<compile_context>
chip_gen: v6e
topology: v6e:2x2x1
jax: 0.10.0
libtpu: 0.0.40
codegen_flags: <defaults>
</compile_context>

<pallas_src>
import functools

import numpy as np
import jax
import jax.numpy as jnp
from jax.experimental import pallas as pl
from jax.experimental.pallas import tpu as pltpu

MID = 512  # hard-coded intermediate channel count in the PyTorch module


def _mam_kernel(x_ref, wd_ref, w1_ref, b1_ref, o_ref, *,
                dilations, TH, W, Cin, Cout, maxd):
    """One (batch, row-tile) per grid step.

    x_ref  : (1, Hp, Wp, Cin)   bf16 zero-padded NHWC input (resident per batch)
    wd_ref : (3, 9*Cin, MID)    bf16 im2col-flattened dilated-conv weights
    w1_ref : (3, MID, Cout)     bf16 1x1 conv weight split per branch
    b1_ref : (1, Cout)          f32  effective bias (conv biases folded through 1x1)
    o_ref  : (1, Cout, TH*W)    f32  lane-dense output tile
    """
    t = pl.program_id(1)
    r0 = pl.multiple_of(t * TH, TH)
    # Row window (with halo) of the padded image covering this output row tile.
    xw = x_ref[0, pl.ds(r0, TH + 2 * maxd), :, :]           # (TH+2*maxd, Wp, Cin)

    n = TH * W
    acc = jnp.broadcast_to(b1_ref[...], (n, Cout)).astype(jnp.float32)

    for br, d in enumerate(dilations):
        # im2col for this branch: 9 shifted (TH, W, Cin) views -> (n, 9*Cin).
        cols = []
        for i in range(3):
            for j in range(3):
                oi = maxd + (i - 1) * d
                oj = maxd + (j - 1) * d
                cols.append(xw[oi:oi + TH, oj:oj + W, :].reshape(n, Cin))
        xcat = jnp.concatenate(cols, axis=1)                 # (n, 9*Cin) bf16

        # Dilated 3x3 conv as a single MXU matmul, K = 9*Cin.
        y = jnp.dot(xcat, wd_ref[br], preferred_element_type=jnp.float32)
        # concat([y0,y1,y2]) @ W1  ==  sum_b y_b @ W1_b   (bias already folded).
        acc = acc + jnp.dot(y.astype(jnp.bfloat16), w1_ref[br],
                            preferred_element_type=jnp.float32)

    # ReLU, then store lane-dense as (Cout, TH*W).
    o_ref[0] = jnp.maximum(acc, 0.0).T.astype(o_ref.dtype)


def _vmem_limit_bytes():
    """Raise the scoped VMEM limit, leaving headroom below physical capacity."""
    try:
        cap = int(pltpu.get_tpu_info().vmem_capacity_bytes)
    except Exception:
        cap = 64 * 1024 * 1024
    return int(min(96 * 1024 * 1024, (cap * 3) // 4))


def multi_atrous_forward(x_nchw, wd_oihw, bd, w1_oihw, b1, dilations):
    """Forward pass matching the PyTorch module.

    x_nchw  : (B, Cin, H, W)
    wd_oihw : list of 3 arrays (MID, Cin, 3, 3)
    bd      : list of 3 arrays (MID,)
    w1_oihw : (Cout, 3*MID, 1, 1)
    b1      : (Cout,)
    returns : (B, Cout, H, W)
    """
    B, Cin, H, W = x_nchw.shape
    Cout = w1_oihw.shape[0]
    maxd = max(dilations)
    Hp, Wp = H + 2 * maxd, W + 2 * maxd

    # Row tile: output block last dim (TH*W) must be 128-aligned (or full H*W).
    TH = 8 if (H % 8 == 0 and (8 * W) % 128 == 0) else H
    n_tiles = H // TH

    # --- layout / dtype glue (plain JAX) -----------------------------------
    x_nhwc = jnp.transpose(x_nchw, (0, 2, 3, 1))
    x_pad = jnp.pad(x_nhwc, ((0, 0), (maxd, maxd), (maxd, maxd), (0, 0)))
    x_pad = x_pad.astype(jnp.bfloat16)

    # (MID, Cin, 3, 3) -> (9*Cin, MID), K ordered (tap i, tap j, channel).
    wd = jnp.stack([jnp.transpose(w, (2, 3, 1, 0)).reshape(9 * Cin, MID)
                    for w in wd_oihw], axis=0).astype(jnp.bfloat16)   # (3, 9*Cin, MID)

    w1_r = w1_oihw.reshape(Cout, 3, MID).astype(jnp.float32)          # (Cout, 3, MID)
    w1 = jnp.transpose(w1_r, (1, 2, 0)).astype(jnp.bfloat16)          # (3, MID, Cout)

    # Fold per-branch conv biases through the 1x1 conv (exact, done in f32).
    bd_stack = jnp.stack(bd, axis=0).astype(jnp.float32)              # (3, MID)
    b1_eff = (b1.astype(jnp.float32)
              + jnp.einsum('bm,cbm->c', bd_stack, w1_r)).reshape(1, Cout)

    kernel = functools.partial(_mam_kernel, dilations=tuple(dilations),
                               TH=TH, W=W, Cin=Cin, Cout=Cout, maxd=maxd)

    flops = 2 * B * H * W * 3 * (9 * Cin * MID + MID * Cout)
    bytes_accessed = (B * Hp * Wp * Cin * 2 + 3 * 9 * Cin * MID * 2
                      + 3 * MID * Cout * 2 + Cout * 4 + B * H * W * Cout * 4)

    out_flat = pl.pallas_call(
        kernel,
        out_shape=jax.ShapeDtypeStruct((B, Cout, H * W), jnp.float32),
        grid_spec=pltpu.PrefetchScalarGridSpec(
            num_scalar_prefetch=0,
            grid=(B, n_tiles),
            in_specs=[
                pl.BlockSpec((1, Hp, Wp, Cin), lambda b, t: (b, 0, 0, 0)),
                pl.BlockSpec((3, 9 * Cin, MID), lambda b, t: (0, 0, 0)),
                pl.BlockSpec((3, MID, Cout), lambda b, t: (0, 0, 0)),
                pl.BlockSpec((1, Cout), lambda b, t: (0, 0)),
            ],
            out_specs=pl.BlockSpec((1, Cout, TH * W), lambda b, t: (b, 0, t)),
        ),
        compiler_params=pltpu.CompilerParams(
            dimension_semantics=("parallel", "parallel"),
            vmem_limit_bytes=_vmem_limit_bytes()),
        cost_estimate=pl.CostEstimate(flops=flops, transcendentals=0,
                                      bytes_accessed=bytes_accessed),
    )(x_pad, wd, w1, b1_eff)

    return out_flat.reshape(B, Cout, H, W)


def reference_forward(x_nchw, wd_oihw, bd, w1_oihw, b1, dilations):
    """Pure-JAX/XLA f32 reference mirroring the PyTorch forward."""
    dn = ('NCHW', 'OIHW', 'NCHW')
    outs = []
    for w, b, d in zip(wd_oihw, bd, dilations):
        y = jax.lax.conv_general_dilated(
            x_nchw, w, window_strides=(1, 1),
            padding=[(d, d), (d, d)], rhs_dilation=(d, d),
            dimension_numbers=dn)
        outs.append(y + b[None, :, None, None])
    cat = jnp.concatenate(outs, axis=1)
    z = jax.lax.conv_general_dilated(cat, w1_oihw, (1, 1), 'VALID',
                                     dimension_numbers=dn)
    z = z + b1[None, :, None, None]
    return jnp.maximum(z, 0.0)


if __name__ == "__main__":
    # Small, module-consistent shapes.
    B, Cin, H, W = 2, 4, 16, 16
    Cout = 4
    dilations = (1, 2, 3)

    key = jax.random.PRNGKey(0)
    ks = jax.random.split(key, 9)

    # Deterministic synthetic parameters (shapes from the module __init__).
    wd_oihw = [jax.random.uniform(ks[i], (MID, Cin, 3, 3), jnp.float32,
                                  minval=-0.1, maxval=0.1) for i in range(3)]
    bd = [jax.random.uniform(ks[3 + i], (MID,), jnp.float32,
                             minval=-0.1, maxval=0.1) for i in range(3)]
    w1_oihw = jax.random.uniform(ks[6], (Cout, 3 * MID, 1, 1), jnp.float32,
                                 minval=-0.05, maxval=0.05)
    b1 = jax.random.uniform(ks[7], (Cout,), jnp.float32,
                            minval=-0.05, maxval=0.05)
    x = jax.random.normal(ks[8], (B, Cin, H, W), jnp.float32)

    out = multi_atrous_forward(x, wd_oihw, bd, w1_oihw, b1, dilations)
    out = jax.block_until_ready(out)

    ref = jax.block_until_ready(
        reference_forward(x, wd_oihw, bd, w1_oihw, b1, dilations))

    np.testing.assert_allclose(np.asarray(out), np.asarray(ref),
                               rtol=2e-2, atol=2e-2)
    print("KERNEL_OK")
</pallas_src>

<mosaic_0001>
module attributes {stable_mosaic.version = 11 : i64} {
  func.func @_mam_kernel(%arg0: i32, %arg1: i32, %arg2: memref<1x22x22x4xbf16, #tpu.memory_space<vmem>>, %arg3: memref<3x36x512xbf16, #tpu.memory_space<vmem>>, %arg4: memref<3x512x4xbf16, #tpu.memory_space<vmem>>, %arg5: memref<1x4xf32, #tpu.memory_space<vmem>>, %arg6: memref<1x4x128xf32, #tpu.memory_space<vmem>>) attributes {dimension_semantics = [#tpu.dimension_semantics<parallel>, #tpu.dimension_semantics<parallel>], iteration_bounds = array<i64: 2, 2>, scalar_prefetch = 0 : i64, scratch_operands = 0 : i64, tpu.core_type = #tpu.core_type<tc>, window_params = [{transform_indices = @transform_0, window_bounds = array<i64: 1, 22, 22, 4>}, {pipeline_mode = #tpu.pipeline_mode<synchronous>, transform_indices = @transform_1, window_bounds = array<i64: 3, 36, 512>}, {pipeline_mode = #tpu.pipeline_mode<synchronous>, transform_indices = @transform_2, window_bounds = array<i64: 3, 512, 4>}, {pipeline_mode = #tpu.pipeline_mode<synchronous>, transform_indices = @transform_3, window_bounds = array<i64: 1, 4>}, {transform_indices = @transform_4, window_bounds = array<i64: 1, 4, 128>}]} {
    %c8_i32 = arith.constant 8 : i32
    %0 = arith.muli %arg1, %c8_i32 : i32
    %1 = tpu.assume_multiple %0, 8 : i32
    %c0 = arith.constant 0 : index
    %2 = arith.index_cast %1 : i32 to index
    %c0_0 = arith.constant 0 : index
    %c0_1 = arith.constant 0 : index
    %3 = vector.load %arg2[%c0, %2, %c0_0, %c0_1] : memref<1x22x22x4xbf16, #tpu.memory_space<vmem>>, vector<1x14x22x4xbf16>
    %4 = vector.shape_cast %3 : vector<1x14x22x4xbf16> to vector<14x22x4xbf16>
    %c0_2 = arith.constant 0 : index
    %c0_3 = arith.constant 0 : index
    %5 = vector.load %arg5[%c0_2, %c0_3] : memref<1x4xf32, #tpu.memory_space<vmem>>, vector<1x4xf32>
    %6 = vector.shape_cast %5 : vector<1x4xf32> to vector<1x4xf32>
    %7 = vector.broadcast %6 : vector<1x4xf32> to vector<128x4xf32>
    %8 = vector.extract_strided_slice %4 {offsets = [2, 2, 0], sizes = [8, 16, 4], strides = [1, 1, 1]} : vector<14x22x4xbf16> to vector<8x16x4xbf16>
    %9 = vector.shape_cast %8 : vector<8x16x4xbf16> to vector<128x4xbf16>
    %10 = vector.extract_strided_slice %4 {offsets = [2, 3, 0], sizes = [8, 16, 4], strides = [1, 1, 1]} : vector<14x22x4xbf16> to vector<8x16x4xbf16>
    %11 = vector.shape_cast %10 : vector<8x16x4xbf16> to vector<128x4xbf16>
    %12 = vector.extract_strided_slice %4 {offsets = [2, 4, 0], sizes = [8, 16, 4], strides = [1, 1, 1]} : vector<14x22x4xbf16> to vector<8x16x4xbf16>
    %13 = vector.shape_cast %12 : vector<8x16x4xbf16> to vector<128x4xbf16>
    %14 = vector.extract_strided_slice %4 {offsets = [3, 2, 0], sizes = [8, 16, 4], strides = [1, 1, 1]} : vector<14x22x4xbf16> to vector<8x16x4xbf16>
    %15 = vector.shape_cast %14 : vector<8x16x4xbf16> to vector<128x4xbf16>
    %16 = vector.extract_strided_slice %4 {offsets = [3, 3, 0], sizes = [8, 16, 4], strides = [1, 1, 1]} : vector<14x22x4xbf16> to vector<8x16x4xbf16>
    %17 = vector.shape_cast %16 : vector<8x16x4xbf16> to vector<128x4xbf16>
    %18 = vector.extract_strided_slice %4 {offsets = [3, 4, 0], sizes = [8, 16, 4], strides = [1, 1, 1]} : vector<14x22x4xbf16> to vector<8x16x4xbf16>
    %19 = vector.shape_cast %18 : vector<8x16x4xbf16> to vector<128x4xbf16>
    %20 = vector.extract_strided_slice %4 {offsets = [4, 2, 0], sizes = [8, 16, 4], strides = [1, 1, 1]} : vector<14x22x4xbf16> to vector<8x16x4xbf16>
    %21 = vector.shape_cast %20 : vector<8x16x4xbf16> to vector<128x4xbf16>
    %22 = vector.extract_strided_slice %4 {offsets = [4, 3, 0], sizes = [8, 16, 4], strides = [1, 1, 1]} : vector<14x22x4xbf16> to vector<8x16x4xbf16>
    %23 = vector.shape_cast %22 : vector<8x16x4xbf16> to vector<128x4xbf16>
    %24 = vector.extract_strided_slice %4 {offsets = [4, 4, 0], sizes = [8, 16, 4], strides = [1, 1, 1]} : vector<14x22x4xbf16> to vector<8x16x4xbf16>
    %25 = vector.shape_cast %24 : vector<8x16x4xbf16> to vector<128x4xbf16>
    %26 = tpu.concatenate %9, %11, %13, %15, %17, %19, %21, %23, %25 in 1 : vector<128x4xbf16>, vector<128x4xbf16>, vector<128x4xbf16>, vector<128x4xbf16>, vector<128x4xbf16>, vector<128x4xbf16>, vector<128x4xbf16>, vector<128x4xbf16>, vector<128x4xbf16> -> vector<128x36xbf16>
    %c0_4 = arith.constant 0 : index
    %c0_5 = arith.constant 0 : index
    %c0_6 = arith.constant 0 : index
    %27 = vector.load %arg3[%c0_4, %c0_5, %c0_6] : memref<3x36x512xbf16, #tpu.memory_space<vmem>>, vector<1x36x512xbf16>
    %28 = vector.shape_cast %27 : vector<1x36x512xbf16> to vector<36x512xbf16>
    %cst = arith.constant dense<0.000000e+00> : vector<128x512xf32>
    %29 = tpu.matmul %26, %28, %cst {dimension_numbers = #tpu.dot_dimension_numbers<[1], [0], [0], [1], [0, 0, 1, 1], [], []>} : vector<128x36xbf16>, vector<36x512xbf16>, vector<128x512xf32> -> vector<128x512xf32>
    %30 = arith.truncf %29 : vector<128x512xf32> to vector<128x512xbf16>
    %c0_7 = arith.constant 0 : index
    %c0_8 = arith.constant 0 : index
    %c0_9 = arith.constant 0 : index
    %31 = vector.load %arg4[%c0_7, %c0_8, %c0_9] : memref<3x512x4xbf16, #tpu.memory_space<vmem>>, vector<1x512x4xbf16>
    %32 = vector.shape_cast %31 : vector<1x512x4xbf16> to vector<512x4xbf16>
    %cst_10 = arith.constant dense<0.000000e+00> : vector<128x4xf32>
    %33 = tpu.matmul %30, %32, %cst_10 {dimension_numbers = #tpu.dot_dimension_numbers<[1], [0], [0], [1], [0, 0, 1, 1], [], []>} : vector<128x512xbf16>, vector<512x4xbf16>, vector<128x4xf32> -> vector<128x4xf32>
    %34 = arith.addf %7, %33 : vector<128x4xf32>
    %35 = vector.extract_strided_slice %4 {offsets = [1, 1, 0], sizes = [8, 16, 4], strides = [1, 1, 1]} : vector<14x22x4xbf16> to vector<8x16x4xbf16>
    %36 = vector.shape_cast %35 : vector<8x16x4xbf16> to vector<128x4xbf16>
    %37 = vector.extract_strided_slice %4 {offsets = [1, 3, 0], sizes = [8, 16, 4], strides = [1, 1, 1]} : vector<14x22x4xbf16> to vector<8x16x4xbf16>
    %38 = vector.shape_cast %37 : vector<8x16x4xbf16> to vector<128x4xbf16>
    %39 = vector.extract_strided_slice %4 {offsets = [1, 5, 0], sizes = [8, 16, 4], strides = [1, 1, 1]} : vector<14x22x4xbf16> to vector<8x16x4xbf16>
    %40 = vector.shape_cast %39 : vector<8x16x4xbf16> to vector<128x4xbf16>
    %41 = vector.extract_strided_slice %4 {offsets = [3, 1, 0], sizes = [8, 16, 4], strides = [1, 1, 1]} : vector<14x22x4xbf16> to vector<8x16x4xbf16>
    %42 = vector.shape_cast %41 : vector<8x16x4xbf16> to vector<128x4xbf16>
    %43 = vector.extract_strided_slice %4 {offsets = [3, 3, 0], sizes = [8, 16, 4], strides = [1, 1, 1]} : vector<14x22x4xbf16> to vector<8x16x4xbf16>
    %44 = vector.shape_cast %43 : vector<8x16x4xbf16> to vector<128x4xbf16>
    %45 = vector.extract_strided_slice %4 {offsets = [3, 5, 0], sizes = [8, 16, 4], strides = [1, 1, 1]} : vector<14x22x4xbf16> to vector<8x16x4xbf16>
    %46 = vector.shape_cast %45 : vector<8x16x4xbf16> to vector<128x4xbf16>
    %47 = vector.extract_strided_slice %4 {offsets = [5, 1, 0], sizes = [8, 16, 4], strides = [1, 1, 1]} : vector<14x22x4xbf16> to vector<8x16x4xbf16>
    %48 = vector.shape_cast %47 : vector<8x16x4xbf16> to vector<128x4xbf16>
    %49 = vector.extract_strided_slice %4 {offsets = [5, 3, 0], sizes = [8, 16, 4], strides = [1, 1, 1]} : vector<14x22x4xbf16> to vector<8x16x4xbf16>
    %50 = vector.shape_cast %49 : vector<8x16x4xbf16> to vector<128x4xbf16>
    %51 = vector.extract_strided_slice %4 {offsets = [5, 5, 0], sizes = [8, 16, 4], strides = [1, 1, 1]} : vector<14x22x4xbf16> to vector<8x16x4xbf16>
    %52 = vector.shape_cast %51 : vector<8x16x4xbf16> to vector<128x4xbf16>
    %53 = tpu.concatenate %36, %38, %40, %42, %44, %46, %48, %50, %52 in 1 : vector<128x4xbf16>, vector<128x4xbf16>, vector<128x4xbf16>, vector<128x4xbf16>, vector<128x4xbf16>, vector<128x4xbf16>, vector<128x4xbf16>, vector<128x4xbf16>, vector<128x4xbf16> -> vector<128x36xbf16>
    %c1 = arith.constant 1 : index
    %c0_11 = arith.constant 0 : index
    %c0_12 = arith.constant 0 : index
    %54 = vector.load %arg3[%c1, %c0_11, %c0_12] : memref<3x36x512xbf16, #tpu.memory_space<vmem>>, vector<1x36x512xbf16>
    %55 = vector.shape_cast %54 : vector<1x36x512xbf16> to vector<36x512xbf16>
    %cst_13 = arith.constant dense<0.000000e+00> : vector<128x512xf32>
    %56 = tpu.matmul %53, %55, %cst_13 {dimension_numbers = #tpu.dot_dimension_numbers<[1], [0], [0], [1], [0, 0, 1, 1], [], []>} : vector<128x36xbf16>, vector<36x512xbf16>, vector<128x512xf32> -> vector<128x512xf32>
    %57 = arith.truncf %56 : vector<128x512xf32> to vector<128x512xbf16>
    %c1_14 = arith.constant 1 : index
    %c0_15 = arith.constant 0 : index
    %c0_16 = arith.constant 0 : index
    %58 = vector.load %arg4[%c1_14, %c0_15, %c0_16] : memref<3x512x4xbf16, #tpu.memory_space<vmem>>, vector<1x512x4xbf16>
    %59 = vector.shape_cast %58 : vector<1x512x4xbf16> to vector<512x4xbf16>
    %cst_17 = arith.constant dense<0.000000e+00> : vector<128x4xf32>
    %60 = tpu.matmul %57, %59, %cst_17 {dimension_numbers = #tpu.dot_dimension_numbers<[1], [0], [0], [1], [0, 0, 1, 1], [], []>} : vector<128x512xbf16>, vector<512x4xbf16>, vector<128x4xf32> -> vector<128x4xf32>
    %61 = arith.addf %34, %60 : vector<128x4xf32>
    %62 = vector.extract_strided_slice %4 {offsets = [0, 0, 0], sizes = [8, 16, 4], strides = [1, 1, 1]} : vector<14x22x4xbf16> to vector<8x16x4xbf16>
    %63 = vector.shape_cast %62 : vector<8x16x4xbf16> to vector<128x4xbf16>
    %64 = vector.extract_strided_slice %4 {offsets = [0, 3, 0], sizes = [8, 16, 4], strides = [1, 1, 1]} : vector<14x22x4xbf16> to vector<8x16x4xbf16>
    %65 = vector.shape_cast %64 : vector<8x16x4xbf16> to vector<128x4xbf16>
    %66 = vector.extract_strided_slice %4 {offsets = [0, 6, 0], sizes = [8, 16, 4], strides = [1, 1, 1]} : vector<14x22x4xbf16> to vector<8x16x4xbf16>
    %67 = vector.shape_cast %66 : vector<8x16x4xbf16> to vector<128x4xbf16>
    %68 = vector.extract_strided_slice %4 {offsets = [3, 0, 0], sizes = [8, 16, 4], strides = [1, 1, 1]} : vector<14x22x4xbf16> to vector<8x16x4xbf16>
    %69 = vector.shape_cast %68 : vector<8x16x4xbf16> to vector<128x4xbf16>
    %70 = vector.extract_strided_slice %4 {offsets = [3, 3, 0], sizes = [8, 16, 4], strides = [1, 1, 1]} : vector<14x22x4xbf16> to vector<8x16x4xbf16>
    %71 = vector.shape_cast %70 : vector<8x16x4xbf16> to vector<128x4xbf16>
    %72 = vector.extract_strided_slice %4 {offsets = [3, 6, 0], sizes = [8, 16, 4], strides = [1, 1, 1]} : vector<14x22x4xbf16> to vector<8x16x4xbf16>
    %73 = vector.shape_cast %72 : vector<8x16x4xbf16> to vector<128x4xbf16>
    %74 = vector.extract_strided_slice %4 {offsets = [6, 0, 0], sizes = [8, 16, 4], strides = [1, 1, 1]} : vector<14x22x4xbf16> to vector<8x16x4xbf16>
    %75 = vector.shape_cast %74 : vector<8x16x4xbf16> to vector<128x4xbf16>
    %76 = vector.extract_strided_slice %4 {offsets = [6, 3, 0], sizes = [8, 16, 4], strides = [1, 1, 1]} : vector<14x22x4xbf16> to vector<8x16x4xbf16>
    %77 = vector.shape_cast %76 : vector<8x16x4xbf16> to vector<128x4xbf16>
    %78 = vector.extract_strided_slice %4 {offsets = [6, 6, 0], sizes = [8, 16, 4], strides = [1, 1, 1]} : vector<14x22x4xbf16> to vector<8x16x4xbf16>
    %79 = vector.shape_cast %78 : vector<8x16x4xbf16> to vector<128x4xbf16>
    %80 = tpu.concatenate %63, %65, %67, %69, %71, %73, %75, %77, %79 in 1 : vector<128x4xbf16>, vector<128x4xbf16>, vector<128x4xbf16>, vector<128x4xbf16>, vector<128x4xbf16>, vector<128x4xbf16>, vector<128x4xbf16>, vector<128x4xbf16>, vector<128x4xbf16> -> vector<128x36xbf16>
    %c2 = arith.constant 2 : index
    %c0_18 = arith.constant 0 : index
    %c0_19 = arith.constant 0 : index
    %81 = vector.load %arg3[%c2, %c0_18, %c0_19] : memref<3x36x512xbf16, #tpu.memory_space<vmem>>, vector<1x36x512xbf16>
    %82 = vector.shape_cast %81 : vector<1x36x512xbf16> to vector<36x512xbf16>
    %cst_20 = arith.constant dense<0.000000e+00> : vector<128x512xf32>
    %83 = tpu.matmul %80, %82, %cst_20 {dimension_numbers = #tpu.dot_dimension_numbers<[1], [0], [0], [1], [0, 0, 1, 1], [], []>} : vector<128x36xbf16>, vector<36x512xbf16>, vector<128x512xf32> -> vector<128x512xf32>
    %84 = arith.truncf %83 : vector<128x512xf32> to vector<128x512xbf16>
    %c2_21 = arith.constant 2 : index
    %c0_22 = arith.constant 0 : index
    %c0_23 = arith.constant 0 : index
    %85 = vector.load %arg4[%c2_21, %c0_22, %c0_23] : memref<3x512x4xbf16, #tpu.memory_space<vmem>>, vector<1x512x4xbf16>
    %86 = vector.shape_cast %85 : vector<1x512x4xbf16> to vector<512x4xbf16>
    %cst_24 = arith.constant dense<0.000000e+00> : vector<128x4xf32>
    %87 = tpu.matmul %84, %86, %cst_24 {dimension_numbers = #tpu.dot_dimension_numbers<[1], [0], [0], [1], [0, 0, 1, 1], [], []>} : vector<128x512xbf16>, vector<512x4xbf16>, vector<128x4xf32> -> vector<128x4xf32>
    %88 = arith.addf %61, %87 : vector<128x4xf32>
    %cst_25 = arith.constant 0.000000e+00 : f32
    %89 = vector.broadcast %cst_25 : f32 to vector<128x4xf32>
    %90 = arith.maximumf %88, %89 : vector<128x4xf32>
    %91 = tpu.transpose %90, [1, 0] : vector<128x4xf32> -> vector<4x128xf32>
    %c0_26 = arith.constant 0 : index
    %c0_27 = arith.constant 0 : index
    %c0_28 = arith.constant 0 : index
    %92 = vector.load %arg6[%c0_26, %c0_27, %c0_28] : memref<1x4x128xf32, #tpu.memory_space<vmem>>, vector<1x4x128xf32>
    %93 = vector.shape_cast %92 : vector<1x4x128xf32> to vector<4x128xf32>
    %94 = vector.shape_cast %91 : vector<4x128xf32> to vector<1x4x128xf32>
    tpu.vector_store %arg6[%c0_26, %c0_27, %c0_28], %94 {strides = array<i32>} : memref<1x4x128xf32, #tpu.memory_space<vmem>>, vector<1x4x128xf32>,
    return
  }
  func.func @transform_0(%arg0: i32, %arg1: i32) -> (i32, i32, i32, i32) {
    %c0_i32 = arith.constant 0 : i32
    %c0_i32_0 = arith.constant 0 : i32
    %c0_i32_1 = arith.constant 0 : i32
    %c0_i32_2 = arith.constant 0 : i32
    return %arg0, %c0_i32, %c0_i32_0, %c0_i32_1 : i32, i32, i32, i32
  }
  func.func @transform_1(%arg0: i32, %arg1: i32) -> (i32, i32, i32) {
    %c0_i32 = arith.constant 0 : i32
    %c0_i32_0 = arith.constant 0 : i32
    %c0_i32_1 = arith.constant 0 : i32
    %c0_i32_2 = arith.constant 0 : i32
    return %c0_i32, %c0_i32_0, %c0_i32_1 : i32, i32, i32
  }
  func.func @transform_2(%arg0: i32, %arg1: i32) -> (i32, i32, i32) {
    %c0_i32 = arith.constant 0 : i32
    %c0_i32_0 = arith.constant 0 : i32
    %c0_i32_1 = arith.constant 0 : i32
    %c0_i32_2 = arith.constant 0 : i32
    return %c0_i32, %c0_i32_0, %c0_i32_1 : i32, i32, i32
  }
  func.func @transform_3(%arg0: i32, %arg1: i32) -> (i32, i32) {
    %c0_i32 = arith.constant 0 : i32
    %c0_i32_0 = arith.constant 0 : i32
    %c0_i32_1 = arith.constant 0 : i32
    return %c0_i32, %c0_i32_0 : i32, i32
  }
  func.func @transform_4(%arg0: i32, %arg1: i32) -> (i32, i32, i32) {
    %c0_i32 = arith.constant 0 : i32
    %c0_i32_0 = arith.constant 0 : i32
    return %arg0, %c0_i32, %arg1 : i32, i32, i32
  }
}

</mosaic_0001>

<bundles_post_ra>
// kernel: tpu_custom_call.1
= control target key start
LH: loop header
LB: loop body
LE: loop exit
PB: predicated region body
PF: predicated region fallthrough
CT: control target
= control target key end

     0   :  { %9 = vsyncpa [#allocation3], 0  ;;  %s8701_s0 = inlined_call_operand.vmem [shape: bf16[2,22,22,4], index: 0, kind: input, shape index: {}]   ;;  %s8702_s1 = inlined_call_operand.vmem [shape: bf16[3,36,512], index: 1, kind: input, shape index: {}]   ;;  %s8703_s2 = inlined_call_operand.vmem [shape: bf16[3,512,4], index: 2, kind: input, shape index: {}]   ;;  %s8704_s3 = inlined_call_operand.vmem [shape: f32[1,4], index: 3, kind: input, shape index: {}]   ;;  %s8705_s4 = inlined_call_operand.hbm [shape: f32[2,4,256], index: 4, kind: output, shape index: {}]  }
   0x1   :  { %11 = vsyncpa [#allocation3 + $0x1], 0  ;;  %s6012_s15 = smov 0   ;;  %s6014_s16 = smov 0  }
   0x2   :  { %s6016_s17 = smov 0   ;;  %s6018_s18 = smov 0  }
   0x3   :  { %s6020_s19 = smov 0   ;;  %s6022_s20 = smov 0  }
   0x4   :  { %s6024_s21 = smov 0   ;;  %s6026_s22 = smov 0  }
   0x5 LB: > { %s4749_s23 = sadd.s32 4294967295, %s5975_s22   ;;  %s4750_s24 = sadd.s32 4294967294, %s5975_s22   ;;  %s5975_s22 = sphi %s6026_s22, %s17_s22   ;;  %s5971_s21 = sphi %s6024_s21, %s9066_s21   ;;  %s5967_s20 = sphi %s6022_s20, %s9065_s20   ;;  %s5963_s19 = sphi %s6020_s19, %s9064_s19   ;;  %s5959_s18 = sphi %s6018_s18, %s9063_s18   ;;  %s5955_s17 = sphi %s6016_s17, %s9062_s17   ;;  %s5951_s16 = sphi %s6014_s16, %s9061_s16   ;;  %s5947_s15 = sphi %s6012_s15, %s9060_s15  }
   0x6   : > { %s26_s25 = sadd.s32 1, %s5967_s20  ;;  %s29_s26 = sadd.s32 1, %s5971_s21 }
   0x7   : > { %p27_p0 = scmp.ge.s32.totalorder %s26_s25, 2  ;;  %p137_p1 = scmp.ne.s32.totalorder %s5955_s17, %s5951_s16 }
   0x8   : > { %p138_p2 = scmp.eq.s32.totalorder %s4749_s23, 3  ;;  %p143_p5 = scmp.ne.s32.totalorder %s5951_s16, %s5947_s15 }
   0x9   : > { %s9068_s25 = smov (%p27_p0, %s26_s25), 0  ;;  %s9070_s26 = smov (!%p27_p0, %s29_s26), %s5971_s21 }
   0xa   : > { %s123_s27 = ssub.s32 %s5967_s20, %s9068_s25  ;;  %p6063_p3 = por %p138_p2, %p137_p1 }
   0xb   : > { %p31_p4 = scmp.ge.s32.totalorder %s9070_s26, 2  ;;  %p144_p6 = scmp.eq.s32.totalorder %s4750_s24, 3 }
   0xc   : > { %p4753_p7 = scmp.ge.s32.totalorder %s5975_s22, 1  ;;  %p179_p9 = scmp.lt.s32.totalorder %s5975_s22, 5 }
   0xd   : > { %s9072_s26 = smov (%p31_p4, %s9070_s26), 0  ;;  %p6072_p8 = por %p144_p6, %p143_p5 }
   0xe   : > { %s122_s30 = ssub.s32 %s5971_s21, %s9072_s26  ;;  %s127_s5 = sadd.s32 1, %s5955_s17 }
   0xf   : > { %s124_s6 = sor.u32 %s123_s27, %s122_s30  ;;  %p180_p10 = pnand %p4753_p7, %p179_p9 }
  0x10   : > { %p125_p11 = scmp.eq.s32.totalorder %s124_s6, 0 }
  0x11   : > { %183 = sbr.rel (%p180_p10) target bundleno = 1307 (0x51b), region = 36 }
  0x12   : > { %s6081_s7 = scalar_select %p125_p11, %s5955_s17, %s127_s5  }
  0x16   : > { %p205_p12 = scmp.lt.s32.totalorder %s5963_s19, 1  ;;  %vm288_vm0 = vcmask 1042432   ;;  %vm289_vm1 = vcmask 1046532   ;;  %s5219_s9 = smul.u32 96, %s5959_s18  ;;  %vm574_vm3 = vcmask 1041408   ;;  %vm575_vm4 = vcmask 1045508  }
  0x17   : > { %vm6086_vm2 = vmor %vm288_vm0, %vm289_vm1  ;;  %vm347_vm6 = vsmask.f32 2304  ;;  %vm348_vm7 = vsmask.f32 6416  ;;  %s8752_s23 = smov 12   ;;  %s5978_s24 = smov 8  }
  0x18   : > { %s206_s8 = scalar_select %p205_p12, %s5963_s19, 1  ;;  %vm6114_vm5 = vmor %vm574_vm3, %vm575_vm4  ;;  %vm2018_vm9 = vsmask.f32 1280  ;;  %vm2019_vm10 = vsmask.f32 5392  ;;  %vm941_vm14 = vcmask 31744  }
  0x19   : > { %s8750_s27 = smov 24   ;;  %s8823_s30 = smov 20   ;;  %vm6202_vm8 = vmor %vm347_vm6, %vm348_vm7  ;;  %vm1899_vm12 = vsmask.f32 3328  ;;  %vm1900_vm13 = vsmask.f32 7440 }
  0x1a   : > { %s5604_s10 = smul.u32 264, %s206_s8  ;;  %s5981_s5 = smov 32   ;;  %vm6818_vm11 = vmor %vm2018_vm9, %vm2019_vm10  ;;  %vm966_vm15 = vcmask 64512   ;;  %vm983_vm0 = vcmask 97280   ;;  %vm1000_vm1 = vcmask 130048   ;;  %vm1051_vm6 = vcmask 228352  }
  0x1b   : > { %s8814_s6 = smov 4   ;;  %s5983_s8 = smov 16   ;;  %vm6908_vm4 = vmor %vm1899_vm12, %vm1900_vm13  ;;  %vm1068_vm7 = vcmask 261120   ;;  %vm1145_vm9 = vcmask 293888   ;;  %vm3373_vm10 = vcmask 1040384   ;;  %vm3374_vm12 = vcmask 1044484  }
  0x1c   : > { %s209_s13 = scalar_lea.vmem %s8701_s0, %s5604_s10  ;;  %s8898_s10 = smov 12   ;;  %vm7474_vm13 = vmor %vm3373_vm10, %vm3374_vm12 }
  0x1d   : > { %s6093_s14 = scalar_lea.vmem %s209_s13, %s5219_s9  ;;  %s8815_s9 = smov 28  }
  0x1e   : > { %v6096_v1 = vld [vmem:[%s6093_s14 + $0x24] sm:$0xf]  ;;  %v6099_v2 = vld [vmem:[%s6093_s14 + $0x28] sm:$0xf]  ;;  %v6102_v3 = vld [vmem:[%s6093_s14 + $0x2c] sm:$0x7] }
  0x1f   : > { %v4761_v4 = vrot.slane %v6096_v1, 9  ;;  %v300_v5 = vrot.slane %v6099_v2, 5  ;;  %v303_v6 = vrot.slane %v6102_v3, 5  ;;  %v221_v7 = vld [vmem:[%s6093_s14 + $0x18] sm:$0xf]  ;;  %v4769_v8 = vrot.slane %v6096_v1, 10 }
  0x20   : > { %v222_v9 = vld [vmem:[%s6093_s14 + $0x1c] sm:$0xf]  ;;  %v6111_v10 = vld [vmem:[%s6093_s14 + $0x20] sm:$0x7]  ;;  %v4768_v12 = vrot.slane %v221_v7, 10  ;;  %v586_v13 = vrot.slane %v6099_v2, 6 }
  0x21   : > { %8841 = vst [vmem:[#allocation5_spill] sm:$0xff] %v6111_v10  ;;  %v301_v14 = vsel %vm6086_vm2, %v4761_v4, %v300_v5  ;;  %v302_v15 = vrot.slane %v300_v5, 4  ;;  %v579_v16 = vrot.slane %v222_v9, 6  ;;  %v582_v17 = vrot.slane %v6111_v10, 6  ;;  %v6123_v18 = vld [vmem:[%s6093_s14 + $0x30] sm:$0xf] }
  0x22   : > { %v6126_v19 = vld [vmem:[%s6093_s14 + $0x34] sm:$0xf]  ;;  %v6129_v20 = vld [vmem:[%s6093_s14 + $0x38] sm:$0x7]  ;;  %v4762_v21 = vrot.slane %v6123_v18, 9  ;;  %v587_v22 = vsel %vm6114_vm5, %v4769_v8, %v586_v13  ;;  %v588_v23 = vrot.slane %v586_v13, 4 }
  0x23   : > { %8844 = vst [vmem:[#allocation6_spill] sm:$0xff] %v6129_v20  ;;  %v304_v24 = vsel %vm6086_vm2, %v302_v15, %v303_v6  ;;  %v580_v25 = vsel %vm6114_vm5, %v4768_v12, %v579_v16  ;;  %v581_v26 = vrot.slane %v579_v16, 4  ;;  %v307_v27 = vrot.slane %v6126_v19, 5  ;;  %s8899_s11 = smov 24   ;;  %s5215_s13 = sshll.u32 %s5963_s19, 1 }
  0x24   : > { %v6139_v28 = vcombine.low %v301_v14, %v304_v24  ;;  %v310_v29 = vrot.slane %v6129_v20, 5  ;;  %v589_v30 = vrot.slane %v6102_v3, 6  ;;  %v4770_v31 = vrot.slane %v6123_v18, 10 }
  0x25   : > { %v583_v32 = vsel %vm6114_vm5, %v581_v26, %v582_v17  ;;  %v308_v33 = vsel %vm6086_vm2, %v4762_v21, %v307_v27  ;;  %v309_v34 = vrot.slane %v307_v27, 4  ;;  %v593_v35 = vrot.slane %v6126_v19, 6 }
  0x26   : > { %8845 = vst [vmem:[#allocation7_spill] sm:$0xff] %v6139_v28  ;;  %830 = vrot.lane.b32.xlu1 %v6139_v28, %s8752_s23  ;;  %v4796_v36 = vcombine.low %v580_v25, %v583_v32  ;;  %v590_v37 = vsel %vm6114_vm5, %v588_v23, %v589_v30  ;;  %v596_v38 = vrot.slane %v6129_v20, 6  ;;  %v6154_v39 = vshrl.u32 %v221_v7, 16  ;;  %v239_v28 = vld [vmem:[%s6093_s14 + $0x60] sm:$0xf] }
  0x27   : > { %v311_v40 = vsel %vm6086_vm2, %v309_v34, %v310_v29  ;;  %v4797_v41 = vcombine.low %v587_v22, %v590_v37  ;;  %v594_v42 = vsel %vm6114_vm5, %v4770_v31, %v593_v35  ;;  %v595_v43 = vrot.slane %v593_v35, 4 }
  0x28   : > { %811 = vrot.lane.b32.xlu0 %v4796_v36, %s5978_s24  ;;  %v6161_v44 = vcombine.low %v308_v33, %v311_v40  ;;  %v353_v45 = vrot.slane %v6154_v39, 5  ;;  %v6164_v46 = vshll.u32 %v221_v7, 16  ;;  %v6166_v47 = vshrl.u32 %v222_v9, 16  ;;  %v230_v33 = vld [vmem:[%s6093_s14 + $0x3c] sm:$0xf] }
  0x29   : > { %v597_v48 = vsel %vm6114_vm5, %v595_v43, %v596_v38  ;;  %v6170_v49 = vshll.u32 %v222_v9, 16  ;;  %v8708_v50 = vshrl.u32 %v6111_v10, 16  ;;  %v6174_v51 = vshll.u32 %v6111_v10, 16  ;;  %v6246_v38 = vld [vmem:[%s6093_s14 + $0x44] sm:$0x7] }
  0x2a   : > { %8846 = vst [vmem:[#allocation8_spill] sm:$0xff] %v6161_v44  ;;  %8847 = vst [vmem:[#allocation9_spill] sm:$0xff] %v6164_v46  ;;  %887 = vrot.lane.b32.xlu1 %v6161_v44, %s8750_s27  ;;  %v6178_v52 = vcombine.low %v594_v42, %v597_v48  ;;  %v356_v53 = vrot.slane %v6164_v46, 6  ;;  %v362_v54 = vrot.slane %v6166_v47, 5  ;;  %v6183_v55 = vshrl.u32 %v6096_v1, 16 }
  0x2b   : > { %8848 = vst [vmem:[#allocation10_spill] sm:$0xff] %v6166_v47  ;;  %8849 = vst [vmem:[#allocation11_spill] sm:$0xff] %v6170_v49  ;;  %v365_v56 = vrot.slane %v6170_v49, 6  ;;  %v372_v57 = vrot.slane %v8708_v50, 5  ;;  %v375_v58 = vrot.slane %v6174_v51, 6  ;;  %v6190_v59 = vshll.u32 %v6096_v1, 16 }
  0x2c   : > { %8850 = vst [vmem:[#allocation12_spill] sm:$0xff] %v6174_v51  ;;  %868 = vrot.lane.b32.xlu0 %v4797_v41, %s8823_s30  ;;  %v357_v60 = vor.u32 %v356_v53, %v353_v45  ;;  %v381_v61 = vrot.slane %v6183_v55, 5  ;;  %v6195_v62 = vshrl.u32 %v6099_v2, 16  ;;  %v6198_v63 = vshll.u32 %v6099_v2, 16 }
  0x2d   : > { %v366_v1 = vor.u32 %v365_v56, %v362_v54  ;;  %v376_v5 = vor.u32 %v375_v58, %v372_v57  ;;  %v384_v6 = vrot.slane %v6190_v59, 6  ;;  %v8710_v7 = vshrl.u32 %v6102_v3, 16 }
  0x2e   : > { %925 = vrot.lane.b32.xlu1 %v6178_v52, %s5981_s5  ;;  %v358_v8 = vrot.slane %v357_v60, 4  ;;  %v390_v2 = vrot.slane %v6195_v62, 5  ;;  %v393_v9 = vrot.slane %v6198_v63, 6  ;;  %v6213_v12 = vshll.u32 %v6102_v3, 16 }
  0x2f   : > { %v368_v13 = vrot.slane %v366_v1, 4  ;;  %v385_v14 = vor.u32 %v384_v6, %v381_v61  ;;  %v400_v15 = vrot.slane %v8710_v7, 5  ;;  %v6218_v16 = vshrl.u32 %v6123_v18, 16 }
  0x30   : > { %832 = vrot.lane.b32.xlu0 %v6161_v44, %s8752_s23  ;;  %v367_v17 = vsel %vm6202_vm8, %v358_v8, %v366_v1  ;;  %v394_v21 = vor.u32 %v393_v9, %v390_v2  ;;  %v403_v22 = vrot.slane %v6213_v12, 6  ;;  %v6226_v23 = vshll.u32 %v6123_v18, 16  ;;  %v231_v18 = vld [vmem:[%s6093_s14 + $0x40] sm:$0xf] }
  0x31   : > { %v377_v24 = vsel %vm6202_vm8, %v368_v13, %v376_v5  ;;  %v386_v25 = vrot.slane %v385_v14, 4  ;;  %v409_v26 = vrot.slane %v6218_v16, 5  ;;  %v6232_v27 = vshrl.u32 %v6126_v19, 16 }
  0x32   : > { %813 = vrot.lane.b32.xlu1 %v4797_v41, %s5978_s24  ;;  %v4788_v29 = vcombine.low %v367_v17, %v377_v24  ;;  %v396_v30 = vrot.slane %v394_v21, 4  ;;  %v404_v31 = vor.u32 %v403_v22, %v400_v15  ;;  %v412_v32 = vrot.slane %v6226_v23, 6 }
  0x33   : > { %v395_v34 = vsel %vm6202_vm8, %v386_v25, %v394_v21  ;;  %v418_v35 = vrot.slane %v6232_v27, 5  ;;  %v6242_v36 = vshll.u32 %v6126_v19, 16  ;;  %v8707_v37 = vshrl.u32 %v6129_v20, 16 }
  0x34   : > { %771 = vrot.lane.b32.xlu0 %v4788_v29, %s8814_s6  ;;  %v405_v40 = vsel %vm6202_vm8, %v396_v30, %v404_v31  ;;  %v413_v41 = vor.u32 %v412_v32, %v409_v26  ;;  %v6252_v42 = vshll.u32 %v6129_v20, 16  ;;  %v4763_v43 = vrot.slane %v230_v33, 9 }
  0x35   : > { %v4789_v45 = vcombine.low %v395_v34, %v405_v40  ;;  %v421_v48 = vrot.slane %v6242_v36, 6  ;;  %v428_v19 = vrot.slane %v8707_v37, 5  ;;  %v314_v53 = vrot.slane %v231_v18, 5 }
  0x36   : > { %8853 = vst [vmem:[#allocation13_spill] sm:$0xff] %v6252_v42  ;;  %v414_v54 = vrot.slane %v413_v41, 4  ;;  %v431_v56 = vrot.slane %v6252_v42, 6  ;;  %v317_v57 = vrot.slane %v6246_v38, 5  ;;  %v600_v61 = vrot.slane %v231_v18, 6 }
  0x37   : > { %849 = vrot.lane.b32.xlu1 %v4789_v45, %s5983_s8  ;;  %v422_v58 = vor.u32 %v421_v48, %v418_v35  ;;  %v316_v60 = vrot.slane %v314_v53, 4  ;;  %v4771_v5 = vrot.slane %v230_v33, 10  ;;  %v6260_v6 = vshrl.u32 %v230_v33, 16  ;;  %v233_v41 = vld [vmem:[%s6093_s14 + $0x48] sm:$0xf] }
  0x38   : > { %v432_v1 = vor.u32 %v431_v56, %v428_v19  ;;  %v6262_v8 = vshll.u32 %v230_v33, 16  ;;  %v315_v13 = vsel %vm6086_vm2, %v4763_v43, %v314_v53  ;;  %v603_v14 = vrot.slane %v6246_v38, 6 }
  0x39   : > { %v423_v2 = vsel %vm6202_vm8, %v414_v54, %v422_v58  ;;  %v424_v9 = vrot.slane %v422_v58, 4  ;;  %v318_v15 = vsel %vm6086_vm2, %v316_v60, %v317_v57  ;;  %v602_v17 = vrot.slane %v600_v61, 4  ;;  %v234_v54 = vld [vmem:[%s6093_s14 + $0x4c] sm:$0xf]  ;;  %v6299_v57 = vld [vmem:[%s6093_s14 + $0x50] sm:$0x7] }
  0x3a   : > { %v437_v21 = vrot.slane %v6260_v6, 5  ;;  %v440_v22 = vrot.slane %v6262_v8, 6  ;;  %v6275_v25 = vshrl.u32 %v231_v18, 16  ;;  %v6277_v26 = vshll.u32 %v231_v18, 16  ;;  %8855 = vst [vmem:[#allocation15_spill] sm:$0xff] %v6299_v57 }
  0x3b   : > { %v433_v24 = vsel %vm6202_vm8, %v424_v9, %v432_v1  ;;  %v8709_v29 = vshrl.u32 %v6246_v38, 16  ;;  %v6281_v32 = vshll.u32 %v6246_v38, 16  ;;  %v6289_v18 = vcombine.low %v315_v13, %v318_v15 }
  0x3c   : > { %v4790_v30 = vcombine.low %v423_v2, %v433_v24  ;;  %v441_v31 = vor.u32 %v440_v22, %v437_v21  ;;  %v446_v33 = vrot.slane %v6275_v25, 5  ;;  %v449_v34 = vrot.slane %v6277_v26, 6 }
  0x3d   : > { %v456_v35 = vrot.slane %v8709_v29, 5  ;;  %8854 = vst [vmem:[#allocation14_spill] sm:$0xff] %v6289_v18  ;;  %v459_v40 = vrot.slane %v6281_v32, 6  ;;  %v601_v43 = vsel %vm6114_vm5, %v4771_v5, %v600_v61  ;;  %v604_v48 = vsel %vm6114_vm5, %v602_v17, %v603_v14 }
  0x3e   : > { %906 = vrot.lane.b32.xlu0 %v4790_v30, %s8815_s9  ;;  %851 = vrot.lane.b32.xlu1 %v4790_v30, %s5983_s8  ;;  %v442_v19 = vrot.slane %v441_v31, 4  ;;  %v450_v53 = vor.u32 %v449_v34, %v446_v33  ;;  %v6304_v60 = vcombine.low %v601_v43, %v604_v48  ;;  %v321_v1 = vrot.slane %v234_v54, 5 }
  0x3f   : > { %v460_v56 = vor.u32 %v459_v40, %v456_v35  ;;  %v6306_v2 = vshrl.u32 %v233_v41, 16  ;;  %v6308_v61 = vshll.u32 %v233_v41, 16  ;;  %v6314_v13 = vshrl.u32 %v234_v54, 16 }
  0x40   : > { %v452_v58 = vrot.slane %v450_v53, 4  ;;  %v451_v5 = vsel %vm6202_vm8, %v442_v19, %v450_v53  ;;  %v6316_v14 = vshll.u32 %v234_v54, 16  ;;  %v324_v15 = vrot.slane %v6299_v57, 5 }
  0x41   : > { %8856 = vst [vmem:[#allocation16_spill] sm:$0xff] %v6306_v2  ;;  %8857 = vst [vmem:[#allocation17_spill] sm:$0xff] %v6308_v61  ;;  %v607_v17 = vrot.slane %v234_v54, 6  ;;  %v323_v22 = vrot.slane %v321_v1, 4  ;;  %v465_v24 = vrot.slane %v6306_v2, 5  ;;  %v468_v31 = vrot.slane %v6308_v61, 6 }
  0x42   : > { %773 = vrot.lane.b32.xlu0 %v4789_v45, %s8814_s6  ;;  %889 = vrot.lane.b32.xlu1 %v6289_v18, %s8750_s27  ;;  %v461_v9 = vsel %vm6202_vm8, %v452_v58, %v460_v56  ;;  %8858 = vst [vmem:[#allocation18_spill] sm:$0xff] %v6314_v13  ;;  %8859 = vst [vmem:[#allocation19_spill] sm:$0xff] %v6316_v14  ;;  %v4764_v45 = vrot.slane %v233_v41, 9  ;;  %v474_v33 = vrot.slane %v6314_v13, 5  ;;  %v477_v34 = vrot.slane %v6316_v14, 6 }
  0x43   : > { %v6323_v21 = vcombine.low %v451_v5, %v461_v9  ;;  %v8706_v35 = vshrl.u32 %v6299_v57, 16  ;;  %v6331_v40 = vshll.u32 %v6299_v57, 16  ;;  %v4772_v43 = vrot.slane %v233_v41, 10  ;;  %v237_v9 = vld [vmem:[%s6093_s14 + $0x58] sm:$0xf] }
  0x44   : > { %v322_v48 = vsel %vm6086_vm2, %v4764_v45, %v321_v1  ;;  %v325_v19 = vsel %vm6086_vm2, %v323_v22, %v324_v15  ;;  %v609_v53 = vrot.slane %v607_v17, 4  ;;  %v610_v54 = vrot.slane %v6299_v57, 6  ;;  %v5844_v2 = vld [vmem:[%s6093_s14 + $0x20] sm:$0x7] }
  0x45   : > { %8860 = vst [vmem:[#allocation20_spill] sm:$0xff] %v6331_v40  ;;  %v469_v56 = vor.u32 %v468_v31, %v465_v24  ;;  %v478_v58 = vor.u32 %v477_v34, %v474_v33  ;;  %v484_v41 = vrot.slane %v8706_v35, 5  ;;  %v487_v5 = vrot.slane %v6331_v40, 6  ;;  %v236_v31 = vld [vmem:[%s6093_s14 + $0x54] sm:$0xf] }
  0x46   : > { %870 = vrot.lane.b32.xlu0 %v6178_v52, %s8823_s30  ;;  %927 = vrot.lane.b32.xlu1 %v6304_v60, %s5981_s5  ;;  %v608_v1 = vsel %vm6114_vm5, %v4772_v43, %v607_v17  ;;  %v611_v45 = vsel %vm6114_vm5, %v609_v53, %v610_v54  ;;  %v6357_v33 = vld [vmem:[%s6093_s14 + $0x5c] sm:$0x7]  ;;  %v328_v34 = vrot.slane %v237_v9, 5  ;;  %v6365_v17 = vshrl.u32 %v236_v31, 16 }
  0x47   : > { %v470_v15 = vrot.slane %v469_v56, 4  ;;  %v480_v22 = vrot.slane %v478_v58, 4  ;;  %v488_v24 = vor.u32 %v487_v5, %v484_v41  ;;  %8862 = vst [vmem:[#allocation22_spill] sm:$0xff] %v6357_v33  ;;  %v6367_v43 = vshll.u32 %v236_v31, 16  ;;  %v6534_v40 = vld [vmem:[%s6093_s14 + $0x7c] sm:$0xf] }
  0x48   : > { %8863 = vst [vmem:[#allocation23_spill] sm:$0xff] %v6365_v17  ;;  %v6373_v53 = vshrl.u32 %v237_v9, 16  ;;  %v6375_v54 = vshll.u32 %v237_v9, 16  ;;  %v4765_v56 = vrot.slane %v236_v31, 9  ;;  %v331_v41 = vrot.slane %v6357_v33, 5 }
  0x49   : > { %8864 = vst [vmem:[#allocation24_spill] sm:$0xff] %v6367_v43  ;;  %v330_v5 = vrot.slane %v328_v34, 4  ;;  %v6390_v35 = vshll.u32 %v6357_v33, 16  ;;  %v4773_v37 = vrot.slane %v236_v31, 10  ;;  %v617_v29 = vrot.slane %v6357_v33, 6 }
  0x4a   : > { %908 = vrot.lane.b32.xlu0 %v6323_v21, %s8815_s9  ;;  %815 = vrot.lane.b32.xlu1 %v6178_v52, %s5978_s24  ;;  %v6348_v52 = vcombine.low %v322_v48, %v325_v19  ;;  %v479_v48 = vsel %vm6202_vm8, %v470_v15, %v478_v58  ;;  %v489_v19 = vsel %vm6202_vm8, %v480_v22, %v488_v24  ;;  %v493_v58 = vrot.slane %v6365_v17, 5 }
  0x4b   : > { %8865 = vst [vmem:[#allocation25_spill] sm:$0xff] %v6373_v53  ;;  %8866 = vst [vmem:[#allocation26_spill] sm:$0xff] %v6375_v54  ;;  %v496_v15 = vrot.slane %v6367_v43, 6  ;;  %v502_v22 = vrot.slane %v6373_v53, 5  ;;  %v505_v24 = vrot.slane %v6375_v54, 6  ;;  %v8868_v31 = vshrl.u32 %v6357_v33, 16 }
  0x4c   : > { %8861 = vst [vmem:[#allocation21_spill] sm:$0xff] %v6348_v52  ;;  %8867 = vst [vmem:[#allocation27_spill] sm:$0xff] %v6390_v35  ;;  %v515_v44 = vrot.slane %v6390_v35, 6  ;;  %v240_v54 = vld [vmem:[%s6093_s14 + $0x64] sm:$0xf]  ;;  %v4774_v35 = vrot.slane %v239_v28, 10 }
  0x4d   : > { %v497_v7 = vor.u32 %v496_v15, %v493_v58  ;;  %v6416_v15 = vshrl.u32 %v239_v28, 16  ;;  %v6468_v53 = vld [vmem:[%s6093_s14 + $0x70] sm:$0xf]  ;;  %v6474_v43 = vld [vmem:[%s6093_s14 + $0x74] sm:$0x7]  ;;  %v8795_v47 = vmov 0  }
  0x4e   : > { %775 = vrot.lane.b32.xlu0 %v4790_v30, %s8814_s6  ;;  %853 = vrot.lane.b32.xlu1 %v6323_v21, %s5983_s8  ;;  %v6363_v30 = vcombine.low %v608_v1, %v611_v45  ;;  %v614_v1 = vrot.slane %v237_v9, 6  ;;  %v6382_v45 = vcombine.low %v479_v48, %v489_v19  ;;  %v329_v48 = vsel %vm6086_vm2, %v4765_v56, %v328_v34 }
  0x4f   : > { %v332_v19 = vsel %vm6086_vm2, %v330_v5, %v331_v41  ;;  %v506_v9 = vor.u32 %v505_v24, %v502_v22  ;;  %v498_v41 = vrot.slane %v497_v7, 4  ;;  %8870 = vst [vmem:[#allocation29_spill] sm:$0xff] %v6416_v15  ;;  %v6418_v22 = vshll.u32 %v239_v28, 16  ;;  %v6421_v24 = vld [vmem:[%s6093_s14 + $0x68] sm:$0x7]  ;;  %8876 = vst [vmem:[#allocation35_spill] sm:$0xff] %v6474_v43  ;;  %1207 = vmatprep.mubr.bf16.mxu0 %v8795_v47 }
  0x50   : > { %v616_v50 = vrot.slane %v614_v1, 4  ;;  %v615_v34 = vsel %vm6114_vm5, %v4773_v37, %v614_v1  ;;  %8872 = vst [vmem:[#allocation31_spill] sm:$0xff] %v6421_v24  ;;  %v6433_v7 = vshrl.u32 %v240_v54, 16  ;;  %v338_v1 = vrot.slane %v6421_v24, 5  ;;  %1320 = vmatprep.mubr.bf16.mxu1 %v8795_v47 }
  0x51   : > { %v508_v5 = vrot.slane %v506_v9, 4  ;;  %8871 = vst [vmem:[#allocation30_spill] sm:$0xff] %v6418_v22 }
  0x52   : > { %834 = vrot.lane.b32.xlu0 %v6289_v18, %s8752_s23  ;;  %891 = vrot.lane.b32.xlu1 %v6348_v52, %s8750_s27  ;;  %v512_v18 = vrot.slane %v8868_v31, 5  ;;  %v618_v56 = vsel %vm6114_vm5, %v616_v50, %v617_v29  ;;  %v507_v50 = vsel %vm6202_vm8, %v498_v41, %v506_v9  ;;  %8873 = vst [vmem:[#allocation32_spill] sm:$0xff] %v6433_v7  ;;  %v6435_v29 = vshll.u32 %v240_v54, 16  ;;  %v6443_v31 = vld [vmem:[%s8702_s1 + $0x40] sm:$0x33] }
  0x53   : > { %v6427_v37 = vcombine.low %v615_v34, %v618_v56  ;;  %v621_v34 = vrot.slane %v240_v54, 6  ;;  %v6446_v56 = vld [vmem:[%s6093_s14 + $0x6c] sm:$0xf] }
  0x54   : > { %v516_v58 = vor.u32 %v515_v44, %v512_v18  ;;  %8874 = vst [vmem:[#allocation33_spill] sm:$0xff] %v6435_v29  ;;  %v4766_v18 = vrot.slane %v239_v28, 9  ;;  %v6451_v41 = vld [vmem:[%s8702_s1 + $0x48] sm:$0x33]  ;;  %v6483_v28 = vshrl.u32 %v6446_v56, 16  ;;  %v4767_v57 = vrot.slane %v6446_v56, 9 }
  0x56   : > { %872 = vrot.lane.b32.xlu0 %v6304_v60, %s8823_s30  ;;  %929 = vrot.lane.b32.xlu1 %v6363_v30, %s5981_s5  ;;  %v517_v44 = vsel %vm6202_vm8, %v508_v5, %v516_v58  ;;  %v530_v58 = vrot.slane %v6433_v7, 5  ;;  %v624_v7 = vrot.slane %v6421_v24, 6  ;;  %8877 = vst [vmem:[#allocation36_spill] sm:$0xff] %v6483_v28 }
  0x57   : > { %v6457_v5 = vcombine.low %v507_v50, %v517_v44  ;;  %v623_v44 = vrot.slane %v621_v34, 4 }
  0x5a   : > { %910 = vrot.lane.b32.xlu0 %v6382_v45, %s8815_s9  ;;  %817 = vrot.lane.b32.xlu1 %v6304_v60, %s5978_s24  ;;  %v6410_v60 = vcombine.low %v329_v48, %v332_v19  ;;  %v521_v48 = vrot.slane %v6416_v15, 5  ;;  %v524_v19 = vrot.slane %v6418_v22, 6  ;;  %v6463_v22 = vshll.u32 %v6421_v24, 16 }
  0x5c   : > { %8869 = vst [vmem:[#allocation28_spill] sm:$0xff] %v6410_v60  ;;  %8875 = vst [vmem:[#allocation34_spill] sm:$0xff] %v6463_v22  ;;  %v525_v33 = vor.u32 %v524_v19, %v521_v48  ;;  %v8879_v48 = vshrl.u32 %v6421_v24, 16  ;;  %v6507_v24 = vshll.u32 %v6468_v53, 16 }
  0x5e   : > { %777 = vrot.lane.b32.xlu0 %v6323_v21, %s8814_s6  ;;  %855 = vrot.lane.b32.xlu1 %v6382_v45, %s5983_s8  ;;  %v335_v21 = vrot.slane %v240_v54, 5  ;;  %v533_v54 = vrot.slane %v6435_v29, 6  ;;  %v540_v19 = vrot.slane %v8879_v48, 5  ;;  %v342_v29 = vrot.slane %v6468_v53, 5  ;;  %8882 = vst [vmem:[#allocation40_spill] sm:$0xff] %v6507_v24 }
  0x5f   : > { %v526_v17 = vrot.slane %v525_v33, 4  ;;  %v6504_v48 = vshrl.u32 %v6468_v53, 16  ;;  %v549_v33 = vrot.slane %v6483_v28, 5  ;;  %v6531_v28 = vshll.u32 %v6474_v43, 16 }
  0x60   : > { %v337_v9 = vrot.slane %v335_v21, 4  ;;  %v336_v15 = vsel %vm6086_vm2, %v4766_v18, %v335_v21  ;;  %v6486_v21 = vshll.u32 %v6446_v56, 16  ;;  %v4821_v18 = vcombine.high %v6451_v41, %v6451_v41 }
  0x61   : > { %8881 = vst [vmem:[#allocation39_spill] sm:$0xff] %v6504_v48  ;;  %8883 = vst [vmem:[#allocation41_spill] sm:$0xff] %v6531_v28  ;;  %v561_v20 = vrot.slane %v6507_v24, 6  ;;  %v5694_v24 = vld [vmem:[%s8702_s1 + $0x28] ss:$16 sps:$4 sm:$0xff]   ;;  %v571_v14 = vrot.slane %v6531_v28, 6 }
  0x62   : > { %836 = vrot.lane.b32.xlu0 %v6348_v52, %s8752_s23  ;;  %893 = vrot.lane.b32.xlu1 %v6410_v60, %s8750_s27  ;;  %v339_v50 = vsel %vm6086_vm2, %v337_v9, %v338_v1  ;;  %v4819_v52 = vcombine.high %v6443_v31, %v6443_v31  ;;  %8878 = vst [vmem:[#allocation37_spill] sm:$0xff] %v6486_v21  ;;  %v543_v9 = vrot.slane %v6463_v22, 6  ;;  %v5691_v22 = vld [vmem:[%s8702_s1 + $0x2c] ss:$16 sps:$4 sm:$0xff]  }
  0x63   : > { %v534_v1 = vor.u32 %v533_v54, %v530_v58  ;;  %4831 = vmatprep.subr.msk.bf16.mxu1 %vm574_vm3, %v4821_v18  ;;  %v622_v58 = vsel %vm6114_vm5, %v4774_v35, %v621_v34  ;;  %v625_v54 = vsel %vm6114_vm5, %v623_v44, %v624_v7  ;;  %v4775_v35 = vrot.slane %v6446_v56, 10  ;;  %v5689_v7 = vld [vmem:[%s8702_s1 + $0x24] ss:$16 sps:$4 sm:$0xff]   ;;  %v6522_v18 = vld [vmem:[%s6093_s14 + $0x78] sm:$0xf] }
  0x64   : > { %4822 = vmatprep.subr.msk.bf16.mxu0 %vm574_vm3, %v4819_v52  ;;  %v345_v52 = vrot.slane %v6474_v43, 5  ;;  %v344_v44 = vrot.slane %v342_v29, 4  ;;  %v6527_v56 = vcombine.low %v622_v58, %v625_v54  ;;  %v4820_v58 = vcombine.low %v6451_v41, %v6451_v41  ;;  %v5693_v54 = vld [vmem:[%s8702_s1 + $0x20] ss:$16 sps:$4 sm:$0xff]  }
  0x65   : > { %v536_v34 = vrot.slane %v534_v1, 4  ;;  %v6576_v51 = vshrl.u32 %v6522_v18, 16 }
  0x66   : > { %874 = vrot.lane.b32.xlu0 %v6363_v30, %s8823_s30  ;;  %931 = vrot.lane.b32.xlu1 %v6427_v37, %s5981_s5 }
  0x67   : > { %8886 = vst [vmem:[#allocation43_spill] sm:$0xff] %v6576_v51 }
  0x6a   : > { %912 = vrot.lane.b32.xlu0 %v6457_v5, %s8815_s9  ;;  %819 = vrot.lane.b32.xlu1 %v6363_v30, %s5978_s24  ;;  %v6495_v30 = vcombine.low %v336_v15, %v339_v50  ;;  %v552_v15 = vrot.slane %v6486_v21, 6  ;;  %v544_v50 = vor.u32 %v543_v9, %v540_v19  ;;  %v4818_v19 = vcombine.low %v6443_v31, %v6443_v31  ;;  %v6555_v21 = vld [vmem:[%s6093_s14 + $0x80] sm:$0x7] }
  0x6b   : > { %v558_v9 = vrot.slane %v6504_v48, 5  ;;  %8884 = vst [vmem:[#allocation42_spill] sm:$0xff] %v6555_v21 }
  0x6c   : > { %8880 = vst [vmem:[#allocation38_spill] sm:$0xff] %v6495_v30  ;;  %v553_v31 = vor.u32 %v552_v15, %v549_v33  ;;  %v1164_v41 = vsel %vm574_vm3, %v4818_v19, 0  ;;  %v545_v48 = vsel %vm6202_vm8, %v536_v34, %v544_v50  ;;  %v1170_v33 = vsel %vm574_vm3, %v4820_v58, 0  ;;  %v5697_v15 = vld [vmem:[%s8702_s1 + $0xc] ss:$16 sps:$4 sm:$0xff]  }
  0x6d   : > { %1186 = vmatpush1.bf16.msra.mxu0 %v1164_v41  ;;  %v8885_v19 = vshrl.u32 %v6474_v43, 16  ;;  %v6579_v34 = vshll.u32 %v6522_v18, 16  ;;  %1299 = vmatpush1.bf16.msra.mxu1 %v1170_v33  ;;  %v638_v50 = vrot.slane %v6534_v40, 5  ;;  %v6586_v58 = vshll.u32 %v6534_v40, 16  ;;  %v6598_v33 = vld [vmem:[%s6093_s14 + $0x84] sm:$0xf] }
  0x6e   : > { %779 = vrot.lane.b32.xlu0 %v6382_v45, %s8814_s6  ;;  %857 = vrot.lane.b32.xlu1 %v6457_v5, %s5983_s8  ;;  %v628_v45 = vrot.slane %v6468_v53, 6  ;;  %v343_v53 = vsel %vm6086_vm2, %v4767_v57, %v342_v29  ;;  %v535_v57 = vsel %vm6202_vm8, %v526_v17, %v534_v1  ;;  %v631_v29 = vrot.slane %v6474_v43, 6  ;;  %v6613_v43 = vld [vmem:[%s6093_s14 + $0x88] sm:$0xf] }
  0x6f   : > { %v346_v17 = vsel %vm6086_vm2, %v344_v44, %v345_v52  ;;  %v568_v13 = vrot.slane %v8885_v19, 5  ;;  %8887 = vst [vmem:[#allocation44_spill] sm:$0xff] %v6579_v34  ;;  %1187 = vmatprep.subr.bf16.mxu0 %v5689_v7  ;;  %v562_v52 = vor.u32 %v561_v20, %v558_v9  ;;  %v6583_v44 = vshrl.u32 %v6534_v40, 16  ;;  %8889 = vst [vmem:[#allocation46_spill] sm:$0xff] %v6586_v58 }
  0x70   : > { %v630_v1 = vrot.slane %v628_v45, 4  ;;  %1300 = vmatprep.subr.bf16.mxu1 %v5691_v22  ;;  %v6592_v41 = vcombine.low %v535_v57, %v545_v48  ;;  %v629_v20 = vsel %vm6114_vm5, %v4775_v35, %v628_v45  ;;  %v554_v7 = vrot.slane %v553_v31, 4  ;;  %v5699_v22 = vld [vmem:[%s8702_s1] ss:$16 sps:$4 sm:$0xff]  }
  0x71   : > { %8888 = vst [vmem:[#allocation45_spill] sm:$0xff] %v6583_v44  ;;  %v673_v9 = vrot.slane %v6534_v40, 6  ;;  %v6603_v19 = vcombine.low %v343_v53, %v346_v17  ;;  %v4776_v48 = vrot.slane %v6522_v18, 9  ;;  %v641_v57 = vrot.slane %v6555_v21, 5  ;;  %1188 = vmatpush1.bf16.msra.mxu0 %v5693_v54  ;;  %1301 = vmatpush1.bf16.msra.mxu1 %v5694_v24  ;;  %v5700_v53 = vld [vmem:[%s8702_s1 + $0x8] ss:$16 sps:$4 sm:$0xff]  }
  0x72   : > { %838 = vrot.lane.b32.xlu0 %v6410_v60, %s8752_s23  ;;  %895 = vrot.lane.b32.xlu1 %v6495_v30, %s8750_s27  ;;  %v5695_v60 = vld [vmem:[%s8702_s1 + $0x4] ss:$16 sps:$4 sm:$0xff]   ;;  %v632_v28 = vsel %vm6114_vm5, %v630_v1, %v631_v29  ;;  %v572_v35 = vor.u32 %v571_v14, %v568_v13  ;;  %v4777_v40 = vrot.slane %v6522_v18, 10  ;;  %v646_v45 = vrot.slane %v6576_v51, 5  ;;  %v6621_v14 = vld [vmem:[%s6093_s14 + $0x8c] sm:$0x7] }
  0x73   : > { %v649_v31 = vrot.slane %v6579_v34, 6  ;;  %1189 = vmatprep.subr.bf16.mxu0 %v5695_v60  ;;  %v564_v29 = vrot.slane %v562_v52, 4  ;;  %v640_v17 = vrot.slane %v638_v50, 4  ;;  %v655_v1 = vrot.slane %v6583_v44, 5  ;;  %8890 = vst [vmem:[#allocation47_spill] sm:$0xff] %v6621_v14  ;;  %1302 = vmatprep.subr.bf16.mxu1 %v5697_v15 }
  0x74   : > { %v658_v13 = vrot.slane %v6586_v58, 6  ;;  %v675_v60 = vrot.slane %v673_v9, 4  ;;  %v676_v24 = vrot.slane %v6555_v21, 6  ;;  %v6629_v18 = vshrl.u32 %v6598_v33, 16 }
  0x75   : > { %v6632_v54 = vshll.u32 %v6598_v33, 16  ;;  %v6634_v44 = vcombine.low %v629_v20, %v632_v28  ;;  %v6638_v15 = vsel %vm6086_vm2, %v4776_v48, %v638_v50  ;;  %v6642_v34 = vshll.u32 %v6555_v21, 16  ;;  %1190 = vmatpush1.bf16.msra.mxu0 %v5699_v22  ;;  %1303 = vmatpush1.bf16.msra.mxu1 %v5700_v53 }
  0x76   : > { %876 = vrot.lane.b32.xlu0 %v6427_v37, %s8823_s30  ;;  %933 = vrot.lane.b32.xlu1 %v6527_v56, %s5981_s5  ;;  %8891 = vst [vmem:[#allocation48_spill] sm:$0xff] %v6629_v18  ;;  %v6648_v51 = vsel %vm6114_vm5, %v4777_v40, %v673_v9  ;;  %v6650_v28 = vor.u32 %v649_v31, %v646_v45  ;;  %v4778_v20 = vrot.slane %v6598_v33, 9  ;;  %v683_v22 = vrot.slane %v6613_v43, 5  ;;  %v218_v40 = vld [vmem:[%s6093_s14 + $0xc] sm:$0xf] }
  0x77   : > { %8892 = vst [vmem:[#allocation49_spill] sm:$0xff] %v6632_v54  ;;  %8893 = vst [vmem:[#allocation50_spill] sm:$0xff] %v6642_v34  ;;  %v573_v50 = vsel %vm6202_vm8, %v564_v29, %v572_v35  ;;  %v6655_v48 = vor.u32 %v658_v13, %v655_v1  ;;  %v686_v58 = vrot.slane %v6621_v14, 5  ;;  %v6666_v9 = vshrl.u32 %v6613_v43, 16  ;;  %v219_v1 = vld [vmem:[%s6093_s14 + $0x10] sm:$0xf] }
  0x78   : > { %v6669_v35 = vshll.u32 %v6613_v43, 16  ;;  %v642_v45 = vsel %vm6086_vm2, %v640_v17, %v641_v57  ;;  %v8896_v31 = vshrl.u32 %v6555_v21, 16  ;;  %v668_v29 = vrot.slane %v6642_v34, 6 }
  0x79   : > { %8894 = vst [vmem:[#allocation51_spill] sm:$0xff] %v6666_v9  ;;  %v718_v57 = vrot.slane %v6613_v43, 6  ;;  %v661_v17 = vrot.slane %v6655_v48, 4  ;;  %v4779_v21 = vrot.slane %v6598_v33, 10  ;;  %v6711_v34 = vshll.u32 %v218_v40, 16 }
  0x7a   : > { %914 = vrot.lane.b32.xlu0 %v6592_v41, %s8815_s9  ;;  %821 = vrot.lane.b32.xlu1 %v6427_v37, %s5978_s24  ;;  %v563_v37 = vsel %vm6202_vm8, %v554_v7, %v562_v52  ;;  %v691_v52 = vrot.slane %v6629_v18, 5  ;;  %v694_v7 = vrot.slane %v6632_v54, 6  ;;  %8895 = vst [vmem:[#allocation52_spill] sm:$0xff] %v6669_v35  ;;  %v665_v53 = vrot.slane %v8896_v31, 5 }
  0x7b   : > { %v6680_v13 = vcombine.low %v563_v37, %v573_v50  ;;  %v651_v54 = vrot.slane %v6650_v28, 4  ;;  %v6685_v18 = vsel %vm6086_vm2, %v4778_v20, %v683_v22  ;;  %v6691_v31 = vshll.u32 %v6621_v14, 16  ;;  %v6702_v20 = vld [vmem:[%s6093_s14 + $0x1c] sm:$0xf]  ;;  %8901 = vst [vmem:[#allocation55_spill] sm:$0xff] %v6711_v34 }
  0x7c   : > { %v6697_v37 = vor.u32 %v694_v7, %v691_v52  ;;  %v700_v28 = vrot.slane %v6666_v9, 5  ;;  %v703_v43 = vrot.slane %v6669_v35, 6  ;;  %v720_v52 = vrot.slane %v718_v57, 4 }
  0x7d   : > { %8897 = vst [vmem:[#allocation53_spill] sm:$0xff] %v6691_v31  ;;  %v721_v7 = vrot.slane %v6621_v14, 6  ;;  %v6714_v10 = vshll.u32 %v219_v1, 16  ;;  %v6716_v9 = vshrl.u32 %v219_v1, 16  ;;  %v8904_v35 = vshrl.u32 %v6621_v14, 16 }
  0x7e   : > { %781 = vrot.lane.b32.xlu0 %v6457_v5, %s8814_s6  ;;  %859 = vrot.lane.b32.xlu1 %v6592_v41, %s5983_s8  ;;  %v677_v5 = vsel %vm6114_vm5, %v675_v60, %v676_v24  ;;  %v685_v60 = vrot.slane %v683_v22, 4  ;;  %v6706_v22 = vld [vmem:[%s6093_s14 + $0x14] sm:$0x7]  ;;  %v669_v24 = vor.u32 %v668_v29, %v665_v53  ;;  %v713_v50 = vrot.slane %v6691_v31, 6 }
  0x7f   : > { %8902 = vst [vmem:[#allocation56_spill] sm:$0xff] %v6714_v10  ;;  %8903 = vst [vmem:[#allocation57_spill] sm:$0xff] %v6716_v9  ;;  %v710_v61 = vrot.slane %v8904_v35, 5  ;;  %v296_v53 = vrot.slane %v5844_v2, 5  ;;  %v704_v29 = vor.u32 %v703_v43, %v700_v28  ;;  %v8905_v1 = vrot.slane %v6702_v20, 5 }
  0x80   : > { %v6728_v33 = vsel %vm6086_vm2, %v685_v60, %v686_v58  ;;  %v6734_v31 = vshll.u32 %v6706_v22, 16  ;;  %v2012_v2 = vshrl.u32 %v6706_v22, 16  ;;  %v2022_v49 = vrot.slane %v6711_v34, 7 }
  0x81   : > { %v295_v35 = vrot.slane %v8905_v1, 4  ;;  %v2025_v58 = vrot.slane %v6716_v9, 6  ;;  %v2026_v60 = vrot.slane %v6714_v10, 7  ;;  %v2004_v28 = vrot.slane %v6711_v34, 6 }
  0x82   : > { %840 = vrot.lane.b32.xlu0 %v6495_v30, %s8898_s10  ;;  %897 = vrot.lane.b32.xlu1 %v6603_v19, %s8899_s11  ;;  %v6709_v30 = vshrl.u32 %v218_v40, 16  ;;  %v696_v40 = vrot.slane %v6697_v37, 4  ;;  %v2007_v43 = vrot.slane %v6716_v9, 5  ;;  %v2008_v22 = vrot.slane %v6714_v10, 6 }
  0x83   : > { %v6752_v1 = vcombine.low %v6638_v15, %v642_v45  ;;  %v6755_v47 = vcombine.low %v6648_v51, %v677_v5  ;;  %v706_v42 = vrot.slane %v704_v29, 4  ;;  %v660_v9 = vsel %vm6202_vm8, %v651_v54, %v6655_v48 }
  0x84   : > { %8900 = vst [vmem:[#allocation54_spill] sm:$0xff] %v6709_v30  ;;  %v2021_v14 = vrot.slane %v6709_v30, 6  ;;  %v2003_v37 = vrot.slane %v6709_v30, 5  ;;  %v5845_v30 = vld [vmem:[%s6093_s14 + $0x18] sm:$0xf]  ;;  %v670_v10 = vsel %vm6202_vm8, %v661_v17, %v669_v24  ;;  %v4807_v34 = vcombine.low %v6685_v18, %v6728_v33  ;;  %v8919_v33 = vld [vmem:[#allocation5_spill] sm:$0xff] }
  0x85   : > { %v4760_v46 = vrot.slane %v5845_v30, 9  ;;  %v2030_v51 = vrot.slane %v2012_v2, 6  ;;  %v2031_v15 = vrot.slane %v6734_v31, 7  ;;  %v2027_v45 = vor.u32 %v2026_v60, %v2025_v58 }
  0x86   : > { %878 = vrot.lane.b32.xlu0 %v6527_v56, %s8823_s30  ;;  %935 = vrot.lane.b32.xlu1 %v6634_v44, %s5981_s5  ;;  %v2023_v30 = vor.u32 %v2022_v49, %v2021_v14  ;;  %v6770_v5 = vor.u32 %v2004_v28, %v2003_v37  ;;  %v6772_v54 = vor.u32 %v2008_v22, %v2007_v43  ;;  %v2048_v17 = vrot.slane %v6190_v59, 7 }
  0x87   : > { %v6778_v48 = vcombine.low %v660_v9, %v670_v10  ;;  %v6784_v49 = vsel %vm6114_vm5, %v720_v52, %v721_v7  ;;  %v6788_v14 = vsel %vm6202_vm8, %v696_v40, %v704_v29  ;;  %v2052_v24 = vrot.slane %v6198_v63, 7 }
  0x88   : > { %v6794_v10 = vsel %vm6086_vm2, %v295_v35, %v296_v53  ;;  %v2014_v11 = vrot.slane %v2012_v2, 5  ;;  %v2024_v52 = vrot.slane %v2023_v30, 4  ;;  %v2029_v7 = vrot.slane %v2027_v45, 4 }
  0x89   : > { %v2006_v40 = vrot.slane %v6770_v5, 4  ;;  %v2011_v29 = vrot.slane %v6772_v54, 4  ;;  %v2057_v35 = vrot.slane %v6213_v12, 7  ;;  %v1937_v37 = vrot.slane %v6183_v55, 4 }
  0x8a   : > { %916 = vrot.lane.b32.xlu0 %v6680_v13, %s8815_s9  ;;  %823 = vrot.lane.b32.xlu1 %v6527_v56, %s5978_s24  ;;  %v6767_v56 = vsel %vm6114_vm5, %v4779_v21, %v718_v57  ;;  %v714_v21 = vor.u32 %v713_v50, %v710_v61  ;;  %v2047_v57 = vrot.slane %v6183_v55, 6  ;;  %v8906_v61 = vrot.slane %v6702_v20, 5 }
  0x8b   : > { %v2015_v50 = vrot.slane %v6734_v31, 6  ;;  %v8907_v20 = vshrl.u32 %v6102_v3, 16  ;;  %v1938_v28 = vrot.slane %v6190_v59, 5  ;;  %v1941_v43 = vrot.slane %v6198_v63, 5  ;;  %v8922_v3 = vld [vmem:[#allocation19_spill] sm:$0xff] }
  0x8c   : > { %v6800_v9 = vsel %vm6086_vm2, %v4760_v46, %v8906_v61  ;;  %v6811_v0 = vsel %vm6202_vm8, %v706_v42, %v714_v21  ;;  %v2032_v46 = vor.u32 %v2031_v15, %v2030_v51  ;;  %v2049_v58 = vor.u32 %v2048_v17, %v2047_v57 }
  0x8d   : > { %v2056_v53 = vrot.slane %v8907_v20, 6  ;;  %v1943_v22 = vrot.slane %v6195_v62, 4  ;;  %v2073_v15 = vrot.slane %v6260_v6, 6  ;;  %v2074_v55 = vrot.slane %v6262_v8, 7 }
  0x8e   : > { %783 = vrot.lane.b32.xlu0 %v6592_v41, %s8814_s6  ;;  %861 = vrot.lane.b32.xlu1 %v6680_v13, %s5983_s8  ;;  %v2051_v41 = vrot.slane %v6195_v62, 6  ;;  %v6840_v59 = vsel %vm6818_vm11, %v2024_v52, %v2027_v45  ;;  %v2016_v62 = vor.u32 %v2015_v50, %v2014_v11  ;;  %v2077_v30 = vrot.slane %v6275_v25, 6 }
  0x8f   : > { %v2078_v5 = vrot.slane %v6277_v26, 7  ;;  %v6846_v21 = vsel %vm6818_vm11, %v2029_v7, %v2032_v46  ;;  %v2050_v57 = vrot.slane %v2049_v58, 4  ;;  %v1939_v61 = vor.u32 %v1938_v28, %v1937_v37 }
  0x90   : > { %v2053_v60 = vor.u32 %v2052_v24, %v2051_v41  ;;  %v2058_v41 = vor.u32 %v2057_v35, %v2056_v53  ;;  %v1944_v20 = vor.u32 %v1943_v22, %v1941_v43  ;;  %v1959_v45 = vrot.slane %v6260_v6, 4 }
  0x91   : > { %v1960_v11 = vrot.slane %v6262_v8, 5  ;;  %v1963_v50 = vrot.slane %v6277_v26, 5  ;;  %v1965_v52 = vrot.slane %v6275_v25, 4  ;;  %v1948_v7 = vrot.slane %v6218_v16, 4 }
  0x92   : > { %842 = vrot.lane.b32.xlu0 %v6603_v19, %s8898_s10  ;;  %899 = vrot.lane.b32.xlu1 %v6752_v1, %s8899_s11  ;;  %v2055_v17 = vrot.slane %v2053_v60, 4  ;;  %v1949_v46 = vrot.slane %v6226_v23, 5  ;;  %v2075_v35 = vor.u32 %v2074_v55, %v2073_v15  ;;  %v2079_v6 = vor.u32 %v2078_v5, %v2077_v30 }
  0x93   : > { %v8910_v8 = vshrl.u32 %v6246_v38, 16  ;;  %v2083_v37 = vrot.slane %v6281_v32, 7  ;;  %v6870_v25 = vsel %vm6202_vm8, %v2006_v40, %v6772_v54  ;;  %v6874_v28 = vsel %vm6202_vm8, %v2011_v29, %v2016_v62 }
  0x94   : > { %v1954_v22 = vrot.slane %v6232_v27, 4  ;;  %v2054_v38 = vsel %vm6818_vm11, %v2050_v57, %v2053_v60  ;;  %v2059_v55 = vsel %vm6818_vm11, %v2055_v17, %v2058_v41  ;;  %v1946_v54 = vrot.slane %v6213_v12, 5 }
  0x95   : > { %v2082_v58 = vrot.slane %v8910_v8, 6  ;;  %v1961_v40 = vor.u32 %v1960_v11, %v1959_v45  ;;  %v1940_v30 = vrot.slane %v1939_v61, 4  ;;  %v1945_v29 = vrot.slane %v1944_v20, 4  ;;  %v8911_v45 = vld [vmem:[#allocation9_spill] sm:$0xff] }
  0x96   : > { %880 = vrot.lane.b32.xlu0 %v6634_v44, %s8823_s30  ;;  %937 = vrot.lane.b32.xlu1 %v6755_v47, %s5981_s5  ;;  %v1966_v62 = vor.u32 %v1965_v52, %v1963_v50  ;;  %v1950_v5 = vor.u32 %v1949_v46, %v1948_v7  ;;  %v2076_v57 = vrot.slane %v2075_v35, 4  ;;  %v2081_v17 = vrot.slane %v2079_v6, 4 }
  0x97   : > { %v2084_v12 = vor.u32 %v2083_v37, %v2082_v58  ;;  %v1968_v41 = vrot.slane %v6281_v32, 5  ;;  %v4881_v61 = vcombine.low %v6840_v59, %v6846_v21  ;;  %v2035_v11 = vrot.slane %v8911_v45, 7  ;;  %v8914_v21 = vld [vmem:[#allocation13_spill] sm:$0xff] }
  0x98   : > { %v6848_v24 = vpop.permute.xlu1 %830  ;;  %vm1017_vm2 = vcmask 162816   ;;  %v6904_v7 = vcombine.low %v2054_v38, %v2059_v55  ;;  %v1962_v59 = vrot.slane %v1961_v40, 4  ;;  %v1957_v46 = vrot.slane %v8914_v21, 5  ;;  %v8915_v38 = vld [vmem:[#allocation10_spill] sm:$0xff] }
  0x99   : > { %v1942_v35 = vsel %vm6908_vm4, %v1940_v30, %v1941_v43  ;;  %v1947_v8 = vsel %vm6908_vm4, %v1945_v29, %v1946_v54  ;;  %v1967_v58 = vrot.slane %v1966_v62, 4  ;;  %v1951_v37 = vrot.slane %v1950_v5, 4  ;;  %v8916_v54 = vld [vmem:[#allocation11_spill] sm:$0xff]  ;;  %v8917_v29 = vld [vmem:[#allocation16_spill] sm:$0xff]  ;;  %v8918_v5 = vld [vmem:[#allocation17_spill] sm:$0xff] }
  0x9a   : > { %918 = vrot.lane.b32.xlu0 %v6778_v48, %s8815_s9  ;;  %825 = vrot.lane.b32.xlu1 %v6634_v44, %s5978_s24  ;;  %v6862_v53 = vpop.permute.xlu0 %811  ;;  %v8805_v44 = vrot.slane %v6242_v36, 5  ;;  %v2080_v63 = vsel %vm6818_vm11, %v2076_v57, %v2079_v6  ;;  %v2085_v43 = vsel %vm6818_vm11, %v2081_v17, %v2084_v12  ;;  %v2038_v55 = vrot.slane %v8915_v38, 6  ;;  %v8921_v6 = vld [vmem:[#allocation12_spill] sm:$0xff]  ;;  %v8923_v12 = vld [vmem:[#allocation18_spill] sm:$0xff] }
  0x9b   : > { %v2039_v40 = vrot.slane %v8916_v54, 7  ;;  %vm1034_vm5 = vcmask 195584   ;;  %v1970_v62 = vrot.slane %v8917_v29, 4  ;;  %v1971_v18 = vrot.slane %v8918_v5, 5 }
  0x9c   : > { %v6878_v15 = vpop.permute.xlu1 %887  ;;  %v1955_v20 = vor.u32 %v1954_v22, %v8805_v44  ;;  %v8920_v52 = vshrl.u32 %v8919_v33, 16  ;;  %v2044_v57 = vrot.slane %v8921_v6, 7  ;;  %v1974_v17 = vrot.slane %v8922_v3, 5 }
  0x9d   : > { %v1976_v44 = vrot.slane %v8923_v12, 4  ;;  %v2061_v42 = vrot.slane %v6226_v23, 7  ;;  %v8925_v26 = vrot.slane %v6242_v36, 5  ;;  %v2065_v23 = vrot.slane %v6242_v36, 7 }
  0x9e   : > { %785 = vrot.lane.b32.xlu0 %v6680_v13, %s8814_s6  ;;  %863 = vrot.lane.b32.xlu1 %v6778_v48, %s5983_s8  ;;  %v6891_v60 = vpop.permute.xlu0 %868  ;;  %v2034_v13 = vrot.slane %v6154_v39, 6  ;;  %v1956_v30 = vrot.slane %v1955_v20, 4  ;;  %v2043_v51 = vrot.slane %v8920_v52, 6  ;;  %v1964_v20 = vsel %vm6908_vm4, %v1962_v59, %v1963_v50  ;;  %s8997_s8 = smov 28  }
  0x9f   : > { %v8924_v52 = vcombine.low %v6767_v56, %v6784_v49  ;;  %v1953_v50 = vsel %vm6908_vm4, %v1951_v37, %v8925_v26 }
  0xa0   : > { %v6900_v48 = vpop.permute.xlu1 %925  ;;  %v1958_v49 = vsel %vm6908_vm4, %v1956_v30, %v1957_v46  ;;  %v2086_v46 = vrot.slane %v8917_v29, 6  ;;  %v2087_v30 = vrot.slane %v8918_v5, 7  ;;  %v6993_v29 = vcombine.low %v1942_v35, %v1947_v8 }
  0xa2   : > { %844 = vrot.lane.b32.xlu0 %v6752_v1, %s8898_s10  ;;  %901 = vrot.lane.b32.xlu1 %v4807_v34, %s8899_s11  ;;  %v6925_v22 = vpop.permute.xlu0 %832  ;;  %v2036_v1 = vor.u32 %v2035_v11, %v2034_v13  ;;  %v1969_v13 = vsel %vm6908_vm4, %v1967_v58, %v1968_v41  ;;  %v2060_v11 = vrot.slane %v6218_v16, 6  ;;  %v2040_v41 = vor.u32 %v2039_v40, %v2038_v55 }
  0xa3   : > { %v2064_v16 = vrot.slane %v6232_v27, 6  ;;  %v1972_v58 = vor.u32 %v1971_v18, %v1970_v62  ;;  %v1977_v55 = vor.u32 %v1976_v44, %v1974_v17  ;;  %v8927_v27 = vld [vmem:[#allocation6_spill] sm:$0xff]  ;;  %v6995_v62 = vcombine.low %v2080_v63, %v2085_v43 }
  0xa4   : > { %v6935_v34 = vpop.permute.xlu1 %813  ;;  %v2037_v59 = vrot.slane %v2036_v1, 4  ;;  %v8928_v40 = vshrl.u32 %v8927_v27, 16  ;;  %v2090_v1 = vrot.slane %v8923_v12, 6  ;;  %v6997_v5 = vcombine.low %v1964_v20, %v1969_v13  ;;  %v8934_v20 = vld [vmem:[#allocation15_spill] sm:$0xff] }
  0xa5   : > { %v6999_v18 = vcombine.low %v1953_v50, %v1958_v49  ;;  %v1978_v12 = vrot.slane %v1977_v55, 4  ;;  %v2088_v43 = vor.u32 %v2087_v30, %v2086_v46  ;;  %v8935_v13 = vshrl.u32 %v8934_v20, 16  ;;  %v8937_v49 = vld [vmem:[#allocation24_spill] sm:$0xff]  ;;  %v8938_v55 = vld [vmem:[#allocation25_spill] sm:$0xff]  ;;  %v8940_v30 = vld [vmem:[#allocation22_spill] sm:$0xff] }
  0xa6   : > { %882 = vrot.lane.b32.xlu0 %v6755_v47, %s8823_s30  ;;  %939 = vrot.lane.b32.xlu1 %v8924_v52, %s5981_s5  ;;  %v6956_v33 = vpop.permute.xlu0 %771  ;;  %v8926_v47 = vcombine.low %v6800_v9, %v6794_v10  ;;  %v2069_v36 = vrot.slane %v8928_v40, 6  ;;  %v2070_v52 = vrot.slane %v8914_v21, 7  ;;  %v2062_v9 = vor.u32 %v2061_v42, %v2060_v11  ;;  %8930 = vst [vmem:[#allocation9_spill] sm:$0xff] %v6997_v5  ;;  %v8939_v40 = vld [vmem:[#allocation26_spill] sm:$0xff] }
  0xa7   : > { %v2066_v21 = vor.u32 %v2065_v23, %v2064_v16  ;;  %8931 = vst [vmem:[#allocation13_spill] sm:$0xff] %v6999_v18  ;;  %v7003_v11 = vsel %vm6818_vm11, %v2037_v59, %v2040_v41  ;;  %v2095_v50 = vrot.slane %v8935_v13, 6  ;;  %v2100_v59 = vrot.slane %v8937_v49, 7 }
  0xa8   : > { %v944_v56 = vsel %vm941_vm14, %v8926_v47, %v6956_v33  ;;  %v2071_v63 = vor.u32 %v2070_v52, %v2069_v36  ;;  %v2103_v27 = vrot.slane %v8938_v55, 6  ;;  %v2104_v36 = vrot.slane %v8939_v40, 7 }
  0xa9   : > { %v968_v37 = vsel %vm966_vm15, %v944_v56, %v6862_v53  ;;  %v6976_v26 = vpop.permute.xlu1 %849  ;;  %v8929_v53 = vcombine.low %v6788_v14, %v6811_v0  ;;  %v2042_v14 = vrot.slane %v2040_v41, 4  ;;  %v2045_v0 = vor.u32 %v2044_v57, %v2043_v51 }
  0xaa   : > { %v985_v10 = vsel %vm983_vm0, %v968_v37, %v6848_v24  ;;  %2302 = vrot.lane.b32.xlu1 %v4881_v61, %s5978_s24  ;;  %v2091_v24 = vrot.slane %v8922_v3, 7  ;;  %v1973_v61 = vrot.slane %v1972_v58, 4  ;;  %v8932_v3 = vld [vmem:[#allocation20_spill] sm:$0xff]  ;;  %v2063_v51 = vrot.slane %v2062_v9, 4 }
  0xab   : > { %920 = vrot.lane.b32.xlu0 %v8929_v53, %s8815_s9  ;;  %v1002_v44 = vsel %vm1000_vm1, %v985_v10, %v6976_v26  ;;  %v1979_v16 = vrot.slane %v8932_v3, 5  ;;  %v2068_v8 = vrot.slane %v2066_v21, 4  ;;  %v2096_v41 = vrot.slane %v8932_v3, 7  ;;  %v8944_v3 = vld [vmem:[#allocation7_spill] sm:$0xff] }
  0xac   : > { %v1019_v42 = vsel %vm1017_vm2, %v1002_v44, %v6891_v60  ;;  %v8933_v60 = vcombine.low %v6870_v25, %v6874_v28  ;;  %v2092_v57 = vor.u32 %v2091_v24, %v2090_v1  ;;  %v2046_v25 = vsel %vm6818_vm11, %v2042_v14, %v2045_v0  ;;  %v8942_v1 = vld [vmem:[#allocation27_spill] sm:$0xff] }
  0xad   : > { %v1036_v35 = vsel %vm1034_vm5, %v1019_v42, %v6878_v15  ;;  %v1975_v28 = vsel %vm6908_vm4, %v1973_v61, %v1974_v17  ;;  %v8936_v15 = vld [vmem:[#allocation23_spill] sm:$0xff]  ;;  %v1980_v37 = vsel %vm6908_vm4, %v1978_v12, %v1979_v16  ;;  %v2067_v17 = vsel %vm6818_vm11, %v2063_v51, %v2066_v21 }
  0xae   : > { %2346 = vrot.lane.b32.xlu1 %v6904_v7, %s8823_s30  ;;  %v2099_v56 = vrot.slane %v8936_v15, 6  ;;  %v2072_v10 = vsel %vm6818_vm11, %v2068_v8, %v2071_v63  ;;  %v2089_v9 = vrot.slane %v2088_v43, 4  ;;  %v2094_v46 = vrot.slane %v2092_v57, 4 }
  0xaf   : > { %2276 = vrot.lane.b32.xlu0 %v8933_v60, %s8814_s6  ;;  %v8941_v53 = vshrl.u32 %v8940_v30, 16  ;;  %v8943_v14 = vmov 0   ;;  %v2097_v21 = vor.u32 %v2096_v41, %v2095_v50  ;;  %v1981_v61 = vrot.slane %v8936_v15, 4  ;;  %s8999_s6 = smov 4  }
  0xb0   : > { %v907_v23 = vpop.permute.xlu0 %906  ;;  %v7017_v47 = vpop.permute.xlu1 %851  ;;  %v2101_v0 = vor.u32 %v2100_v59, %v2099_v56  ;;  %v1982_v12 = vrot.slane %v8937_v49, 5  ;;  %v4882_v60 = vcombine.low %v7003_v11, %v2046_v25  ;;  %v7061_v8 = vcombine.low %v1975_v28, %v1980_v37 }
  0xb1   : > { %v1053_v58 = vsel %vm1051_vm6, %v1036_v35, %v907_v23  ;;  %v2108_v44 = vrot.slane %v8941_v53, 6  ;;  %v2105_v35 = vor.u32 %v2104_v36, %v2103_v27  ;;  %v1985_v63 = vrot.slane %v8939_v40, 5  ;;  %v8949_v40 = vld [vmem:[#allocation32_spill] sm:$0xff] }
  0xb2   : > { %v1070_v52 = vsel %vm1068_vm7, %v1053_v58, %v6900_v48  ;;  %2395 = vrot.lane.b32.xlu1 %v6995_v62, %s5981_s5  ;;  %v2109_v48 = vrot.slane %v8942_v1, 7  ;;  %8945 = vst [vmem:[#allocation10_spill] sm:$0xff] %v7061_v8  ;;  %v1987_v43 = vrot.slane %v8938_v55, 4  ;;  %v7067_v11 = vcombine.low %v2067_v17, %v2072_v10  ;;  %v8947_v58 = vld [vmem:[#allocation30_spill] sm:$0xff]  ;;  %v8948_v55 = vld [vmem:[#allocation33_spill] sm:$0xff] }
  0xb3   : > { %2324 = vrot.lane.b32.xlu0 %v6993_v29, %s8898_s10  ;;  %4823 = vmatmul.mubr.msk.bf16.vlgmr.msra.gmra.mxu0 %vm1145_vm9, %v1070_v52  ;;  %v2098_v23 = vsel %vm6818_vm11, %v2094_v46, %v2097_v21  ;;  %v2102_v25 = vrot.slane %v2101_v0, 4  ;;  %v2107_v56 = vrot.slane %v2105_v35, 4  ;;  %v1983_v49 = vor.u32 %v1982_v12, %v1981_v61 }
  0xb4   : > { %4832 = vmatmul.mubr.msk.bf16.vlgmr.msra.gmra.mxu1 %vm1145_vm9, %v1070_v52  ;;  %v7045_v24 = vpop.permute.xlu0 %773  ;;  %v890_v42 = vpop.permute.xlu1 %889  ;;  %1217 = vmatprep.mubr.bf16.mxu0 %v8943_v14  ;;  %v2110_v28 = vor.u32 %v2109_v48, %v2108_v44  ;;  %v1993_v37 = vrot.slane %v8947_v58, 5  ;;  %v1996_v27 = vrot.slane %v8948_v55, 5  ;;  %v1998_v36 = vrot.slane %v8949_v40, 4 }
  0xb5   : > { %1330 = vmatprep.mubr.bf16.mxu1 %v8943_v14  ;;  %v947_v16 = vsel %vm941_vm14, %v8944_v3, %v7045_v24  ;;  %v1990_v46 = vrot.slane %v8942_v1, 5  ;;  %v2106_v53 = vsel %vm6818_vm11, %v2102_v25, %v2105_v35  ;;  %v1984_v48 = vrot.slane %v1983_v49, 4  ;;  %v8953_v25 = vld [vmem:[#allocation31_spill] sm:$0xff] }
  0xb6   : > { %v970_v51 = vsel %vm966_vm15, %v947_v16, %v6935_v34  ;;  %2326 = vrot.lane.b32.xlu1 %v6999_v18, %s8898_s10  ;;  %v2093_v34 = vsel %vm6818_vm11, %v2089_v9, %v2092_v57  ;;  %v1988_v57 = vor.u32 %v1987_v43, %v1985_v63  ;;  %v2111_v44 = vsel %vm6818_vm11, %v2107_v56, %v2110_v28 }
  0xb7   : > { %2368 = vrot.lane.b32.xlu0 %v6997_v5, %s8899_s11  ;;  %v987_v20 = vsel %vm983_vm0, %v970_v51, %v6925_v22  ;;  %v8946_v22 = vld [vmem:[#allocation29_spill] sm:$0xff]  ;;  %v7086_v9 = vcombine.low %v2093_v34, %v2098_v23  ;;  %v1999_v0 = vor.u32 %v1998_v36, %v1996_v27  ;;  %v2113_v12 = vrot.slane %v8947_v58, 7  ;;  %v8952_v34 = vld [vmem:[#allocation34_spill] sm:$0xff]  ;;  %v8957_v36 = vld [vmem:[#allocation39_spill] sm:$0xff] }
  0xb8   : > { %v1004_v13 = vsel %vm1000_vm1, %v987_v20, %v7017_v47  ;;  %v871_v50 = vpop.permute.xlu0 %870  ;;  %v928_v41 = vpop.permute.xlu1 %927  ;;  %v1992_v59 = vrot.slane %v8946_v22, 4  ;;  %v1989_v21 = vrot.slane %v1988_v57, 4  ;;  %v2112_v61 = vrot.slane %v8946_v22, 6  ;;  %v8955_v22 = vld [vmem:[#allocation36_spill] sm:$0xff] }
  0xb9   : > { %v1021_v15 = vsel %vm1017_vm2, %v1004_v13, %v871_v50  ;;  %v2116_v3 = vrot.slane %v8949_v40, 6  ;;  %v2117_v16 = vrot.slane %v8948_v55, 7  ;;  %v7115_v43 = vcombine.low %v2106_v53, %v2111_v44  ;;  %v8956_v55 = vld [vmem:[#allocation37_spill] sm:$0xff] }
  0xba   : > { %2370 = vrot.lane.b32.xlu1 %v7061_v8, %s8899_s11  ;;  %v1038_v52 = vsel %vm1034_vm5, %v1021_v15, %v890_v42  ;;  %v1994_v1 = vor.u32 %v1993_v37, %v1992_v59  ;;  %v1986_v20 = vsel %vm6908_vm4, %v1984_v48, %v1985_v63  ;;  %v2001_v13 = vrot.slane %v8952_v34, 5 }
  0xbb   : > { %2304 = vrot.lane.b32.xlu0 %v4882_v60, %s5978_s24  ;;  %v1991_v50 = vsel %vm6908_vm4, %v1989_v21, %v1990_v46  ;;  %v2000_v23 = vrot.slane %v1999_v0, 4  ;;  %v8954_v28 = vshrl.u32 %v8953_v25, 16  ;;  %v2114_v56 = vor.u32 %v2113_v12, %v2112_v61  ;;  %v8958_v46 = vld [vmem:[#allocation40_spill] sm:$0xff] }
  0xbc   : > { %v7084_v17 = vpop.permute.xlu0 %908  ;;  %v816_v10 = vpop.permute.xlu1 %815  ;;  %v2118_v49 = vor.u32 %v2117_v16, %v2116_v3  ;;  %v2122_v63 = vrot.slane %v8952_v34, 7  ;;  %v2147_v59 = vrot.slane %v8955_v22, 6  ;;  %v2148_v40 = vrot.slane %v8956_v55, 7  ;;  %v8960_v16 = vld [vmem:[#allocation35_spill] sm:$0xff] }
  0xbd   : > { %v1055_v30 = vsel %vm1051_vm6, %v1038_v52, %v7084_v17  ;;  %v2121_v15 = vrot.slane %v8954_v28, 6  ;;  %v2151_v52 = vrot.slane %v8957_v36, 6  ;;  %v7135_v44 = vcombine.low %v1986_v20, %v1991_v50 }
  0xbe   : > { %v1072_v42 = vsel %vm1068_vm7, %v1055_v30, %v928_v41  ;;  %2306 = vrot.lane.b32.xlu1 %v6904_v7, %s5978_s24  ;;  %v8951_v7 = vld [vmem:[#allocation8_spill] sm:$0xff]  ;;  %v1995_v41 = vrot.slane %v1994_v1, 4  ;;  %v2152_v30 = vrot.slane %v8958_v46, 7  ;;  %v2125_v48 = vrot.slane %v8955_v22, 4  ;;  %v8963_v22 = vld [vmem:[#allocation43_spill] sm:$0xff] }
  0xbf   : > { %2348 = vrot.lane.b32.xlu0 %v7067_v11, %s8823_s30  ;;  %4824 = vmatmul.mubr.msk.bf16.gmra.mxu0 %vm1145_vm9, %v1072_v42  ;;  %8959 = vst [vmem:[#allocation16_spill] sm:$0xff] %v7135_v44  ;;  %v2002_v21 = vsel %vm6908_vm4, %v2000_v23, %v2001_v13  ;;  %v2129_v1 = vrot.slane %v8958_v46, 5  ;;  %v2131_v0 = vrot.slane %v8957_v36, 4  ;;  %v2115_v61 = vrot.slane %v2114_v56, 4  ;;  %v8964_v56 = vld [vmem:[#allocation44_spill] sm:$0xff] }
  0xc0   : > { %4833 = vmatmul.mubr.msk.bf16.gmra.mxu1 %vm1145_vm9, %v1072_v42  ;;  %v7106_v60 = vpop.permute.xlu0 %775  ;;  %v7108_v35 = vpop.permute.xlu1 %853  ;;  %1227 = vmatprep.mubr.bf16.mxu0 %v8943_v14  ;;  %v2126_v42 = vrot.slane %v8956_v55, 5  ;;  %v2120_v12 = vrot.slane %v2118_v49, 4  ;;  %v2123_v3 = vor.u32 %v2122_v63, %v2121_v15  ;;  %v2149_v25 = vor.u32 %v2148_v40, %v2147_v59  ;;  %v8966_v59 = vld [vmem:[#allocation46_spill] sm:$0xff]  ;;  %v8967_v40 = vld [vmem:[#allocation45_spill] sm:$0xff] }
  0xc1   : > { %8950 = vst [vmem:[#allocation11_spill] sm:$0xff] %v7106_v60  ;;  %1340 = vmatprep.mubr.bf16.mxu1 %v8943_v14  ;;  %v950_v51 = vsel %vm941_vm14, %v8951_v7, %v7106_v60  ;;  %v8961_v7 = vshrl.u32 %v8960_v16, 16  ;;  %v2132_v63 = vor.u32 %v2131_v0, %v2129_v1  ;;  %v2140_v55 = vrot.slane %v8966_v59, 5 }
  0xc2   : > { %2350 = vrot.lane.b32.xlu1 %v6995_v62, %s8823_s30  ;;  %v972_v57 = vsel %vm966_vm15, %v950_v51, %v816_v10  ;;  %v1997_v10 = vsel %vm6908_vm4, %v1995_v41, %v1996_v27  ;;  %v2153_v27 = vor.u32 %v2152_v30, %v2151_v52  ;;  %v8962_v41 = vld [vmem:[#allocation41_spill] sm:$0xff]  ;;  %v2127_v23 = vor.u32 %v2126_v42, %v2125_v48 }
  0xc3   : > { %2397 = vrot.lane.b32.xlu0 %v7086_v9, %s5981_s5  ;;  %v2156_v51 = vrot.slane %v8961_v7, 6  ;;  %v2157_v28 = vrot.slane %v8962_v41, 7  ;;  %v7161_v15 = vcombine.low %v1997_v10, %v2002_v21  ;;  %v2142_v36 = vrot.slane %v8967_v40, 4 }
  0xc4   : > { %v835_v58 = vpop.permute.xlu0 %834  ;;  %v892_v37 = vpop.permute.xlu1 %891  ;;  %v2119_v52 = vsel %vm6818_vm11, %v2115_v61, %v2118_v49  ;;  %v2150_v48 = vrot.slane %v2149_v25, 4  ;;  %v2155_v42 = vrot.slane %v2153_v27, 4  ;;  %v2124_v21 = vsel %vm6818_vm11, %v2120_v12, %v2123_v3 }
  0xc5   : > { %v989_v53 = vsel %vm983_vm0, %v972_v57, %v835_v58  ;;  %v2136_v57 = vrot.slane %v8963_v22, 4  ;;  %v2137_v58 = vrot.slane %v8964_v56, 5  ;;  %8965 = vst [vmem:[#allocation17_spill] sm:$0xff] %v7161_v15  ;;  %v2158_v16 = vor.u32 %v2157_v28, %v2156_v51 }
  0xc6   : > { %2399 = vrot.lane.b32.xlu1 %v7115_v43, %s5981_s5  ;;  %v1006_v20 = vsel %vm1000_vm1, %v989_v53, %v7108_v35  ;;  %v2128_v0 = vrot.slane %v2127_v23, 4  ;;  %v2134_v61 = vrot.slane %v8962_v41, 5  ;;  %v2143_v51 = vor.u32 %v2142_v36, %v2140_v55 }
  0xc7   : > { %2328 = vrot.lane.b32.xlu0 %v6997_v5, %s8898_s10  ;;  %v2138_v7 = vor.u32 %v2137_v58, %v2136_v57  ;;  %v7186_v3 = vcombine.low %v2119_v52, %v2124_v21  ;;  %v2160_v58 = vrot.slane %v8963_v22, 6  ;;  %v8972_v21 = vld [vmem:[#allocation48_spill] sm:$0xff] }
  0xc8   : > { %v873_v34 = vpop.permute.xlu0 %872  ;;  %v930_v50 = vpop.permute.xlu1 %929  ;;  %v2130_v41 = vsel %vm6908_vm4, %v2128_v0, %v2129_v1  ;;  %v2144_v57 = vrot.slane %v2143_v51, 4  ;;  %v2223_v0 = vrot.slane %v8972_v21, 6 }
  0xc9   : > { %v1023_v13 = vsel %vm1017_vm2, %v1006_v20, %v873_v34  ;;  %v2159_v34 = vsel %vm6818_vm11, %v2155_v42, %v2158_v16  ;;  %v2139_v28 = vrot.slane %v2138_v7, 4  ;;  %v2165_v16 = vrot.slane %v8966_v59, 7 }
  0xca   : > { %2330 = vrot.lane.b32.xlu1 %v7061_v8, %s8898_s10  ;;  %v1040_v46 = vsel %vm1034_vm5, %v1023_v13, %v892_v37  ;;  %v2133_v37 = vrot.slane %v2132_v63, 4  ;;  %v8971_v13 = vld [vmem:[#allocation50_spill] sm:$0xff]  ;;  %v2161_v63 = vrot.slane %v8964_v56, 7 }
  0xcb   : > { %2372 = vrot.lane.b32.xlu0 %v7135_v44, %s8899_s11  ;;  %v2145_v23 = vrot.slane %v8971_v13, 5  ;;  %v2141_v22 = vsel %vm6908_vm4, %v2139_v28, %v2140_v55 }
  0xcc   : > { %v7168_v30 = vpop.permute.xlu0 %910  ;;  %v818_v53 = vpop.permute.xlu1 %817 }
  0xcd   : > { %v1057_v10 = vsel %vm1051_vm6, %v1040_v46, %v7168_v30  ;;  %v2146_v56 = vsel %vm6908_vm4, %v2144_v57, %v2145_v23 }
  0xce   : > { %v1074_v49 = vsel %vm1068_vm7, %v1057_v10, %v930_v50  ;;  %2374 = vrot.lane.b32.xlu1 %v7161_v15, %s8899_s11  ;;  %v8970_v50 = vld [vmem:[#allocation14_spill] sm:$0xff] }
  0xcf   : > { %2308 = vrot.lane.b32.xlu0 %v7067_v11, %s5978_s24  ;;  %4825 = vmatmul.mubr.msk.bf16.gmra.mxu0 %vm1145_vm9, %v1074_v49  ;;  %v2154_v11 = vsel %vm6818_vm11, %v2150_v48, %v2153_v27  ;;  %v2135_v27 = vsel %vm6908_vm4, %v2133_v37, %v2134_v61  ;;  %v7225_v10 = vld [vmem:[%s6093_s14 + $0x90] sm:$0xf]  ;;  %v8975_v61 = vld [vmem:[#allocation52_spill] sm:$0xff] }
  0xd0   : > { %4834 = vmatmul.mubr.msk.bf16.gmra.mxu1 %vm1145_vm9, %v1074_v49  ;;  %v7182_v20 = vpop.permute.xlu0 %777  ;;  %v7184_v12 = vpop.permute.xlu1 %855  ;;  %1237 = vmatprep.mubr.bf16.mxu0 %v8943_v14  ;;  %v7210_v48 = vcombine.low %v2154_v11, %v2159_v34  ;;  %v7212_v42 = vcombine.low %v2130_v41, %v2135_v27  ;;  %v8974_v49 = vld [vmem:[#allocation51_spill] sm:$0xff]  ;;  %v2228_v51 = vrot.slane %v8975_v61, 7  ;;  %v7232_v11 = vld [vmem:[%s6093_s14 + $0x94] sm:$0xf]  ;;  %v7242_v27 = vshrl.u32 %v7225_v10, 16 }
  0xd1   : > { %8968 = vst [vmem:[#allocation5_spill] sm:$0xff] %v7182_v20  ;;  %8969 = vst [vmem:[#allocation12_spill] sm:$0xff] %v7184_v12  ;;  %1350 = vmatprep.mubr.bf16.mxu1 %v8943_v14  ;;  %v953_v25 = vsel %vm941_vm14, %v8970_v50, %v7182_v20  ;;  %v2227_v37 = vrot.slane %v8974_v49, 6  ;;  %v2179_v23 = vrot.slane %v8974_v49, 4  ;;  %v7245_v57 = vshll.u32 %v7225_v10, 16 }
  0xd2   : > { %2310 = vrot.lane.b32.xlu1 %v6995_v62, %s5978_s24  ;;  %v974_v1 = vsel %vm966_vm15, %v953_v25, %v818_v53  ;;  %v2164_v62 = vrot.slane %v8967_v40, 6  ;;  %v2162_v53 = vor.u32 %v2161_v63, %v2160_v58  ;;  %v8973_v40 = vld [vmem:[#allocation49_spill] sm:$0xff]  ;;  %v2173_v25 = vrot.slane %v8972_v21, 4  ;;  %v8976_v63 = vld [vmem:[#allocation42_spill] sm:$0xff] }
  0xd3   : > { %2352 = vrot.lane.b32.xlu0 %v7086_v9, %s8823_s30  ;;  %v2224_v7 = vrot.slane %v8973_v40, 7  ;;  %v2174_v59 = vrot.slane %v8973_v40, 5  ;;  %v7257_v21 = vshrl.u32 %v7232_v11, 16  ;;  %v2170_v49 = vrot.slane %v8971_v13, 7 }
  0xd4   : > { %v837_v36 = vpop.permute.xlu0 %836  ;;  %v894_v52 = vpop.permute.xlu1 %893  ;;  %v2163_v58 = vrot.slane %v2162_v53, 4  ;;  %v2166_v40 = vor.u32 %v2165_v16, %v2164_v62  ;;  %v2229_v20 = vor.u32 %v2228_v51, %v2227_v37  ;;  %v8982_v62 = vrot.slane %v8975_v61, 5 }
  0xd5   : > { %v991_v46 = vsel %vm983_vm0, %v974_v1, %v837_v36  ;;  %v8977_v1 = vshrl.u32 %v8976_v63, 16  ;;  %v2187_v13 = vrot.slane %v7242_v27, 4  ;;  %v2200_v51 = vrot.slane %v7257_v21, 4 }
  0xd6   : > { %2354 = vrot.lane.b32.xlu1 %v7115_v43, %s8823_s30  ;;  %v1008_v55 = vsel %vm1000_vm1, %v991_v46, %v7184_v12  ;;  %v7254_v46 = vshll.u32 %v7232_v11, 16  ;;  %v2175_v12 = vor.u32 %v2174_v59, %v2173_v25  ;;  %v2180_v16 = vor.u32 %v2179_v23, %v8982_v62  ;;  %v7292_v23 = vld [vmem:[%s6093_s14 + $0x98] sm:$0x7] }
  0xd7   : > { %2401 = vrot.lane.b32.xlu0 %v7186_v3, %s5981_s5  ;;  %v2169_v36 = vrot.slane %v8977_v1, 6  ;;  %v2225_v1 = vor.u32 %v2224_v7, %v2223_v0  ;;  %v5714_v0 = vld [vmem:[%s8703_s2 + $0xf8] sm:$0xff]   ;;  %v7283_v7 = vcombine.low %v2141_v22, %v2146_v56  ;;  %v2167_v25 = vsel %vm6818_vm11, %v2163_v58, %v2166_v40 }
  0xd8   : > { %v875_v34 = vpop.permute.xlu0 %874  ;;  %v932_v50 = vpop.permute.xlu1 %931  ;;  %v8817_v37 = vrot.slane %v7254_v46, 5  ;;  %v2168_v59 = vrot.slane %v2166_v40, 4  ;;  %v2231_v56 = vrot.slane %v2229_v20, 4  ;;  %v2181_v40 = vrot.slane %v2180_v16, 4  ;;  %5284 = vmatprep.subr.bf16.mxu1 %v5714_v0  ;;  %v5717_v0 = vld [vmem:[%s8703_s2 + $0x70] sm:$0xff]  }
  0xd9   : > { %v1025_v28 = vsel %vm1017_vm2, %v1008_v55, %v875_v34  ;;  %v8978_v55 = vld [vmem:[#allocation47_spill] sm:$0xff]  ;;  %v2226_v22 = vrot.slane %v2225_v1, 4 }
  0xda   : > { %2403 = vrot.lane.b32.xlu1 %v7210_v48, %s5981_s5  ;;  %v8979_v34 = vshrl.u32 %v8978_v55, 16  ;;  %v1042_v5 = vsel %vm1034_vm5, %v1025_v28, %v894_v52  ;;  %v2190_v55 = vrot.slane %v7245_v57, 5  ;;  %v5713_v52 = vld [vmem:[%s8703_s2 + $0x78] sm:$0xff]   ;;  %v2171_v28 = vor.u32 %v2170_v49, %v2169_v36 }
  0xdb   : > { %2332 = vrot.lane.b32.xlu0 %v7135_v44, %s8898_s10  ;;  %v8980_v44 = vld [vmem:[#allocation53_spill] sm:$0xff]  ;;  %v2176_v36 = vrot.slane %v2175_v12, 4  ;;  %5220 = vmatprep.subr.bf16.mxu0 %v5713_v52  ;;  %v2237_v12 = vrot.slane %v7245_v57, 7  ;;  %v5715_v1 = vld [vmem:[%s8703_s2 + $0x38] sm:$0xff]   ;;  %v2241_v52 = vrot.slane %v7254_v46, 7 }
  0xdc   : > { %v2232_v41 = vrot.slane %v8979_v34, 6  ;;  %v2233_v8 = vrot.slane %v8980_v44, 7  ;;  %v7264_v53 = vpop.permute.xlu0 %912  ;;  %v820_v63 = vpop.permute.xlu1 %819  ;;  %v2182_v62 = vrot.slane %v8980_v44, 5  ;;  %v2191_v49 = vor.u32 %v2190_v55, %v2187_v13  ;;  %5221 = vmatpush3.bf16.msra.mxu0 %v5715_v1 }
  0xdd   : > { %8981 = vst [vmem:[#allocation19_spill] sm:$0xff] %v7264_v53  ;;  %v1059_v18 = vsel %vm1051_vm6, %v1042_v5, %v7264_v53  ;;  %v7311_v44 = vshll.u32 %v7292_v23, 16  ;;  %v2172_v16 = vsel %vm6818_vm11, %v2168_v59, %v2171_v28  ;;  %v2240_v55 = vrot.slane %v7257_v21, 6  ;;  %5222 = vmatprep.subr.bf16.mxu0 %v5717_v0 }
  0xde   : > { %v1076_v5 = vsel %vm1068_vm7, %v1059_v18, %v932_v50  ;;  %2334 = vrot.lane.b32.xlu1 %v7161_v15, %s8898_s10  ;;  %v2234_v34 = vor.u32 %v2233_v8, %v2232_v41  ;;  %v2201_v8 = vor.u32 %v2200_v51, %v8817_v37  ;;  %v2236_v41 = vrot.slane %v7242_v27, 6  ;;  %v5718_v51 = vld [vmem:[%s8703_s2 + $0xf0] sm:$0xff]  }
  0xdf   : > { %2376 = vrot.lane.b32.xlu0 %v7212_v42, %s8899_s11  ;;  %4826 = vmatmul.mubr.msk.bf16.gmra.mxu0 %vm1145_vm9, %v1076_v5  ;;  %v7335_v59 = vsel %vm6818_vm11, %v2226_v22, %v2229_v20  ;;  %v2192_v20 = vrot.slane %v2191_v49, 4  ;;  %v5721_v49 = vld [vmem:[%s8703_s2 + $0x68] sm:$0xff]  }
  0xe0   : > { %4835 = vmatmul.mubr.msk.bf16.gmra.mxu1 %vm1145_vm9, %v1076_v5  ;;  %v7294_v18 = vpop.permute.xlu0 %779  ;;  %v7296_v50 = vpop.permute.xlu1 %857  ;;  %1247 = vmatprep.mubr.bf16.mxu0 %v8943_v14  ;;  %v8985_v5 = vld [vmem:[#allocation21_spill] sm:$0xff]  ;;  %v7339_v28 = vsel %vm6818_vm11, %v2231_v56, %v2234_v34  ;;  %v7359_v22 = vor.u32 %v2237_v12, %v2236_v41  ;;  %v5719_v56 = vld [vmem:[%s8703_s2 + $0x30] sm:$0xff]  }
  0xe1   : > { %8983 = vst [vmem:[#allocation18_spill] sm:$0xff] %v7294_v18  ;;  %8984 = vst [vmem:[#allocation6_spill] sm:$0xff] %v7296_v50  ;;  %1360 = vmatprep.mubr.bf16.mxu1 %v8943_v14  ;;  %v956_v58 = vsel %vm941_vm14, %v8985_v5, %v7294_v18  ;;  %v8986_v18 = vrot.slane %v8975_v61, 5  ;;  %v2202_v61 = vrot.slane %v2201_v8, 4  ;;  %v5720_v34 = vld [vmem:[%s8703_s2 + $0xb0] sm:$0xff]   ;;  %v5722_v8 = vld [vmem:[%s8703_s2 + $0xe8] sm:$0xff]   ;;  %5223 = vmatpush3.bf16.msra.mxu0 %v5719_v56 }
  0xe2   : > { %2378 = vrot.lane.b32.xlu1 %v7283_v7, %s8899_s11  ;;  %v976_v5 = vsel %vm966_vm15, %v956_v58, %v820_v63  ;;  %v7350_v63 = vsel %vm6908_vm4, %v2181_v40, %v2182_v62  ;;  %v4896_v62 = vcombine.low %v7335_v59, %v7339_v28  ;;  %v7375_v40 = vld [vmem:[%s6093_s14] sm:$0xf]  ;;  %v2213_v59 = vrot.slane %v7254_v46, 6  ;;  %5224 = vmatprep.subr.bf16.mxu0 %v5721_v49 }
  0xe3   : > { %2312 = vrot.lane.b32.xlu0 %v7086_v9, %s5978_s24  ;;  %v5716_v9 = vld [vmem:[%s8703_s2 + $0xb8] sm:$0xff]   ;;  %v7346_v53 = vsel %vm6908_vm4, %v2176_v36, %v8986_v18  ;;  %v2206_v18 = vrot.slane %v7311_v44, 5  ;;  %v2246_v36 = vrot.slane %v7311_v44, 7  ;;  %v3340_v28 = vshrl.u32 %v7375_v40, 16 }
  0xe4   : > { %v839_v37 = vpop.permute.xlu0 %838  ;;  %v896_v15 = vpop.permute.xlu1 %895  ;;  %5285 = vmatpush3.bf16.msra.mxu1 %v5716_v9 }
  0xe5   : > { %v993_v13 = vsel %vm983_vm0, %v976_v5, %v839_v37  ;;  %5286 = vmatprep.subr.bf16.mxu1 %v5718_v51  ;;  %v7356_v37 = vcombine.low %v2167_v25, %v2172_v16  ;;  %v8987_v25 = vshrl.u32 %v7292_v23, 16  ;;  %v2208_v16 = vrot.slane %v7242_v27, 5 }
  0xe6   : > { %2314 = vrot.lane.b32.xlu1 %v7115_v43, %s5978_s24  ;;  %v7369_v43 = vor.u32 %v2241_v52, %v2240_v55  ;;  %v1010_v41 = vsel %vm1000_vm1, %v993_v13, %v7296_v50  ;;  %v2209_v55 = vrot.slane %v7245_v57, 6  ;;  %v7390_v52 = vld [vmem:[%s6093_s14 + $0x4] sm:$0xf]  ;;  %v8988_v51 = vrot.slane %v7254_v46, 5  ;;  %v5723_v46 = vld [vmem:[%s8703_s2 + $0x28] sm:$0xff]  }
  0xe7   : > { %2356 = vrot.lane.b32.xlu0 %v7186_v3, %s8823_s30  ;;  %v2245_v58 = vrot.slane %v8987_v25, 6  ;;  %v2212_v5 = vrot.slane %v7257_v21, 5  ;;  %v7407_v27 = vsel %vm6908_vm4, %v2202_v61, %v2206_v18  ;;  %v2239_v57 = vrot.slane %v7359_v22, 4  ;;  %v5725_v22 = vld [vmem:[%s8703_s2 + $0x60] sm:$0xff]   ;;  %5225 = vmatpush3.bf16.msra.mxu0 %v5723_v46 }
  0xe8   : > { %v877_v12 = vpop.permute.xlu0 %876  ;;  %v934_v1 = vpop.permute.xlu1 %933  ;;  %5287 = vmatpush3.bf16.msra.mxu1 %v5720_v34  ;;  %v7397_v13 = vsel %vm6908_vm4, %v2192_v20, %v8988_v51  ;;  %v3343_v21 = vshll.u32 %v7375_v40, 16  ;;  %v5724_v20 = vld [vmem:[%s8703_s2 + $0xa8] sm:$0xff]   ;;  %v3349_v61 = vshrl.u32 %v7390_v52, 16  ;;  %v3352_v18 = vshll.u32 %v7390_v52, 16  ;;  %v5726_v34 = vld [vmem:[%s8703_s2 + $0xe0] sm:$0xff]   ;;  %5226 = vmatprep.subr.bf16.mxu0 %v5725_v22 }
  0xe9   : > { %v1027_v0 = vsel %vm1017_vm2, %v1010_v41, %v877_v12  ;;  %5288 = vmatprep.subr.bf16.mxu1 %v5722_v8  ;;  %v2247_v56 = vor.u32 %v2246_v36, %v2245_v58  ;;  %v7430_v41 = vor.u32 %v2209_v55, %v2208_v16  ;;  %v8990_v58 = vshrl.u32 %v7292_v23, 16  ;;  %v7436_v51 = vld [vmem:[%s6093_s14 + $0x8] sm:$0x7]  ;;  %v5727_v16 = vld [vmem:[%s8703_s2 + $0x20] sm:$0xff]  }
  0xea   : > { %2358 = vrot.lane.b32.xlu1 %v7210_v48, %s8823_s30  ;;  %v2244_v48 = vrot.slane %v7369_v43, 4  ;;  %v1044_v25 = vsel %vm1034_vm5, %v1027_v0, %v896_v15  ;;  %v2220_v12 = vrot.slane %v7311_v44, 6  ;;  %v2214_v50 = vor.u32 %v2213_v59, %v2212_v5  ;;  %v5728_v44 = vld [vmem:[%s8703_s2 + $0xa0] sm:$0xff]   ;;  %s8996_s30 = smov 20  }
  0xeb   : > { %2405 = vrot.lane.b32.xlu0 %v7356_v37, %s5981_s5  ;;  %v2219_v36 = vrot.slane %v8990_v58, 5  ;;  %v3378_v15 = vrot.slane %v7390_v52, 7  ;;  %v3342_v0 = vrot.slane %v3340_v28, 5  ;;  %v3345_v5 = vrot.slane %v3343_v21, 6  ;;  %5227 = vmatpush3.bf16.msra.mxu0 %v5727_v16 }
  0xec   : > { %v7428_v49 = vpop.permute.xlu0 %914  ;;  %v822_v8 = vpop.permute.xlu1 %821  ;;  %5289 = vmatpush3.bf16.msra.mxu1 %v5724_v20  ;;  %v3351_v59 = vrot.slane %v3349_v61, 5  ;;  %v3354_v46 = vrot.slane %v3352_v18, 6  ;;  %v3359_v20 = vshrl.u32 %v7436_v51, 16  ;;  %v3362_v22 = vshll.u32 %v7436_v51, 16  ;;  %v8992_v18 = vld [vmem:[#allocation28_spill] sm:$0xff] }
  0xed   : > { %8989 = vst [vmem:[#allocation20_spill] sm:$0xff] %v7428_v49  ;;  %v1061_v9 = vsel %vm1051_vm6, %v1044_v25, %v7428_v49  ;;  %5290 = vmatprep.subr.bf16.mxu1 %v5726_v34  ;;  %v2211_v28 = vrot.slane %v7430_v41, 4  ;;  %v2221_v21 = vor.u32 %v2220_v12, %v2219_v36  ;;  %v5034_v61 = vrot.slane %v7375_v40, 11  ;;  %v5731_v41 = vld [vmem:[%s8703_s2 + $0x18] sm:$0xff]  }
  0xee   : > { %v1078_v55 = vsel %vm1068_vm7, %v1061_v9, %v934_v1  ;;  %2407 = vrot.lane.b32.xlu1 %v4896_v62, %s5981_s5  ;;  %v5730_v62 = vld [vmem:[%s8703_s2 + $0xd8] sm:$0xff]   ;;  %v2216_v25 = vrot.slane %v2214_v50, 4  ;;  %v3381_v49 = vrot.slane %v7436_v51, 7  ;;  %v8995_v12 = vcombine.low %v7346_v53, %v7350_v63 }
  0xef   : > { %2336 = vrot.lane.b32.xlu0 %v7212_v42, %s8898_s10  ;;  %4827 = vmatmul.mubr.msk.bf16.gmra.mxu0 %vm1145_vm9, %v1078_v55  ;;  %v5729_v42 = vld [vmem:[%s8703_s2 + $0x58] sm:$0xff]   ;;  %v4894_v51 = vcombine.low %v7397_v13, %v7407_v27  ;;  %v2243_v16 = vsel %vm6818_vm11, %v2239_v57, %v7369_v43  ;;  %v2248_v60 = vsel %vm6818_vm11, %v2244_v48, %v2247_v56  ;;  %v3361_v63 = vrot.slane %v3359_v20, 5  ;;  %v5733_v13 = vld [vmem:[%s8703_s2 + $0x50] sm:$0xff]  }
  0xf0   : > { %4836 = vmatmul.mubr.msk.bf16.gmra.mxu1 %vm1145_vm9, %v1078_v55  ;;  %v7461_v1 = vpop.permute.xlu0 %781  ;;  %v7463_v9 = vpop.permute.xlu1 %859  ;;  %1257 = vmatprep.mubr.bf16.mxu0 %v8943_v14  ;;  %v3380_v55 = vrot.slane %v3378_v15, 4  ;;  %v5732_v36 = vld [vmem:[%s8703_s2 + $0x98] sm:$0xff]   ;;  %v7502_v53 = vor.u32 %v3354_v46, %v3351_v59  ;;  %v5734_v43 = vld [vmem:[%s8703_s2 + $0xd0] sm:$0xff]   ;;  %v7513_v48 = vsel %vm6202_vm8, %v2211_v28, %v2214_v50  ;;  %v7517_v56 = vsel %vm7474_vm13, %v5034_v61, %v3378_v15  ;;  %v7540_v61 = vld [vmem:[%s6093_s14 + $0x4c] sm:$0xf] }
  0xf1   : > { %8991 = vst [vmem:[#allocation15_spill] sm:$0xff] %v7461_v1  ;;  %1370 = vmatprep.mubr.bf16.mxu1 %v8943_v14  ;;  %v959_v34 = vsel %vm941_vm14, %v8992_v18, %v7461_v1  ;;  %5291 = vmatpush3.bf16.msra.mxu1 %v5728_v44  ;;  %v3346_v44 = vor.u32 %v3345_v5, %v3342_v0  ;;  %v7497_v18 = vld [vmem:[%s6093_s14 + $0x28] sm:$0xf]  ;;  %v5736_v50 = vld [vmem:[%s8703_s2 + $0x10] sm:$0xff]  }
  0xf2   : > { %2338 = vrot.lane.b32.xlu1 %v7283_v7, %s8898_s10  ;;  %v3399_v1 = vrot.slane %v7497_v18, 7  ;;  %v3364_v7 = vrot.slane %v3362_v22, 6  ;;  %5228 = vmatprep.subr.bf16.mxu0 %v5729_v42  ;;  %v978_v27 = vsel %vm966_vm15, %v959_v34, %v822_v8  ;;  %v2222_v5 = vsel %vm6202_vm8, %v2216_v25, %v2221_v21  ;;  %v7525_v8 = vld [vmem:[%s6093_s14 + $0x24] sm:$0xf]  ;;  %v5737_v15 = vld [vmem:[%s8703_s2 + $0x90] sm:$0xff]  }
  0xf3   : > { %2380 = vrot.lane.b32.xlu0 %v8995_v12, %s8899_s11  ;;  %5292 = vmatprep.subr.bf16.mxu1 %v5730_v62  ;;  %v3382_v59 = vsel %vm7474_vm13, %v3380_v55, %v3381_v49  ;;  %v5037_v46 = vrot.slane %v7525_v8, 11  ;;  %v4897_v49 = vcombine.low %v2243_v16, %v2248_v60  ;;  %v3347_v20 = vrot.slane %v3346_v44, 4  ;;  %v5848_v42 = vld [vmem:[%s6093_s14 + $0x2c] sm:$0x7]  ;;  %v7557_v44 = vld [vmem:[%s6093_s14 + $0x48] sm:$0xf] }
  0xf4   : > { %v841_v57 = vpop.permute.xlu0 %840  ;;  %v898_v2 = vpop.permute.xlu1 %897  ;;  %5229 = vmatpush3.bf16.msra.mxu0 %v5731_v41  ;;  %v3401_v22 = vrot.slane %v3399_v1, 4  ;;  %v3402_v62 = vrot.slane %v5848_v42, 7  ;;  %v3357_v28 = vrot.slane %v7502_v53, 4  ;;  %v3365_v21 = vor.u32 %v3364_v7, %v3361_v63  ;;  %v5739_v60 = vld [vmem:[%s8703_s2 + $0xc8] sm:$0xff]   ;;  %v5851_v7 = vld [vmem:[%s6093_s14 + $0x50] sm:$0x7] }
  0xf5   : > { %v995_v0 = vsel %vm983_vm0, %v978_v27, %v841_v57  ;;  %5293 = vmatpush3.bf16.msra.mxu1 %v5732_v36  ;;  %v3420_v34 = vrot.slane %v7540_v61, 7  ;;  %5230 = vmatprep.subr.bf16.mxu0 %v5733_v13  ;;  %v4895_v36 = vcombine.low %v7513_v48, %v2222_v5  ;;  %v5057_v12 = vcombine.low %v7517_v56, %v3382_v59  ;;  %v5740_v48 = vld [vmem:[%s8703_s2 + $0x8] sm:$0xff]  }
  0xf6   : > { %2382 = vrot.lane.b32.xlu1 %v4894_v51, %s8899_s11  ;;  %5294 = vmatprep.subr.bf16.mxu1 %v5734_v43  ;;  %v1012_v25 = vsel %vm1000_vm1, %v995_v0, %v7463_v9  ;;  %v3400_v16 = vsel %vm7474_vm13, %v5037_v46, %v3399_v1  ;;  %v5040_v63 = vrot.slane %v7557_v44, 11  ;;  %v3423_v13 = vrot.slane %v5851_v7, 7 }
  0xf7   : > { %2316 = vrot.lane.b32.xlu0 %v7186_v3, %s5978_s24  ;;  %v5738_v3 = vld [vmem:[%s8703_s2 + $0x48] sm:$0xff]   ;;  %v3356_v43 = vsel %vm6202_vm8, %v3347_v20, %v7502_v53  ;;  %v3403_v1 = vsel %vm7474_vm13, %v3401_v22, %v3402_v62  ;;  %v5046_v57 = vrot.slane %v7225_v10, 11  ;;  %v3366_v56 = vsel %vm6202_vm8, %v3357_v28, %v3365_v21  ;;  %v5852_v28 = vld [vmem:[%s6093_s14 + $0x10] sm:$0xf] }
  0xf8   : > { %v879_v55 = vpop.permute.xlu0 %878  ;;  %v936_v41 = vpop.permute.xlu1 %935  ;;  %5231 = vmatpush3.bf16.msra.mxu0 %v5736_v50  ;;  %v3422_v53 = vrot.slane %v3420_v34, 4  ;;  %v3496_v0 = vrot.slane %v7232_v11, 7  ;;  %v3499_v5 = vrot.slane %v7292_v23, 7  ;;  %v5742_v23 = vld [vmem:[%s8703_s2 + $0x40] sm:$0xff]   ;;  %v5056_v42 = vcombine.low %v3356_v43, %v3366_v56  ;;  %v5856_v56 = vld [vmem:[%s6093_s14 + $0x1c] sm:$0xf] }
  0xf9   : > { %v1029_v51 = vsel %vm1017_vm2, %v1012_v25, %v879_v55  ;;  %5295 = vmatpush3.bf16.msra.mxu1 %v5737_v15  ;;  %5232 = vmatprep.subr.bf16.mxu0 %v5738_v3  ;;  %v7600_v62 = vcombine.low %v3400_v16, %v3403_v1  ;;  %v3385_v21 = vrot.slane %v5852_v28, 7  ;;  %v3421_v3 = vsel %vm7474_vm13, %v5040_v63, %v3420_v34  ;;  %v5744_v55 = vld [vmem:[%s8703_s2] sm:$0xff]   ;;  %v5853_v63 = vld [vmem:[%s6093_s14 + $0xc] sm:$0xf] }
  0xfa   : > { %2409 = vrot.lane.b32.xlu1 %v4897_v49, %s5981_s5  ;;  %5296 = vmatprep.subr.bf16.mxu1 %v5739_v60  ;;  %v1046_v59 = vsel %vm1034_vm5, %v1029_v51, %v898_v2  ;;  %v7589_v49 = vsel %vm7474_vm13, %v5046_v57, %v3496_v0  ;;  %v3498_v20 = vrot.slane %v3496_v0, 4  ;;  %v5743_v2 = vld [vmem:[%s8703_s2 + $0xc0] sm:$0xff]   ;;  %v3424_v60 = vsel %vm7474_vm13, %v3422_v53, %v3423_v13  ;;  %v8998_v51 = vld [vmem:[#allocation38_spill] sm:$0xff] }
  0xfb   : > { %2360 = vrot.lane.b32.xlu0 %v7356_v37, %s8996_s30  ;;  %v5741_v37 = vld [vmem:[%s8703_s2 + $0x88] sm:$0xff]   ;;  %v5035_v7 = vrot.slane %v5853_v63, 11  ;;  %v5854_v13 = vld [vmem:[%s6093_s14 + $0x34] sm:$0xf]  ;;  %v7635_v1 = vcombine.low %v3421_v3, %v3424_v60  ;;  %v3387_v57 = vrot.slane %v3385_v21, 4  ;;  %v3392_v53 = vrot.slane %v5856_v56, 7 }
  0xfc   : > { %v7583_v46 = vpop.permute.xlu0 %916  ;;  %v824_v50 = vpop.permute.xlu1 %823  ;;  %5233 = vmatpush3.bf16.msra.mxu0 %v5740_v48  ;;  %v7611_v25 = vsel %vm7474_vm13, %v3498_v20, %v3499_v5  ;;  %v3406_v43 = vrot.slane %v5854_v13, 7  ;;  %v5855_v48 = vld [vmem:[%s6093_s14 + $0x14] sm:$0x7]  ;;  %v7641_v0 = vcombine.low %v7525_v8, %v7497_v18  ;;  %v5857_v20 = vld [vmem:[%s6093_s14 + $0x30] sm:$0xf] }
  0xfd   : > { %v1063_v15 = vsel %vm1051_vm6, %v1046_v59, %v7583_v46  ;;  %5297 = vmatpush3.bf16.msra.mxu1 %v5741_v37  ;;  %5234 = vmatprep.subr.bf16.mxu0 %v5742_v23  ;;  %v3388_v37 = vrot.slane %v5855_v48, 7  ;;  %v5038_v23 = vrot.slane %v5857_v20, 11  ;;  %v3386_v18 = vsel %vm7474_vm13, %v5035_v7, %v3385_v21  ;;  %v7661_v21 = vld [vmem:[%s6093_s14 + $0x40] sm:$0xf] }
  0xfe   : > { %v1080_v22 = vsel %vm1068_vm7, %v1063_v15, %v936_v41  ;;  %3561 = vrot.lane.b32.xlu1 %v5057_v12, %s5978_s24  ;;  %v5745_v41 = vld [vmem:[%s8703_s2 + $0x80] sm:$0xff]   ;;  %5298 = vmatprep.subr.bf16.mxu1 %v5743_v2  ;;  %v5858_v2 = vld [vmem:[%s6093_s14 + $0x38] sm:$0x7]  ;;  %v3408_v8 = vrot.slane %v3406_v43, 4  ;;  %v3413_v7 = vrot.slane %v7661_v21, 7 }
  0xff   : > { %2387 = vrot.lane.b32.xlu0 %v4895_v36, %s8997_s8  ;;  %4828 = vmatmul.mubr.msk.bf16.gmra.mxu0 %vm1145_vm9, %v1080_v22  ;;  %v3389_v60 = vsel %vm7474_vm13, %v3387_v57, %v3388_v37  ;;  %v7670_v37 = vcombine.low %v5857_v20, %v5854_v13 }
 0x100   : > { %4837 = vmatmul.mubr.msk.bf16.gmra.mxu1 %vm1145_vm9, %v1080_v22  ;;  %v7619_v36 = vpop.permute.xlu0 %783  ;;  %v7621_v12 = vpop.permute.xlu1 %861  ;;  %1267 = vmatprep.mubr.bf16.mxu0 %v8943_v14  ;;  %v3409_v22 = vrot.slane %v5858_v2, 7 }
 0x101   : > { %1380 = vmatprep.mubr.bf16.mxu1 %v8943_v14  ;;  %v962_v16 = vsel %vm941_vm14, %v8998_v51, %v7619_v36  ;;  %5235 = vmatpush3.bf16.msra.mxu0 %v5744_v55  ;;  %v3394_v55 = vrot.slane %v3392_v53, 4  ;;  %9001 = vst [vmem:[#allocation24_spill] sm:$0xff] %v7670_v37 }
 0x102   : > { %3611 = vrot.lane.b32.xlu1 %v7600_v62, %s8996_s30  ;;  %5299 = vmatpush3.bf16.msra.mxu1 %v5745_v41  ;;  %v980_v5 = vsel %vm966_vm15, %v962_v16, %v824_v50  ;;  %v5860_v41 = vld [vmem:[%s6093_s14 + $0x20] sm:$0x7]  ;;  %v5861_v16 = vld [vmem:[%s6093_s14 + $0x58] sm:$0xf] }
 0x103   : > { %3535 = vrot.lane.b32.xlu0 %v5056_v42, %s8999_s6  ;;  %v5859_v42 = vld [vmem:[%s6093_s14 + $0x18] sm:$0xf]  ;;  %v3395_v51 = vrot.slane %v5860_v41, 7  ;;  %v3427_v63 = vrot.slane %v5861_v16, 7  ;;  %v5863_v41 = vld [vmem:[%s6093_s14 + $0x54] sm:$0xf]  ;;  %s4671_s6 = sadd.s32 %s5959_s18, %s5215_s13 }
 0x104   : > { %v843_v59 = vpop.permute.xlu0 %842  ;;  %v900_v15 = vpop.permute.xlu1 %899  ;;  %v5036_v28 = vrot.slane %v5859_v42, 11  ;;  %v5058_v42 = vcombine.low %v3386_v18, %v3389_v60  ;;  %v5041_v50 = vrot.slane %v5863_v41, 11  ;;  %s5216_s27 = sshll.u32 %s4671_s6, 6  ;;  %s5986_s18 = smov [#allocation2]  }
 0x105   : > { %v997_v3 = vsel %vm983_vm0, %v980_v5, %v843_v59  ;;  %v7668_v5 = vcombine.low %v7557_v44, %v7540_v61  ;;  %v3407_v59 = vsel %vm7474_vm13, %v5038_v23, %v3406_v43  ;;  %v3396_v44 = vsel %vm7474_vm13, %v3394_v55, %v3395_v51  ;;  %v5864_v43 = vld [vmem:[%s6093_s14 + $0x5c] sm:$0x7]  ;;  %s5887_s19 = sshll.u32 %s5986_s18, 4  ;;  %s5888_s19 = int_to_ptr.vmem [resolvable:$false] %s5887_s19 }
 0x106   : > { %3666 = vrot.lane.b32.xlu1 %v7635_v1, %s5981_s5  ;;  %v1014_v48 = vsel %vm1000_vm1, %v997_v3, %v7621_v12  ;;  %v3410_v3 = vsel %vm7474_vm13, %v3408_v8, %v3409_v22  ;;  %v3393_v61 = vsel %vm7474_vm13, %v5036_v28, %v3392_v53  ;;  %v3429_v13 = vrot.slane %v3427_v63, 4  ;;  %v5865_v23 = vld [vmem:[%s6093_s14 + $0x3c] sm:$0xf]  ;;  %v5866_v8 = vld [vmem:[%s6093_s14 + $0x44] sm:$0x7] }
 0x107   : > { %3586 = vrot.lane.b32.xlu0 %v7641_v0, %s8898_s10  ;;  %9000 = vst [vmem:[#allocation23_spill] sm:$0xff] %v7668_v5  ;;  %v3430_v20 = vrot.slane %v5864_v43, 7  ;;  %v5039_v18 = vrot.slane %v5865_v23, 11  ;;  %v3415_v22 = vrot.slane %v3413_v7, 4  ;;  %v3416_v60 = vrot.slane %v5866_v8, 7 }
 0x108   : > { %v881_v56 = vpop.permute.xlu0 %880  ;;  %v938_v57 = vpop.permute.xlu1 %937  ;;  %v7693_v53 = vcombine.low %v5863_v41, %v5861_v16  ;;  %v7697_v55 = vcombine.low %v3407_v59, %v3410_v3  ;;  %v3428_v51 = vsel %vm7474_vm13, %v5041_v50, %v3427_v63 }
 0x109   : > { %v1031_v2 = vsel %vm1017_vm2, %v1014_v48, %v881_v56  ;;  %v5867_v48 = vld [vmem:[%s6093_s14 + $0x64] sm:$0xf]  ;;  %v3431_v16 = vsel %vm7474_vm13, %v3429_v13, %v3430_v20  ;;  %v3417_v50 = vsel %vm7474_vm13, %v3415_v22, %v3416_v60 }
 0x10a   : > { %3588 = vrot.lane.b32.xlu1 %v7670_v37, %s8898_s10  ;;  %v3434_v56 = vrot.slane %v5867_v48, 7  ;;  %v1048_v27 = vsel %vm1034_vm5, %v1031_v2, %v900_v15  ;;  %9002 = vst [vmem:[#allocation25_spill] sm:$0xff] %v7693_v53  ;;  %v5059_v15 = vcombine.low %v3393_v61, %v3396_v44  ;;  %v5868_v2 = vld [vmem:[%s6093_s14 + $0x60] sm:$0xf] }
 0x10b   : > { %3636 = vrot.lane.b32.xlu0 %v7668_v5, %s8899_s11  ;;  %v5042_v41 = vrot.slane %v5868_v2, 11 }
 0x10c   : > { %v7691_v34 = vpop.permute.xlu0 %918  ;;  %v826_v37 = vpop.permute.xlu1 %825  ;;  %v3436_v63 = vrot.slane %v3434_v56, 4 }
 0x10d   : > { %v1065_v28 = vsel %vm1051_vm6, %v1048_v27, %v7691_v34  ;;  %v3414_v27 = vsel %vm7474_vm13, %v5039_v18, %v3413_v7  ;;  %v7724_v7 = vcombine.low %v3428_v51, %v3431_v16  ;;  %v3435_v13 = vsel %vm7474_vm13, %v5042_v41, %v3434_v56  ;;  %v5870_v16 = vld [vmem:[%s6093_s14 + $0x70] sm:$0xf] }
 0x10e   : > { %v1082_v43 = vsel %vm1068_vm7, %v1065_v28, %v938_v57  ;;  %3638 = vrot.lane.b32.xlu1 %v7693_v53, %s8899_s11  ;;  %v5869_v57 = vld [vmem:[%s6093_s14 + $0x68] sm:$0x7]  ;;  %v7726_v44 = vcombine.low %v3414_v27, %v3417_v50  ;;  %v7743_v51 = vcombine.low %v5865_v23, %v7661_v21  ;;  %v3441_v41 = vrot.slane %v5870_v16, 7 }
 0x10f   : > { %3563 = vrot.lane.b32.xlu0 %v5058_v42, %s5978_s24  ;;  %4829 = vmatmul.mubr.msk.bf16.gmra.mxu0 %vm1145_vm9, %v1082_v43  ;;  %v3437_v59 = vrot.slane %v5869_v57, 7 }
 0x110   : > { %4838 = vmatmul.mubr.msk.bf16.gmra.mxu1 %vm1145_vm9, %v1082_v43  ;;  %v786_v42 = vpop.permute.xlu0 %785  ;;  %v7715_v3 = vpop.permute.xlu1 %863  ;;  %1277 = vmatprep.mubr.bf16.mxu0 %v8943_v14  ;;  %v5065_v43 = vcombine.low %v5868_v2, %v5867_v48  ;;  %v5871_v48 = vld [vmem:[%s6093_s14 + $0x6c] sm:$0xf]  ;;  %v3443_v57 = vrot.slane %v3441_v41, 4 }
 0x111   : > { %9003 = vst [vmem:[#allocation26_spill] sm:$0xff] %v7715_v3  ;;  %1390 = vmatprep.mubr.bf16.mxu1 %v8943_v14  ;;  %v965_v61 = vsel %vm941_vm14, %v6603_v19, %v786_v42  ;;  %v3438_v20 = vsel %vm7474_vm13, %v3436_v63, %v3437_v59  ;;  %v7761_v2 = vcombine.low %v5871_v48, %v5870_v16  ;;  %v5043_v63 = vrot.slane %v5871_v48, 11  ;;  %v5872_v59 = vld [vmem:[%s6093_s14 + $0x74] sm:$0x7] }
 0x112   : > { %3565 = vrot.lane.b32.xlu1 %v5059_v15, %s5978_s24  ;;  %v982_v18 = vsel %vm966_vm15, %v965_v61, %v826_v37  ;;  %v7738_v60 = vcombine.low %v3435_v13, %v3438_v20  ;;  %v3444_v42 = vrot.slane %v5872_v59, 7  ;;  %v5873_v61 = vld [vmem:[%s6093_s14 + $0x7c] sm:$0xf] }
 0x113   : > { %3613 = vrot.lane.b32.xlu0 %v7697_v55, %s8996_s30  ;;  %v3448_v13 = vrot.slane %v5873_v61, 7  ;;  %v3442_v20 = vsel %vm7474_vm13, %v5043_v63, %v3441_v41  ;;  %v5876_v41 = vld [vmem:[%s6093_s14 + $0x88] sm:$0xf] }
 0x114   : > { %v845_v22 = vpop.permute.xlu0 %844  ;;  %v902_v8 = vpop.permute.xlu1 %901 }
 0x115   : > { %v999_v19 = vsel %vm983_vm0, %v982_v18, %v845_v22  ;;  %v3445_v18 = vsel %vm7474_vm13, %v3443_v57, %v3444_v42  ;;  %v5874_v22 = vld [vmem:[%s6093_s14 + $0x78] sm:$0xf]  ;;  %v5877_v57 = vld [vmem:[%s6093_s14 + $0x84] sm:$0xf] }
 0x116   : > { %3615 = vrot.lane.b32.xlu1 %v7726_v44, %s8996_s30  ;;  %v1016_v56 = vsel %vm1000_vm1, %v999_v19, %v7715_v3  ;;  %v5044_v19 = vrot.slane %v5874_v22, 11  ;;  %v5071_v59 = vcombine.low %v5877_v57, %v5876_v41  ;;  %v5045_v42 = vrot.slane %v5877_v57, 11 }
 0x117   : > { %3668 = vrot.lane.b32.xlu0 %v7724_v7, %s5981_s5 }
 0x118   : > { %v883_v28 = vpop.permute.xlu0 %882  ;;  %v940_v15 = vpop.permute.xlu1 %939 }
 0x119   : > { %v1033_v37 = vsel %vm1017_vm2, %v1016_v56, %v883_v28  ;;  %v5875_v56 = vld [vmem:[%s6093_s14 + $0x80] sm:$0x7] }
 0x11a   : > { %3670 = vrot.lane.b32.xlu1 %v7738_v60, %s5981_s5  ;;  %v1050_v27 = vsel %vm1034_vm5, %v1033_v37, %v902_v8  ;;  %v3450_v8 = vrot.slane %v3448_v13, 4  ;;  %v3451_v28 = vrot.slane %v5875_v56, 7  ;;  %v3449_v37 = vsel %vm7474_vm13, %v5044_v19, %v3448_v13  ;;  %v5878_v13 = vld [vmem:[%s6093_s14 + $0x8c] sm:$0x7]  ;;  %v255_v19 = vld [vmem:[%s6093_s14 + $0xa0] sm:$0xf] }
 0x11b   : > { %3590 = vrot.lane.b32.xlu0 %v7743_v51, %s8898_s10 }
 0x11d   : > { %v7752_v50 = vpop.permute.xlu0 %920 }
 0x11e   : > { %v1067_v21 = vsel %vm1051_vm6, %v1050_v27, %v7752_v50  ;;  %3592 = vrot.lane.b32.xlu1 %v7668_v5, %s8898_s10  ;;  %v3489_v27 = vrot.slane %v5876_v41, 7 }
 0x11f   : > { %3640 = vrot.lane.b32.xlu0 %v5065_v43, %s8899_s11  ;;  %v1084_v23 = vsel %vm1068_vm7, %v1067_v21, %v940_v15  ;;  %v3452_v15 = vsel %vm7474_vm13, %v3450_v8, %v3451_v28  ;;  %v7798_v21 = vld [vmem:[%s8702_s1 + $0x90] sm:$0x33] }
 0x120   : > { %4830 = vmatmul.mubr.msk.bf16.gmra.mxu0 %vm1145_vm9, %v1084_v23  ;;  %4839 = vmatmul.mubr.msk.bf16.gmra.mxu1 %vm1145_vm9, %v1084_v23  ;;  %v7788_v16 = vcombine.low %v3449_v37, %v3452_v15  ;;  %v7803_v23 = vld [vmem:[%s8702_s1 + $0x98] sm:$0x33]  ;;  %v4917_v48 = vcombine.high %v7798_v21, %v7798_v21  ;;  %v3463_v37 = vshrl.u32 %v255_v19, 16  ;;  %v3466_v15 = vshll.u32 %v255_v19, 16 }
 0x121   : > { %v4919_v63 = vcombine.high %v7803_v23, %v7803_v23  ;;  %v4918_v4 = vcombine.low %v7803_v23, %v7803_v23  ;;  %v5751_v23 = vld [vmem:[%s8702_s1 + $0x70] ss:$16 sps:$4 sm:$0xff]  }
 0x122   : > { %3642 = vrot.lane.b32.xlu1 %v7761_v2, %s8899_s11  ;;  %4920 = vmatprep.subr.msk.bf16.mxu0 %vm574_vm3, %v4917_v48  ;;  %v3468_v57 = vrot.slane %v3466_v15, 6 }
 0x123   : > { %3567 = vrot.lane.b32.xlu0 %v7600_v62, %s5978_s24  ;;  %v5069_v62 = vcombine.low %v3442_v20, %v3445_v18  ;;  %v3492_v20 = vrot.slane %v5878_v13, 7  ;;  %4929 = vmatprep.subr.msk.bf16.mxu1 %vm574_vm3, %v4919_v63  ;;  %v3490_v18 = vsel %vm7474_vm13, %v5045_v42, %v3489_v27  ;;  %v3465_v63 = vrot.slane %v3463_v37, 5 }
 0x126   : > { %3569 = vrot.lane.b32.xlu1 %v7697_v55, %s5978_s24  ;;  %v5067_v55 = vcombine.low %v5874_v22, %v5873_v61  ;;  %v3491_v61 = vrot.slane %v3489_v27, 4  ;;  %v254_v22 = vld [vmem:[%s6093_s14 + $0x9c] sm:$0xf] }
 0x127   : > { %3617 = vrot.lane.b32.xlu0 %v7635_v1, %s8996_s30  ;;  %v3454_v56 = vshrl.u32 %v254_v22, 16  ;;  %v3457_v28 = vshll.u32 %v254_v22, 16  ;;  %v5047_v13 = vrot.slane %v254_v22, 11 }
 0x129   : > { %v3456_v41 = vrot.slane %v3454_v56, 5  ;;  %v3459_v27 = vrot.slane %v3457_v28, 6 }
 0x12a   : > { %3619 = vrot.lane.b32.xlu1 %v7724_v7, %s8996_s30 }
 0x12b   : > { %3672 = vrot.lane.b32.xlu0 %v5069_v62, %s5981_s5  ;;  %v3460_v42 = vor.u32 %v3459_v27, %v3456_v41  ;;  %v4916_v27 = vcombine.low %v7798_v21, %v7798_v21  ;;  %v5756_v21 = vld [vmem:[%s8702_s1 + $0x7c] ss:$16 sps:$4 sm:$0xff]  }
 0x12d   : > { %v3461_v56 = vrot.slane %v3460_v42, 4  ;;  %v2609_v42 = vsel %vm574_vm3, %v4918_v4, 0 }
 0x12e   : > { %3674 = vrot.lane.b32.xlu1 %v7788_v16, %s5981_s5 }
 0x12f   : > { %3594 = vrot.lane.b32.xlu0 %v7693_v53, %s8898_s10 }
 0x132   : > { %3596 = vrot.lane.b32.xlu1 %v5065_v43, %s8898_s10  ;;  %v3493_v43 = vsel %vm7474_vm13, %v3491_v61, %v3492_v20  ;;  %v3469_v20 = vor.u32 %v3468_v57, %v3465_v63 }
 0x133   : > { %3644 = vrot.lane.b32.xlu0 %v5067_v55, %s8899_s11  ;;  %v5075_v8 = vcombine.low %v3490_v18, %v3493_v43 }
 0x134   : > { %v3471_v28 = vrot.slane %v3469_v20, 4 }
 0x136   : > { %3646 = vrot.lane.b32.xlu1 %v5071_v59, %s8899_s11 }
 0x137   : > { %3571 = vrot.lane.b32.xlu0 %v7726_v44, %s5978_s24  ;;  %v256_v44 = vld [vmem:[%s6093_s14 + $0xa4] sm:$0x7] }
 0x138   : > { %v3473_v48 = vshrl.u32 %v256_v44, 16  ;;  %v3476_v59 = vshll.u32 %v256_v44, 16  ;;  %v3506_v43 = vrot.slane %v256_v44, 7 }
 0x13a   : > { %3573 = vrot.lane.b32.xlu1 %v7635_v1, %s5978_s24  ;;  %v9004_v1 = vcombine.low %v7589_v49, %v7611_v25  ;;  %v3475_v61 = vrot.slane %v3473_v48, 5 }
 0x13b   : > { %3621 = vrot.lane.b32.xlu0 %v7738_v60, %s8996_s30  ;;  %v3503_v60 = vrot.slane %v255_v19, 7 }
 0x13d   : > { %v3505_v18 = vrot.slane %v3503_v60, 4  ;;  %v3504_v49 = vsel %vm7474_vm13, %v5047_v13, %v3503_v60  ;;  %v5754_v13 = vld [vmem:[%s8702_s1 + $0x78] ss:$16 sps:$4 sm:$0xff]  }
 0x13e   : > { %3623 = vrot.lane.b32.xlu1 %v5069_v62, %s8996_s30  ;;  %v3478_v62 = vrot.slane %v3476_v59, 6 }
 0x13f   : > { %3676 = vrot.lane.b32.xlu0 %v5075_v8, %s5981_s5  ;;  %v9005_v8 = vcombine.low %v7225_v10, %v7232_v11  ;;  %v3507_v25 = vsel %vm7474_vm13, %v3505_v18, %v3506_v43  ;;  %v3470_v10 = vsel %vm6202_vm8, %v3461_v56, %v3469_v20  ;;  %v5759_v18 = vld [vmem:[%s8702_s1 + $0x54] ss:$16 sps:$4 sm:$0xff]   ;;  %v5762_v43 = vld [vmem:[%s8702_s1 + $0x5c] ss:$16 sps:$4 sm:$0xff]   ;;  %v5757_v56 = vld [vmem:[%s8702_s1 + $0x50] ss:$16 sps:$4 sm:$0xff]  }
 0x140   : > { %v3479_v37 = vor.u32 %v3478_v62, %v3475_v61  ;;  %v5077_v44 = vcombine.low %v3504_v49, %v3507_v25  ;;  %v5753_v61 = vld [vmem:[%s8702_s1 + $0x74] ss:$16 sps:$4 sm:$0xff]  }
 0x142   : > { %3678 = vrot.lane.b32.xlu1 %v9004_v1, %s5981_s5  ;;  %v3480_v11 = vsel %vm6202_vm8, %v3471_v28, %v3479_v37  ;;  %v2603_v1 = vsel %vm574_vm3, %v4916_v27, 0  ;;  %v5760_v28 = vld [vmem:[%s8702_s1 + $0x58] ss:$16 sps:$4 sm:$0xff]  }
 0x143   : > { %3598 = vrot.lane.b32.xlu0 %v7761_v2, %s8898_s10  ;;  %v5073_v2 = vcombine.low %v254_v22, %v255_v19 }
 0x146   : > { %3600 = vrot.lane.b32.xlu1 %v5067_v55, %s8898_s10  ;;  %v5074_v55 = vcombine.low %v3470_v10, %v3480_v11 }
 0x147   : > { %3648 = vrot.lane.b32.xlu0 %v9005_v8, %s8899_s11 }
 0x14a   : > { %3650 = vrot.lane.b32.xlu1 %v5073_v2, %s8899_s11 }
 0x14b   : > { %3575 = vrot.lane.b32.xlu0 %v7724_v7, %s5978_s24 }
 0x14e   : > { %3680 = vrot.lane.b32.xlu1 %v5077_v44, %s5981_s5  ;;  %s4673_s5 = scalar_lea.hbm %s8705_s4, %s5216_s27 }
 0x14f   : > { %3625 = vrot.lane.b32.xlu0 %v7788_v16, %s8996_s30  ;;  %s202_s30 = sand.u32 1, %s5951_s16  }
 0x150   : > { %s4660_s10 = scalar_lea.sflag [#allocation3], %s202_s30 }
 0x153   : > { %3655 = vrot.lane.b32.xlu0 %v5074_v55, %s8997_s8  ;;  %s4754_s8 = sshll.u32 %s202_s30, 2 }
 0x154   : > { %s204_s9 = scalar_lea.vmem [#allocation2], %s4754_s8 }
 0x155   : > { %s4675_s23 = sshll.u32 %s204_s9, 4  ;;  %s8652_s23 = int_to_ptr.vmem [resolvable:$true] %s4675_s23 }
 0x156   : > { %s5883_s11 = scalar_lea.vmem %s8652_s23, 64  ;;  %p5890_p2 = scmp.lt.s32.totalorder %s8652_s23, %s5888_s19 }
 0x157   : > { %p5884_p13 = scmp.ne.s32.totalorder %s8652_s23, %s5883_s11 }
 0x159   : > { %p5885_p0 = pnand %p5884_p13, %p6063_p3 }
 0x15b   : > { %p5886_p1 = pneg %p5885_p0 }
 0x173   : > { %v1209_v58 = vpop.f32.mrf.mxu0 }
 0x174   : > { %v1322_v22 = vpop.f32.mrf.mxu1 }
 0x175   : > { %v1211_v7 = vpop.f32.mrf.mxu0 }
 0x176   : > { %v1324_v19 = vpop.f32.mrf.mxu1 }
 0x177   : > { %v1213_v15 = vpop.f32.mrf.mxu0 }
 0x178   : > { %v1326_v41 = vpop.f32.mrf.mxu1  ;;  %v1401_v59 = vpack.c.bf16 %v1213_v15, %v1209_v58 }
 0x179   : > { %v1215_v48 = vpop.f32.mrf.mxu0  ;;  %v1403_v60 = vpack.c.bf16 %v1326_v41, %v1322_v22 }
 0x17a   : > { %v1328_v63 = vpop.f32.mrf.mxu1  ;;  %v1402_v16 = vpack.c.bf16 %v1215_v48, %v1211_v7 }
 0x17b   : > { %v1404_v57 = vpack.c.bf16 %v1328_v63, %v1324_v19 }
 0x17c   : > { %1721 = vmatprep.mubr.bf16.mxu0 %v1402_v16 }
 0x17d   : > { %1818 = vmatprep.mubr.bf16.mxu1 %v1404_v57  ;;  %1722 = vmatmul.mubr.bf16.vlgmr.msra.gmra.mxu0 %v1401_v59 }
 0x17e   : > { %1819 = vmatmul.mubr.bf16.vlgmr.msra.gmra.mxu1 %v1403_v60  ;;  %2625 = vmatpush1.bf16.msra.mxu0 %v2603_v1 }
 0x17f   : > { %2738 = vmatpush1.bf16.msra.mxu1 %v2609_v42  ;;  %v1219_v20 = vpop.f32.mrf.mxu0  ;;  %2626 = vmatprep.subr.bf16.mxu0 %v5753_v61 }
 0x180   : > { %v1332_v62 = vpop.f32.mrf.mxu1  ;;  %2739 = vmatprep.subr.bf16.mxu1 %v5756_v21 }
 0x181   : > { %v1221_v8 = vpop.f32.mrf.mxu0 }
 0x182   : > { %v1334_v2 = vpop.f32.mrf.mxu1  ;;  %2627 = vmatpush1.bf16.msra.mxu0 %v5751_v23 }
 0x183   : > { %2740 = vmatpush1.bf16.msra.mxu1 %v5754_v13  ;;  %v1223_v37 = vpop.f32.mrf.mxu0  ;;  %2628 = vmatprep.subr.bf16.mxu0 %v5759_v18 }
 0x184   : > { %v1336_v49 = vpop.f32.mrf.mxu1  ;;  %2741 = vmatprep.subr.bf16.mxu1 %v5762_v43  ;;  %v1405_v55 = vpack.c.bf16 %v1223_v37, %v1219_v20 }
 0x185   : > { %v1225_v25 = vpop.f32.mrf.mxu0  ;;  %v1407_v58 = vpack.c.bf16 %v1336_v49, %v1332_v62 }
 0x186   : > { %v1338_v44 = vpop.f32.mrf.mxu1  ;;  %v1406_v10 = vpack.c.bf16 %v1225_v25, %v1221_v8  ;;  %2629 = vmatpush1.bf16.msra.mxu0 %v5757_v56  ;;  %v7889_v56 = vpop.permute.xlu1 %2302 }
 0x187   : > { %v1408_v11 = vpack.c.bf16 %v1338_v44, %v1334_v2  ;;  %2742 = vmatpush1.bf16.msra.mxu1 %v5760_v28  ;;  %v7887_v2 = vpop.permute.xlu0 %2276 }
 0x188   : > { %1729 = vmatprep.mubr.bf16.mxu0 %v1406_v10 }
 0x189   : > { %1826 = vmatprep.mubr.bf16.mxu1 %v1408_v11  ;;  %1730 = vmatmul.mubr.bf16.gmra.mxu0 %v1405_v55 }
 0x18a   : > { %1827 = vmatmul.mubr.bf16.gmra.mxu1 %v1407_v58  ;;  %v7893_v10 = vpop.permute.xlu1 %2346 }
 0x18b   : > { %v7891_v28 = vpop.permute.xlu0 %2324 }
 0x18f   : > { %v1229_v22 = vpop.f32.mrf.mxu0  ;;  %v7895_v58 = vpop.permute.xlu0 %2368 }
 0x190   : > { %v1342_v7 = vpop.f32.mrf.mxu1 }
 0x191   : > { %v1231_v19 = vpop.f32.mrf.mxu0 }
 0x192   : > { %v1344_v15 = vpop.f32.mrf.mxu1 }
 0x193   : > { %v1233_v41 = vpop.f32.mrf.mxu0 }
 0x194   : > { %v1346_v27 = vpop.f32.mrf.mxu1  ;;  %v1409_v57 = vpack.c.bf16 %v1233_v41, %v1229_v22 }
 0x195   : > { %v1235_v4 = vpop.f32.mrf.mxu0  ;;  %v1411_v59 = vpack.c.bf16 %v1346_v27, %v1342_v7 }
 0x196   : > { %v1348_v48 = vpop.f32.mrf.mxu1  ;;  %v1410_v63 = vpack.c.bf16 %v1235_v4, %v1231_v19  ;;  %v7897_v4 = vpop.permute.xlu1 %2395 }
 0x197   : > { %v1412_v16 = vpack.c.bf16 %v1348_v48, %v1344_v15  ;;  %v7899_v48 = vpop.permute.xlu0 %2304 }
 0x198   : > { %1737 = vmatprep.mubr.bf16.mxu0 %v1410_v63 }
 0x199   : > { %1834 = vmatprep.mubr.bf16.mxu1 %v1412_v16  ;;  %1738 = vmatmul.mubr.bf16.gmra.mxu0 %v1409_v57 }
 0x19a   : > { %1835 = vmatmul.mubr.bf16.gmra.mxu1 %v1411_v59  ;;  %v7901_v63 = vpop.permute.xlu1 %2326 }
 0x19b   : > { %v7903_v59 = vpop.permute.xlu0 %2348 }
 0x19f   : > { %v1239_v60 = vpop.f32.mrf.mxu0 }
 0x1a0   : > { %v1352_v1 = vpop.f32.mrf.mxu1 }
 0x1a1   : > { %v1241_v42 = vpop.f32.mrf.mxu0 }
 0x1a2   : > { %v1354_v61 = vpop.f32.mrf.mxu1 }
 0x1a3   : > { %v1243_v21 = vpop.f32.mrf.mxu0 }
 0x1a4   : > { %v1356_v23 = vpop.f32.mrf.mxu1  ;;  %v1413_v43 = vpack.c.bf16 %v1243_v21, %v1239_v60  ;;  %v7905_v21 = vpop.permute.xlu1 %2370 }
 0x1a5   : > { %v1245_v13 = vpop.f32.mrf.mxu0  ;;  %v1415_v8 = vpack.c.bf16 %v1356_v23, %v1352_v1 }
 0x1a6   : > { %v1358_v20 = vpop.f32.mrf.mxu1  ;;  %v1414_v62 = vpack.c.bf16 %v1245_v13, %v1241_v42 }
 0x1a7   : > { %v1416_v18 = vpack.c.bf16 %v1358_v20, %v1354_v61  ;;  %v7907_v20 = vpop.permute.xlu0 %2397 }
 0x1a8   : > { %1745 = vmatprep.mubr.bf16.mxu0 %v1414_v62 }
 0x1a9   : > { %1842 = vmatprep.mubr.bf16.mxu1 %v1416_v18  ;;  %1746 = vmatmul.mubr.bf16.gmra.mxu0 %v1413_v43 }
 0x1aa   : > { %1843 = vmatmul.mubr.bf16.gmra.mxu1 %v1415_v8 }
 0x1af   : > { %v1249_v37 = vpop.f32.mrf.mxu0 }
 0x1b0   : > { %v1362_v49 = vpop.f32.mrf.mxu1 }
 0x1b1   : > { %v1251_v25 = vpop.f32.mrf.mxu0 }
 0x1b2   : > { %v1364_v44 = vpop.f32.mrf.mxu1 }
 0x1b3   : > { %v1253_v11 = vpop.f32.mrf.mxu0 }
 0x1b4   : > { %v1366_v55 = vpop.f32.mrf.mxu1  ;;  %v1417_v41 = vpack.c.bf16 %v1253_v11, %v1249_v37  ;;  %v9006_v37 = vld [vmem:[#allocation55_spill] sm:$0xff]  ;;  %v9008_v11 = vld [vmem:[#allocation57_spill] sm:$0xff] }
 0x1b5   : > { %v1255_v22 = vpop.f32.mrf.mxu0  ;;  %v1419_v27 = vpack.c.bf16 %v1366_v55, %v1362_v49  ;;  %v1908_v49 = vrot.slane %v9006_v37, 5  ;;  %v1918_v55 = vrot.slane %v9008_v11, 4 }
 0x1b6   : > { %v1368_v7 = vpop.f32.mrf.mxu1  ;;  %v1418_v19 = vpack.c.bf16 %v1255_v22, %v1251_v25  ;;  %v9007_v25 = vld [vmem:[#allocation56_spill] sm:$0xff]  ;;  %v9009_v22 = vld [vmem:[#allocation54_spill] sm:$0xff] }
 0x1b7   : > { %v1420_v15 = vpack.c.bf16 %v1368_v7, %v1364_v44  ;;  %v1914_v44 = vrot.slane %v9007_v25, 5  ;;  %v1905_v7 = vrot.slane %v9009_v22, 4 }
 0x1b8   : > { %1753 = vmatprep.mubr.bf16.mxu0 %v1418_v19  ;;  %v7913_v19 = vpop.permute.xlu1 %2306 }
 0x1b9   : > { %1850 = vmatprep.mubr.bf16.mxu1 %v1420_v15  ;;  %1754 = vmatmul.mubr.bf16.gmra.mxu0 %v1417_v41  ;;  %v1919_v15 = vor.u32 %v1918_v55, %v1914_v44  ;;  %v1909_v41 = vor.u32 %v1908_v49, %v1905_v7 }
 0x1ba   : > { %1851 = vmatmul.mubr.bf16.gmra.mxu1 %v1419_v27  ;;  %v7915_v27 = vpop.permute.xlu0 %2328 }
 0x1be   : > { %v7924_v37 = vpop.permute.xlu0 %2372 }
 0x1bf   : > { %v1259_v16 = vpop.f32.mrf.mxu0 }
 0x1c0   : > { %v1372_v57 = vpop.f32.mrf.mxu1 }
 0x1c1   : > { %v1261_v60 = vpop.f32.mrf.mxu0 }
 0x1c2   : > { %v1374_v1 = vpop.f32.mrf.mxu1  ;;  %v7932_v5 = vpop.permute.xlu0 %2308 }
 0x1c3   : > { %v1263_v42 = vpop.f32.mrf.mxu0 }
 0x1c4   : > { %v1376_v61 = vpop.f32.mrf.mxu1  ;;  %v1421_v43 = vpack.c.bf16 %v1263_v42, %v1259_v16  ;;  %v1910_v42 = vrot.slane %v1909_v41, 4 }
 0x1c5   : > { %v1265_v23 = vpop.f32.mrf.mxu0  ;;  %v1423_v8 = vpack.c.bf16 %v1376_v61, %v1372_v57  ;;  %v7918_v61 = vpop.permute.xlu1 %2350 }
 0x1c6   : > { %v1378_v13 = vpop.f32.mrf.mxu1  ;;  %v1422_v62 = vpack.c.bf16 %v1265_v23, %v1261_v60  ;;  %v1920_v60 = vrot.slane %v1919_v15, 4  ;;  %v1915_v11 = vsel %vm6908_vm4, %v1910_v42, %v1914_v44  ;;  %v1935_v44 = vrot.slane %v8921_v6, 5 }
 0x1c7   : > { %v1424_v18 = vpack.c.bf16 %v1378_v13, %v1374_v1  ;;  %v1924_v1 = vrot.slane %v6734_v31, 5 }
 0x1c8   : > { %1761 = vmatprep.mubr.bf16.mxu0 %v1422_v62  ;;  %v1926_v62 = vrot.slane %v6154_v39, 4 }
 0x1c9   : > { %1858 = vmatprep.mubr.bf16.mxu1 %v1424_v18  ;;  %1762 = vmatmul.mubr.bf16.gmra.mxu0 %v1421_v43  ;;  %v1927_v18 = vrot.slane %v8911_v45, 5  ;;  %v1930_v43 = vrot.slane %v8916_v54, 5  ;;  %v1925_v31 = vsel %vm6908_vm4, %v1920_v60, %v1924_v1  ;;  %v7930_v15 = vpop.permute.xlu1 %2399 }
 0x1ca   : > { %1859 = vmatmul.mubr.bf16.gmra.mxu1 %v1423_v8  ;;  %v1932_v8 = vrot.slane %v8915_v38, 4  ;;  %v4872_v41 = vcombine.low %v1915_v11, %v1925_v31 }
 0x1cb   : > { %v1928_v7 = vor.u32 %v1927_v18, %v1926_v62 }
 0x1cc   : > { %v1933_v39 = vor.u32 %v1932_v8, %v1930_v43  ;;  %v2413_v42 = vsel %vm941_vm14, %v4872_v41, %v7887_v2 }
 0x1cd   : > { %v1929_v60 = vrot.slane %v1928_v7, 4  ;;  %v2331_v62 = vpop.permute.xlu1 %2330 }
 0x1ce   : > { %v1934_v1 = vrot.slane %v1933_v39, 4 }
 0x1cf   : > { %v1269_v16 = vpop.f32.mrf.mxu0 }
 0x1d0   : > { %v1382_v57 = vpop.f32.mrf.mxu1 }
 0x1d1   : > { %v1271_v23 = vpop.f32.mrf.mxu0  ;;  %v7947_v31 = vpop.permute.xlu1 %2374 }
 0x1d2   : > { %v1384_v13 = vpop.f32.mrf.mxu1 }
 0x1d3   : > { %v1273_v49 = vpop.f32.mrf.mxu0 }
 0x1d4   : > { %v1386_v25 = vpop.f32.mrf.mxu1  ;;  %v1425_v38 = vpack.c.bf16 %v1273_v49, %v1269_v16  ;;  %v1931_v16 = vsel %vm6908_vm4, %v1929_v60, %v1930_v43 }
 0x1d5   : > { %v1275_v55 = vpop.f32.mrf.mxu0  ;;  %v1427_v53 = vpack.c.bf16 %v1386_v25, %v1382_v57  ;;  %v1936_v57 = vsel %vm6908_vm4, %v1934_v1, %v1935_v44  ;;  %v2311_v60 = vpop.permute.xlu1 %2310 }
 0x1d6   : > { %v1388_v22 = vpop.f32.mrf.mxu1  ;;  %v1426_v45 = vpack.c.bf16 %v1275_v55, %v1271_v23  ;;  %v2429_v23 = vsel %vm966_vm15, %v2413_v42, %v7889_v56  ;;  %v4873_v8 = vcombine.low %v1931_v16, %v1936_v57  ;;  %v2417_v16 = vsel %vm941_vm14, %v6993_v29, %v7045_v24 }
 0x1d7   : > { %v1428_v54 = vpack.c.bf16 %v1388_v22, %v1384_v13  ;;  %v7943_v13 = vpop.permute.xlu0 %2352  ;;  %v2445_v6 = vsel %vm983_vm0, %v2429_v23, %v7891_v28  ;;  %v2433_v57 = vsel %vm966_vm15, %v2417_v16, %v7913_v19  ;;  %v9010_v19 = vld [vmem:[#allocation11_spill] sm:$0xff]  ;;  %v9017_v16 = vld [vmem:[#allocation20_spill] sm:$0xff] }
 0x1d8   : > { %1769 = vmatprep.mubr.bf16.mxu0 %v1426_v45  ;;  %v2460_v43 = vsel %vm1000_vm1, %v2445_v6, %v6976_v26  ;;  %v2415_v32 = vsel %vm941_vm14, %v4873_v8, %v6956_v33 }
 0x1d9   : > { %1866 = vmatprep.mubr.bf16.mxu1 %v1428_v54  ;;  %1770 = vmatmul.mubr.bf16.gmra.mxu0 %v1425_v38  ;;  %v2431_v28 = vsel %vm966_vm15, %v2415_v32, %v7899_v48  ;;  %v2469_v54 = vsel %vm1017_vm2, %v2460_v43, %v7893_v10  ;;  %v2355_v23 = vpop.permute.xlu1 %2354  ;;  %v9013_v32 = vld [vmem:[#allocation19_spill] sm:$0xff] }
 0x1da   : > { %1867 = vmatmul.mubr.bf16.gmra.mxu1 %v1427_v53  ;;  %v2447_v1 = vsel %vm983_vm0, %v2431_v28, %v7901_v63  ;;  %v2485_v44 = vsel %vm1034_vm5, %v2469_v54, %v7895_v58 }
 0x1db   : > { %v7951_v55 = vpop.permute.xlu0 %2401  ;;  %v2461_v10 = vsel %vm1000_vm1, %v2447_v1, %v7017_v47  ;;  %v2500_v42 = vsel %vm1051_vm6, %v2485_v44, %v7084_v17  ;;  %v5765_v1 = vld [vmem:[%s8703_s2 + $0x138] sm:$0xff]  }
 0x1dc   : > { %v2471_v63 = vsel %vm1017_vm2, %v2461_v10, %v7903_v59  ;;  %v2510_v58 = vsel %vm1068_vm7, %v2500_v42, %v7897_v4  ;;  %v5766_v44 = vld [vmem:[%s8703_s2 + $0x1b8] sm:$0xff]   ;;  %v9016_v10 = vld [vmem:[#allocation6_spill] sm:$0xff] }
 0x1dd   : > { %v2487_v17 = vsel %vm1034_vm5, %v2471_v63, %v7905_v21  ;;  %v7990_v4 = vpop.permute.xlu1 %2403  ;;  %v5768_v63 = vld [vmem:[%s8703_s2 + $0x1f0] sm:$0xff]  }
 0x1de   : > { %v2501_v59 = vsel %vm1051_vm6, %v2487_v17, %v7168_v30 }
 0x1df   : > { %v2333_v48 = vpop.permute.xlu0 %2332 }
 0x1e0   : > { %v1279_v53 = vpop.f32.mrf.mxu0  ;;  %v1392_v18 = vpop.f32.mrf.mxu1 }
 0x1e1   : > { %v2335_v43 = vpop.permute.xlu1 %2334 }
 0x1e2   : > { %v1281_v49 = vpop.f32.mrf.mxu0  ;;  %v1394_v25 = vpop.f32.mrf.mxu1 }
 0x1e4   : > { %v1283_v11 = vpop.f32.mrf.mxu0  ;;  %v1396_v56 = vpop.f32.mrf.mxu1 }
 0x1e5   : > { %v1429_v41 = vpack.c.bf16 %v1283_v11, %v1279_v53  ;;  %v1431_v38 = vpack.c.bf16 %v1396_v56, %v1392_v18  ;;  %v2449_v53 = vsel %vm983_vm0, %v2433_v57, %v7915_v27  ;;  %v7980_v18 = vpop.permute.xlu0 %2376  ;;  %v9011_v27 = vld [vmem:[#allocation13_spill] sm:$0xff]  ;;  %v5763_v56 = vld [vmem:[%s8703_s2 + $0x178] sm:$0xff]   ;;  %v9018_v57 = vld [vmem:[#allocation18_spill] sm:$0xff] }
 0x1e6   : > { %v1285_v22 = vpop.f32.mrf.mxu0  ;;  %v1398_v7 = vpop.f32.mrf.mxu1  ;;  %v2462_v29 = vsel %vm1000_vm1, %v2449_v53, %v7108_v35  ;;  %v2419_v6 = vsel %vm941_vm14, %v9011_v27, %v9010_v19  ;;  %5348 = vmatprep.subr.bf16.mxu0 %v5763_v56  ;;  %v9019_v53 = vld [vmem:[#allocation10_spill] sm:$0xff] }
 0x1e7   : > { %v1430_v39 = vpack.c.bf16 %v1285_v22, %v1281_v49  ;;  %v1432_v45 = vpack.c.bf16 %v1398_v7, %v1394_v25  ;;  %v2435_v8 = vsel %vm966_vm15, %v2419_v6, %v7932_v5  ;;  %v2473_v21 = vsel %vm1017_vm2, %v2462_v29, %v7918_v61  ;;  %v5764_v5 = vld [vmem:[%s8703_s2 + $0x1f8] sm:$0xff]   ;;  %v5770_v29 = vld [vmem:[%s8703_s2 + $0x1b0] sm:$0xff]  }
 0x1e8   : > { %v2512_v25 = vsel %vm1068_vm7, %v2501_v59, %v7907_v20  ;;  %v2451_v11 = vsel %vm983_vm0, %v2435_v8, %v2331_v62  ;;  %v2489_v61 = vsel %vm1034_vm5, %v2473_v21, %v7924_v37  ;;  %5412 = vmatprep.subr.bf16.mxu1 %v5764_v5  ;;  %v9012_v20 = vld [vmem:[#allocation12_spill] sm:$0xff]  ;;  %v2423_v17 = vsel %vm941_vm14, %v9019_v53, %v9018_v57 }
 0x1e9   : > { %1777 = vmatprep.mubr.bf16.mxu0 %v1430_v39  ;;  %1874 = vmatprep.mubr.bf16.mxu1 %v1432_v45  ;;  %v2313_v49 = vpop.permute.xlu0 %2312  ;;  %v2463_v62 = vsel %vm1000_vm1, %v2451_v11, %v9012_v20  ;;  %v2502_v22 = vsel %vm1051_vm6, %v2489_v61, %v9013_v32  ;;  %v9014_v39 = vld [vmem:[#allocation5_spill] sm:$0xff] }
 0x1ea   : > { %1778 = vmatmul.mubr.bf16.gmra.mxu0 %v1429_v41  ;;  %1875 = vmatmul.mubr.bf16.gmra.mxu1 %v1431_v38  ;;  %v2475_v28 = vsel %vm1017_vm2, %v2463_v62, %v7943_v13  ;;  %v9015_v45 = vld [vmem:[#allocation9_spill] sm:$0xff]  ;;  %v2379_v41 = vpop.permute.xlu1 %2378  ;;  %v2514_v38 = vsel %vm1068_vm7, %v2502_v22, %v7930_v15  ;;  %v2439_v59 = vsel %vm966_vm15, %v2423_v17, %v2313_v49  ;;  %v9021_v62 = vld [vmem:[#allocation16_spill] sm:$0xff] }
 0x1eb   : > { %2646 = vmatprep.mubr.bf16.mxu0 %v8943_v14  ;;  %2759 = vmatprep.mubr.bf16.mxu1 %v8943_v14  ;;  %v2421_v37 = vsel %vm941_vm14, %v9015_v45, %v9014_v39  ;;  %v2455_v21 = vsel %vm983_vm0, %v2439_v59, %v2335_v43  ;;  %v5771_v49 = vld [vmem:[%s8703_s2 + $0x168] sm:$0xff]   ;;  %v9020_v43 = vld [vmem:[#allocation15_spill] sm:$0xff] }
 0x1ec   : > { %v2437_v54 = vsel %vm966_vm15, %v2421_v37, %v2311_v60  ;;  %v2491_v60 = vsel %vm1034_vm5, %v2475_v28, %v7947_v31  ;;  %v5769_v31 = vld [vmem:[%s8703_s2 + $0x130] sm:$0xff]   ;;  %v2425_v22 = vsel %vm941_vm14, %v9021_v62, %v9020_v43  ;;  %v5773_v37 = vld [vmem:[%s8703_s2 + $0x128] sm:$0xff]   ;;  %v5779_v59 = vld [vmem:[%s8703_s2 + $0x158] sm:$0xff]  }
 0x1ed   : > { %v2357_v7 = vpop.permute.xlu0 %2356  ;;  %v2453_v13 = vsel %vm983_vm0, %v2437_v54, %v2333_v48  ;;  %v5767_v48 = vld [vmem:[%s8703_s2 + $0x170] sm:$0xff]   ;;  %v5774_v54 = vld [vmem:[%s8703_s2 + $0x1a8] sm:$0xff]  }
 0x1ee   : > { %v2464_v42 = vsel %vm1000_vm1, %v2453_v13, %v9016_v10  ;;  %v2315_v27 = vpop.permute.xlu1 %2314  ;;  %v5776_v13 = vld [vmem:[%s8703_s2 + $0x1e0] sm:$0xff]   ;;  %v5784_v62 = vld [vmem:[%s8703_s2 + $0x1d0] sm:$0xff]  }
 0x1ef   : > { %v2477_v6 = vsel %vm1017_vm2, %v2464_v42, %v2355_v23  ;;  %v5772_v23 = vld [vmem:[%s8703_s2 + $0x1e8] sm:$0xff]   ;;  %v2441_v28 = vsel %vm966_vm15, %v2425_v22, %v2315_v27  ;;  %v5785_v22 = vld [vmem:[%s8703_s2 + $0x110] sm:$0xff]  }
 0x1f0   : > { %v2493_v11 = vsel %vm1034_vm5, %v2477_v6, %v7980_v18 }
 0x1f1   : > { %v2406_v15 = vpop.permute.xlu0 %2405  ;;  %v2504_v5 = vsel %vm1051_vm6, %v2493_v11, %v7583_v46  ;;  %v5782_v11 = vld [vmem:[%s8703_s2 + $0x198] sm:$0xff]  }
 0x1f2   : > { %4921 = vmatmul.mubr.msk.bf16.vlgmr.msra.gmra.mxu0 %vm1145_vm9, %v2510_v58  ;;  %4930 = vmatmul.mubr.msk.bf16.vlgmr.msra.gmra.mxu1 %vm1145_vm9, %v2510_v58  ;;  %v2503_v58 = vsel %vm1051_vm6, %v2491_v60, %v9017_v16  ;;  %v2359_v56 = vpop.permute.xlu1 %2358  ;;  %v2518_v45 = vsel %vm1068_vm7, %v2504_v5, %v7990_v4 }
 0x1f3   : > { %2656 = vmatprep.mubr.bf16.mxu0 %v8943_v14  ;;  %2769 = vmatprep.mubr.bf16.mxu1 %v8943_v14  ;;  %v2516_v8 = vsel %vm1068_vm7, %v2503_v58, %v7951_v55  ;;  %v2465_v55 = vsel %vm1000_vm1, %v2455_v21, %v7463_v9 }
 0x1f4   : > { %5349 = vmatpush3.bf16.msra.mxu0 %v5765_v1  ;;  %5413 = vmatpush3.bf16.msra.mxu1 %v5766_v44  ;;  %v2479_v61 = vsel %vm1017_vm2, %v2465_v55, %v2357_v7  ;;  %v5775_v44 = vld [vmem:[%s8703_s2 + $0x160] sm:$0xff]  }
 0x1f5   : > { %5350 = vmatprep.subr.bf16.mxu0 %v5767_v48  ;;  %5414 = vmatprep.subr.bf16.mxu1 %v5768_v63  ;;  %v5778_v48 = vld [vmem:[%s8703_s2 + $0x1a0] sm:$0xff]   ;;  %v9022_v63 = vld [vmem:[#allocation17_spill] sm:$0xff] }
 0x1f6   : > { %v2408_v1 = vpop.permute.xlu1 %2407 }
 0x1f8   : > { %5351 = vmatpush3.bf16.msra.mxu0 %v5769_v31  ;;  %5415 = vmatpush3.bf16.msra.mxu1 %v5770_v29  ;;  %v2427_v31 = vsel %vm941_vm14, %v9022_v63, %v7619_v36  ;;  %v5780_v36 = vld [vmem:[%s8703_s2 + $0x1d8] sm:$0xff]  }
 0x1f9   : > { %5352 = vmatprep.subr.bf16.mxu0 %v5771_v49  ;;  %5416 = vmatprep.subr.bf16.mxu1 %v5772_v23  ;;  %v5781_v23 = vld [vmem:[%s8703_s2 + $0x118] sm:$0xff]  }
 0x1fa   : > { %4922 = vmatmul.mubr.msk.bf16.gmra.mxu0 %vm1145_vm9, %v2512_v25  ;;  %4931 = vmatmul.mubr.msk.bf16.gmra.mxu1 %vm1145_vm9, %v2512_v25  ;;  %v2337_v25 = vpop.permute.xlu0 %2336  ;;  %v2339_v17 = vpop.permute.xlu1 %2338 }
 0x1fb   : > { %2666 = vmatprep.mubr.bf16.mxu0 %v8943_v14  ;;  %2779 = vmatprep.mubr.bf16.mxu1 %v8943_v14  ;;  %v2457_v7 = vsel %vm983_vm0, %v2441_v28, %v2337_v25 }
 0x1fc   : > { %5353 = vmatpush3.bf16.msra.mxu0 %v5773_v37  ;;  %5417 = vmatpush3.bf16.msra.mxu1 %v5774_v54  ;;  %v2466_v4 = vsel %vm1000_vm1, %v2457_v7, %v7621_v12  ;;  %v5787_v54 = vld [vmem:[%s8703_s2 + $0x148] sm:$0xff]  }
 0x1fd   : > { %5354 = vmatprep.subr.bf16.mxu0 %v5775_v44  ;;  %5418 = vmatprep.subr.bf16.mxu1 %v5776_v13  ;;  %v2481_v58 = vsel %vm1017_vm2, %v2466_v4, %v2359_v56  ;;  %v5788_v7 = vld [vmem:[%s8703_s2 + $0x1c8] sm:$0xff]   ;;  %v5791_v4 = vld [vmem:[%s8703_s2 + $0x140] sm:$0xff]  }
 0x1fe   : > { %v2381_v18 = vpop.permute.xlu0 %2380  ;;  %v2383_v25 = vpop.permute.xlu1 %2382  ;;  %v5792_v44 = vld [vmem:[%s8703_s2 + $0x1c0] sm:$0xff]  }
 0x1ff   : > { %v2497_v27 = vsel %vm1034_vm5, %v2481_v58, %v2381_v18  ;;  %v5793_v13 = vld [vmem:[%s8703_s2 + $0x100] sm:$0xff]  }
 0x200   : > { %5419 = vmatpush3.bf16.msra.mxu1 %v5778_v48 }
 0x201   : > { %5420 = vmatprep.subr.bf16.mxu1 %v5780_v36 }
 0x202   : > { %4923 = vmatmul.mubr.msk.bf16.gmra.mxu0 %vm1145_vm9, %v2514_v38  ;;  %4932 = vmatmul.mubr.msk.bf16.gmra.mxu1 %vm1145_vm9, %v2514_v38  ;;  %v2495_v38 = vsel %vm1034_vm5, %v2479_v61, %v2379_v41  ;;  %v5777_v41 = vld [vmem:[%s8703_s2 + $0x120] sm:$0xff]   ;;  %v2317_v42 = vpop.permute.xlu0 %2316  ;;  %v5783_v61 = vld [vmem:[%s8703_s2 + $0x150] sm:$0xff]   ;;  %v2410_v18 = vpop.permute.xlu1 %2409 }
 0x203   : > { %2676 = vmatprep.mubr.bf16.mxu0 %v8943_v14  ;;  %2789 = vmatprep.mubr.bf16.mxu1 %v8943_v14  ;;  %v2505_v60 = vsel %vm1051_vm6, %v2495_v38, %v7691_v34  ;;  %v2443_v29 = vsel %vm966_vm15, %v2427_v31, %v2317_v42  ;;  %v5789_v38 = vld [vmem:[%s8703_s2 + $0x108] sm:$0xff]  }
 0x204   : > { %5355 = vmatpush3.bf16.msra.mxu0 %v5777_v41  ;;  %v2520_v53 = vsel %vm1068_vm7, %v2505_v60, %v2406_v15  ;;  %v2459_v15 = vsel %vm983_vm0, %v2443_v29, %v2339_v17  ;;  %5421 = vmatpush3.bf16.msra.mxu1 %v5782_v11  ;;  %v5794_v41 = vld [vmem:[%s8703_s2 + $0x180] sm:$0xff]   ;;  %v8202_v42 = vld [vmem:[%s8702_s1 + $0xe8] sm:$0x33] }
 0x205   : > { %5356 = vmatprep.subr.bf16.mxu0 %v5779_v59  ;;  %v2467_v21 = vsel %vm1000_vm1, %v2459_v15, %v7715_v3  ;;  %5422 = vmatprep.subr.bf16.mxu1 %v5784_v62  ;;  %v8197_v60 = vld [vmem:[%s8702_s1 + $0xe0] sm:$0x33]  ;;  %v5099_v63 = vcombine.high %v8202_v42, %v8202_v42 }
 0x206   : > { %v2361_v6 = vpop.permute.xlu0 %2360  ;;  %v5097_v48 = vcombine.high %v8197_v60, %v8197_v60 }
 0x207   : > { %v2483_v55 = vsel %vm1017_vm2, %v2467_v21, %v2361_v6 }
 0x208   : > { %5357 = vmatpush3.bf16.msra.mxu0 %v5781_v23  ;;  %v2499_v5 = vsel %vm1034_vm5, %v2483_v55, %v2383_v25 }
 0x209   : > { %5358 = vmatprep.subr.bf16.mxu0 %v5783_v61 }
 0x20a   : > { %4924 = vmatmul.mubr.msk.bf16.gmra.mxu0 %vm1145_vm9, %v2516_v8  ;;  %4933 = vmatmul.mubr.msk.bf16.gmra.mxu1 %vm1145_vm9, %v2516_v8  ;;  %v2506_v8 = vsel %vm1051_vm6, %v2497_v27, %v7752_v50  ;;  %v8148_v56 = vpop.permute.xlu0 %2387 }
 0x20b   : > { %2686 = vmatprep.mubr.bf16.mxu0 %v8943_v14  ;;  %2799 = vmatprep.mubr.bf16.mxu1 %v8943_v14  ;;  %v2522_v49 = vsel %vm1068_vm7, %v2506_v8, %v2408_v1  ;;  %v2508_v28 = vsel %vm1051_vm6, %v2499_v5, %v8148_v56  ;;  %v5790_v1 = vld [vmem:[%s8703_s2 + $0x188] sm:$0xff]  }
 0x20c   : > { %5359 = vmatpush3.bf16.msra.mxu0 %v5785_v22  ;;  %v2524_v37 = vsel %vm1068_vm7, %v2508_v28, %v2410_v18 }
 0x20d   : > { %5360 = vmatprep.subr.bf16.mxu0 %v5787_v54 }
 0x210   : > { %5361 = vmatpush3.bf16.msra.mxu0 %v5789_v38 }
 0x211   : > { %5362 = vmatprep.subr.bf16.mxu0 %v5791_v4 }
 0x212   : > { %4925 = vmatmul.mubr.msk.bf16.gmra.mxu0 %vm1145_vm9, %v2518_v45  ;;  %4934 = vmatmul.mubr.msk.bf16.gmra.mxu1 %vm1145_vm9, %v2518_v45  ;;  %v5786_v45 = vld [vmem:[%s8703_s2 + $0x190] sm:$0xff]  }
 0x213   : > { %2696 = vmatprep.mubr.bf16.mxu0 %v8943_v14  ;;  %2809 = vmatprep.mubr.bf16.mxu1 %v8943_v14 }
 0x214   : > { %5423 = vmatpush3.bf16.msra.mxu1 %v5786_v45  ;;  %5363 = vmatpush3.bf16.msra.mxu0 %v5793_v13 }
 0x215   : > { %5424 = vmatprep.subr.bf16.mxu1 %v5788_v7  ;;  %5100 = vmatprep.subr.msk.bf16.mxu0 %vm574_vm3, %v5097_v48 }
 0x218   : > { %5425 = vmatpush3.bf16.msra.mxu1 %v5790_v1 }
 0x219   : > { %5426 = vmatprep.subr.bf16.mxu1 %v5792_v44 }
 0x21a   : > { %4926 = vmatmul.mubr.msk.bf16.gmra.mxu0 %vm1145_vm9, %v2520_v53  ;;  %4935 = vmatmul.mubr.msk.bf16.gmra.mxu1 %vm1145_vm9, %v2520_v53 }
 0x21b   : > { %2706 = vmatprep.mubr.bf16.mxu0 %v8943_v14  ;;  %2819 = vmatprep.mubr.bf16.mxu1 %v8943_v14 }
 0x21c   : > { %5427 = vmatpush3.bf16.msra.mxu1 %v5794_v41 }
 0x21d   : > { %5109 = vmatprep.subr.msk.bf16.mxu1 %vm574_vm3, %v5099_v63 }
 0x222   : > { %4927 = vmatmul.mubr.msk.bf16.gmra.mxu0 %vm1145_vm9, %v2522_v49  ;;  %4936 = vmatmul.mubr.msk.bf16.gmra.mxu1 %vm1145_vm9, %v2522_v49 }
 0x223   : > { %2716 = vmatprep.mubr.bf16.mxu0 %v8943_v14  ;;  %2829 = vmatprep.mubr.bf16.mxu1 %v8943_v14 }
 0x22a   : > { %4928 = vmatmul.mubr.msk.bf16.gmra.mxu0 %vm1145_vm9, %v2524_v37  ;;  %4937 = vmatmul.mubr.msk.bf16.gmra.mxu1 %vm1145_vm9, %v2524_v37 }
 0x23d   : > { %v5236_v31 = vpop.f32.mrf.mxu0 }
 0x23e   : > { %v5300_v58 = vpop.f32.mrf.mxu1 }
 0x23f   : > { %v5237_v53 = vpop.f32.mrf.mxu0 }
 0x240   : > { %v5301_v17 = vpop.f32.mrf.mxu1  ;;  %v5238_v29 = vadd.f32 %v5237_v53, %v5236_v31 }
 0x241   : > { %v5302_v59 = vadd.f32 %v5301_v17, %v5300_v58  ;;  %v5239_v36 = vpop.f32.mrf.mxu0 }
 0x242   : > { %v5303_v27 = vpop.f32.mrf.mxu1 }
 0x243   : > { %v8210_v15 = vadd.f32 %v5302_v59, %v5238_v29  ;;  %v5240_v6 = vpop.f32.mrf.mxu0 }
 0x244   : > { %v5304_v8 = vpop.f32.mrf.mxu1  ;;  %v5241_v21 = vadd.f32 %v5240_v6, %v5239_v36 }
 0x245   : > { %9023 = vst [vmem:[#allocation22_spill] sm:$0xff] %v8210_v15  ;;  %v5305_v25 = vadd.f32 %v5304_v8, %v5303_v27 }
 0x247   : > { %v8212_v49 = vadd.f32 %v5305_v25, %v5241_v21 }
 0x249   : > { %9024 = vst [vmem:[#allocation27_spill] sm:$0xff] %v8212_v49  ;;  %v5242_v23 = vpop.f32.mrf.mxu0 }
 0x24a   : > { %v5306_v11 = vpop.f32.mrf.mxu1 }
 0x24b   : > { %v5243_v55 = vpop.f32.mrf.mxu0 }
 0x24c   : > { %v5307_v5 = vpop.f32.mrf.mxu1  ;;  %v5244_v61 = vadd.f32 %v5243_v55, %v5242_v23 }
 0x24d   : > { %v5308_v62 = vadd.f32 %v5307_v5, %v5306_v11  ;;  %v5245_v22 = vpop.f32.mrf.mxu0 }
 0x24e   : > { %v5309_v18 = vpop.f32.mrf.mxu1 }
 0x24f   : > { %v8214_v28 = vadd.f32 %v5308_v62, %v5244_v61  ;;  %v5246_v45 = vpop.f32.mrf.mxu0 }
 0x250   : > { %v5310_v37 = vpop.f32.mrf.mxu1  ;;  %v5247_v54 = vadd.f32 %v5246_v45, %v5245_v22 }
 0x251   : > { %9025 = vst [vmem:[#allocation7_spill] sm:$0xff] %v8214_v28  ;;  %v5311_v7 = vadd.f32 %v5310_v37, %v5309_v18 }
 0x253   : > { %v8216_v38 = vadd.f32 %v5311_v7, %v5247_v54 }
 0x255   : > { %9026 = vst [vmem:[#allocation29_spill] sm:$0xff] %v8216_v38 }
 0x259   : > { %v5248_v1 = vpop.f32.mrf.mxu0 }
 0x25a   : > { %v5312_v4 = vpop.f32.mrf.mxu1 }
 0x25b   : > { %v5249_v44 = vpop.f32.mrf.mxu0 }
 0x25c   : > { %v5313_v13 = vpop.f32.mrf.mxu1  ;;  %v5250_v41 = vadd.f32 %v5249_v44, %v5248_v1 }
 0x25d   : > { %v5314_v48 = vadd.f32 %v5313_v13, %v5312_v4  ;;  %v5251_v63 = vpop.f32.mrf.mxu0 }
 0x25e   : > { %v5315_v31 = vpop.f32.mrf.mxu1 }
 0x25f   : > { %v8218_v58 = vadd.f32 %v5314_v48, %v5250_v41  ;;  %v5252_v53 = vpop.f32.mrf.mxu0 }
 0x260   : > { %v5316_v17 = vpop.f32.mrf.mxu1  ;;  %v5253_v29 = vadd.f32 %v5252_v53, %v5251_v63 }
 0x261   : > { %9027 = vst [vmem:[#allocation30_spill] sm:$0xff] %v8218_v58  ;;  %v5317_v59 = vadd.f32 %v5316_v17, %v5315_v31 }
 0x263   : > { %v8220_v36 = vadd.f32 %v5317_v59, %v5253_v29 }
 0x265   : > { %9028 = vst [vmem:[#allocation33_spill] sm:$0xff] %v8220_v36 }
 0x269   : > { %v5254_v27 = vpop.f32.mrf.mxu0 }
 0x26a   : > { %v5318_v6 = vpop.f32.mrf.mxu1 }
 0x26b   : > { %v5255_v8 = vpop.f32.mrf.mxu0 }
 0x26c   : > { %v5319_v21 = vpop.f32.mrf.mxu1  ;;  %v5256_v25 = vadd.f32 %v5255_v8, %v5254_v27 }
 0x26d   : > { %v5320_v23 = vadd.f32 %v5319_v21, %v5318_v6  ;;  %v5257_v11 = vpop.f32.mrf.mxu0 }
 0x26e   : > { %v5321_v55 = vpop.f32.mrf.mxu1 }
 0x26f   : > { %v8222_v5 = vadd.f32 %v5320_v23, %v5256_v25  ;;  %v5258_v61 = vpop.f32.mrf.mxu0 }
 0x270   : > { %v5322_v62 = vpop.f32.mrf.mxu1  ;;  %v5259_v22 = vadd.f32 %v5258_v61, %v5257_v11 }
 0x271   : > { %9029 = vst [vmem:[#allocation32_spill] sm:$0xff] %v8222_v5  ;;  %v5323_v18 = vadd.f32 %v5322_v62, %v5321_v55 }
 0x273   : > { %v8224_v45 = vadd.f32 %v5323_v18, %v5259_v22 }
 0x275   : > { %9030 = vst [vmem:[#allocation8_spill] sm:$0xff] %v8224_v45 }
 0x279   : > { %v5260_v37 = vpop.f32.mrf.mxu0 }
 0x27a   : > { %v5324_v54 = vpop.f32.mrf.mxu1 }
 0x27b   : > { %v5261_v7 = vpop.f32.mrf.mxu0 }
 0x27c   : > { %v5325_v1 = vpop.f32.mrf.mxu1  ;;  %v5262_v4 = vadd.f32 %v5261_v7, %v5260_v37 }
 0x27d   : > { %v5326_v44 = vadd.f32 %v5325_v1, %v5324_v54  ;;  %v5263_v13 = vpop.f32.mrf.mxu0 }
 0x27e   : > { %v5327_v41 = vpop.f32.mrf.mxu1 }
 0x27f   : > { %v8226_v48 = vadd.f32 %v5326_v44, %v5262_v4  ;;  %v5264_v63 = vpop.f32.mrf.mxu0 }
 0x280   : > { %v5328_v31 = vpop.f32.mrf.mxu1  ;;  %v5265_v53 = vadd.f32 %v5264_v63, %v5263_v13 }
 0x281   : > { %9031 = vst [vmem:[#allocation34_spill] sm:$0xff] %v8226_v48  ;;  %v5329_v17 = vadd.f32 %v5328_v31, %v5327_v41 }
 0x283   : > { %v8228_v29 = vadd.f32 %v5329_v17, %v5265_v53 }
 0x285   : > { %9032 = vst [vmem:[#allocation31_spill] sm:$0xff] %v8228_v29 }
 0x289   : > { %v5266_v59 = vpop.f32.mrf.mxu0 }
 0x28a   : > { %v5330_v27 = vpop.f32.mrf.mxu1 }
 0x28b   : > { %v5267_v6 = vpop.f32.mrf.mxu0 }
 0x28c   : > { %v5331_v8 = vpop.f32.mrf.mxu1  ;;  %v5268_v21 = vadd.f32 %v5267_v6, %v5266_v59 }
 0x28d   : > { %v5332_v25 = vadd.f32 %v5331_v8, %v5330_v27  ;;  %v5269_v23 = vpop.f32.mrf.mxu0 }
 0x28e   : > { %v5333_v11 = vpop.f32.mrf.mxu1 }
 0x28f   : > { %v8230_v55 = vadd.f32 %v5332_v25, %v5268_v21  ;;  %v5270_v61 = vpop.f32.mrf.mxu0 }
 0x290   : > { %v5334_v62 = vpop.f32.mrf.mxu1  ;;  %v5271_v22 = vadd.f32 %v5270_v61, %v5269_v23 }
 0x291   : > { %9033 = vst [vmem:[#allocation36_spill] sm:$0xff] %v8230_v55  ;;  %v5335_v18 = vadd.f32 %v5334_v62, %v5333_v11 }
 0x293   : > { %v8232_v37 = vadd.f32 %v5335_v18, %v5271_v22 }
 0x295   : > { %9034 = vst [vmem:[#allocation37_spill] sm:$0xff] %v8232_v37 }
 0x299   : > { %v5272_v54 = vpop.f32.mrf.mxu0 }
 0x29a   : > { %v5336_v7 = vpop.f32.mrf.mxu1 }
 0x29b   : > { %v5273_v1 = vpop.f32.mrf.mxu0 }
 0x29c   : > { %v5337_v4 = vpop.f32.mrf.mxu1  ;;  %v5274_v44 = vadd.f32 %v5273_v1, %v5272_v54 }
 0x29d   : > { %v5338_v13 = vadd.f32 %v5337_v4, %v5336_v7  ;;  %v5275_v41 = vpop.f32.mrf.mxu0 }
 0x29e   : > { %v5339_v63 = vpop.f32.mrf.mxu1 }
 0x29f   : > { %v8234_v31 = vadd.f32 %v5338_v13, %v5274_v44  ;;  %v5276_v53 = vpop.f32.mrf.mxu0 }
 0x2a0   : > { %v5340_v17 = vpop.f32.mrf.mxu1  ;;  %v5277_v59 = vadd.f32 %v5276_v53, %v5275_v41  ;;  %v8240_v41 = vpop.permute.xlu0 %3535 }
 0x2a1   : > { %9035 = vst [vmem:[#allocation39_spill] sm:$0xff] %v8234_v31  ;;  %v5341_v27 = vadd.f32 %v5340_v17, %v5339_v63 }
 0x2a3   : > { %v8236_v6 = vadd.f32 %v5341_v27, %v5277_v59 }
 0x2a5   : > { %9036 = vst [vmem:[#allocation40_spill] sm:$0xff] %v8236_v6 }
 0x2aa   : > { %v5278_v8 = vpop.f32.mrf.mxu0  ;;  %v5342_v21 = vpop.f32.mrf.mxu1 }
 0x2ac   : > { %v5279_v25 = vpop.f32.mrf.mxu0  ;;  %v5343_v23 = vpop.f32.mrf.mxu1 }
 0x2ad   : > { %v5280_v11 = vadd.f32 %v5279_v25, %v5278_v8  ;;  %v5344_v61 = vadd.f32 %v5343_v23, %v5342_v21  ;;  %v5096_v8 = vcombine.low %v8197_v60, %v8197_v60  ;;  %v5098_v21 = vcombine.low %v8202_v42, %v8202_v42  ;;  %v8248_v25 = vpop.permute.xlu1 %3561  ;;  %v5801_v60 = vld [vmem:[%s8702_s1 + $0xc4] ss:$16 sps:$4 sm:$0xff]   ;;  %v5804_v42 = vld [vmem:[%s8702_s1 + $0xcc] ss:$16 sps:$4 sm:$0xff]  }
 0x2ae   : > { %v5281_v62 = vpop.f32.mrf.mxu0  ;;  %v5345_v22 = vpop.f32.mrf.mxu1 }
 0x2af   : > { %v8238_v18 = vadd.f32 %v5344_v61, %v5280_v11  ;;  %v8250_v61 = vpop.permute.xlu0 %3586 }
 0x2b0   : > { %v5282_v54 = vpop.f32.mrf.mxu0  ;;  %v5346_v7 = vpop.f32.mrf.mxu1 }
 0x2b1   : > { %9037 = vst [vmem:[#allocation35_spill] sm:$0xff] %v8238_v18  ;;  %v5283_v1 = vadd.f32 %v5282_v54, %v5281_v62  ;;  %v5347_v4 = vadd.f32 %v5346_v7, %v5345_v22  ;;  %v3880_v18 = vsel %vm574_vm3, %v5098_v21, 0  ;;  %v5807_v21 = vld [vmem:[%s8702_s1 + $0xa4] ss:$16 sps:$4 sm:$0xff]  }
 0x2b2   : > { %v2648_v44 = vpop.f32.mrf.mxu0  ;;  %v2761_v13 = vpop.f32.mrf.mxu1 }
 0x2b3   : > { %v8242_v63 = vadd.f32 %v5347_v4, %v5283_v1 }
 0x2b4   : > { %v2650_v53 = vpop.f32.mrf.mxu0  ;;  %v2763_v17 = vpop.f32.mrf.mxu1 }
 0x2b5   : > { %9038 = vst [vmem:[#allocation41_spill] sm:$0xff] %v8242_v63  ;;  %v3874_v63 = vsel %vm574_vm3, %v5096_v8, 0 }
 0x2b6   : > { %v2652_v59 = vpop.f32.mrf.mxu0  ;;  %v2765_v27 = vpop.f32.mrf.mxu1 }
 0x2b7   : > { %v2840_v54 = vpack.c.bf16 %v2652_v59, %v2648_v44  ;;  %v2842_v7 = vpack.c.bf16 %v2765_v27, %v2761_v13  ;;  %v8260_v44 = vpop.permute.xlu1 %3611  ;;  %v5799_v13 = vld [vmem:[%s8702_s1 + $0xc0] ss:$16 sps:$4 sm:$0xff]   ;;  %v5802_v59 = vld [vmem:[%s8702_s1 + $0xc8] ss:$16 sps:$4 sm:$0xff]  }
 0x2b8   : > { %v2654_v23 = vpop.f32.mrf.mxu0  ;;  %v2767_v11 = vpop.f32.mrf.mxu1 }
 0x2b9   : > { %v2841_v62 = vpack.c.bf16 %v2654_v23, %v2650_v53  ;;  %v2843_v22 = vpack.c.bf16 %v2767_v11, %v2763_v17 }
 0x2ba   : > { %v2658_v1 = vpop.f32.mrf.mxu0  ;;  %v2771_v4 = vpop.f32.mrf.mxu1 }
 0x2bb   : > { %3161 = vmatprep.mubr.bf16.mxu0 %v2841_v62  ;;  %3258 = vmatprep.mubr.bf16.mxu1 %v2843_v22  ;;  %v8282_v37 = vpop.permute.xlu1 %3666 }
 0x2bc   : > { %v2660_v53 = vpop.f32.mrf.mxu0  ;;  %v2773_v17 = vpop.f32.mrf.mxu1  ;;  %3162 = vmatmul.mubr.bf16.vlgmr.msra.gmra.mxu0 %v2840_v54  ;;  %3259 = vmatmul.mubr.bf16.vlgmr.msra.gmra.mxu1 %v2842_v7  ;;  %v5805_v54 = vld [vmem:[%s8702_s1 + $0xa0] ss:$16 sps:$4 sm:$0xff]   ;;  %v5808_v7 = vld [vmem:[%s8702_s1 + $0xa8] ss:$16 sps:$4 sm:$0xff]  }
 0x2bd   : > { %3896 = vmatpush1.bf16.msra.mxu0 %v3874_v63  ;;  %4009 = vmatpush1.bf16.msra.mxu1 %v3880_v18  ;;  %v5810_v18 = vld [vmem:[%s8702_s1 + $0xac] ss:$16 sps:$4 sm:$0xff]   ;;  %v8274_v63 = vpop.permute.xlu0 %3636 }
 0x2be   : > { %v2662_v27 = vpop.f32.mrf.mxu0  ;;  %v2775_v8 = vpop.f32.mrf.mxu1  ;;  %3897 = vmatprep.subr.bf16.mxu0 %v5801_v60  ;;  %4010 = vmatprep.subr.bf16.mxu1 %v5804_v42 }
 0x2bf   : > { %v2844_v60 = vpack.c.bf16 %v2662_v27, %v2658_v1  ;;  %v2846_v42 = vpack.c.bf16 %v2775_v8, %v2771_v4  ;;  %v8286_v27 = vpop.permute.xlu1 %3588 }
 0x2c0   : > { %v2664_v23 = vpop.f32.mrf.mxu0  ;;  %v2777_v11 = vpop.f32.mrf.mxu1 }
 0x2c1   : > { %v2845_v62 = vpack.c.bf16 %v2664_v23, %v2660_v53  ;;  %v2847_v22 = vpack.c.bf16 %v2777_v11, %v2773_v17  ;;  %3898 = vmatpush1.bf16.msra.mxu0 %v5799_v13  ;;  %4011 = vmatpush1.bf16.msra.mxu1 %v5802_v59  ;;  %v8284_v13 = vpop.permute.xlu0 %3563 }
 0x2c2   : > { %v2668_v6 = vpop.f32.mrf.mxu0  ;;  %v2781_v31 = vpop.f32.mrf.mxu1  ;;  %3899 = vmatprep.subr.bf16.mxu0 %v5807_v21  ;;  %4012 = vmatprep.subr.bf16.mxu1 %v5810_v18 }
 0x2c3   : > { %3169 = vmatprep.mubr.bf16.mxu0 %v2845_v62  ;;  %3266 = vmatprep.mubr.bf16.mxu1 %v2847_v22  ;;  %v8290_v29 = vpop.permute.xlu1 %3638 }
 0x2c4   : > { %v2670_v53 = vpop.f32.mrf.mxu0  ;;  %v2783_v17 = vpop.f32.mrf.mxu1  ;;  %3170 = vmatmul.mubr.bf16.gmra.mxu0 %v2844_v60  ;;  %3267 = vmatmul.mubr.bf16.gmra.mxu1 %v2846_v42 }
 0x2c5   : > { %3900 = vmatpush1.bf16.msra.mxu0 %v5805_v54  ;;  %4013 = vmatpush1.bf16.msra.mxu1 %v5808_v7  ;;  %v8288_v55 = vpop.permute.xlu0 %3613 }
 0x2c6   : > { %v2672_v59 = vpop.f32.mrf.mxu0  ;;  %v2785_v23 = vpop.f32.mrf.mxu1 }
 0x2c7   : > { %v2848_v18 = vpack.c.bf16 %v2672_v59, %v2668_v6  ;;  %v2850_v11 = vpack.c.bf16 %v2785_v23, %v2781_v31 }
 0x2c8   : > { %v2674_v1 = vpop.f32.mrf.mxu0  ;;  %v2787_v4 = vpop.f32.mrf.mxu1 }
 0x2c9   : > { %v2849_v8 = vpack.c.bf16 %v2674_v1, %v2670_v53  ;;  %v2851_v21 = vpack.c.bf16 %v2787_v4, %v2783_v17  ;;  %v8292_v53 = vpop.permute.xlu0 %3668 }
 0x2ca   : > { %v2678_v62 = vpop.f32.mrf.mxu0  ;;  %v2791_v22 = vpop.f32.mrf.mxu1 }
 0x2cb   : > { %3177 = vmatprep.mubr.bf16.mxu0 %v2849_v8  ;;  %3274 = vmatprep.mubr.bf16.mxu1 %v2851_v21  ;;  %v8294_v21 = vpop.permute.xlu1 %3565 }
 0x2cc   : > { %v2680_v60 = vpop.f32.mrf.mxu0  ;;  %v2793_v42 = vpop.f32.mrf.mxu1  ;;  %3178 = vmatmul.mubr.bf16.gmra.mxu0 %v2848_v18  ;;  %3275 = vmatmul.mubr.bf16.gmra.mxu1 %v2850_v11 }
 0x2cd   : > { %v8296_v5 = vpop.permute.xlu0 %3590 }
 0x2ce   : > { %v2682_v54 = vpop.f32.mrf.mxu0  ;;  %v2795_v7 = vpop.f32.mrf.mxu1 }
 0x2cf   : > { %v2852_v17 = vpack.c.bf16 %v2682_v54, %v2678_v62  ;;  %v2854_v59 = vpack.c.bf16 %v2795_v7, %v2791_v22  ;;  %v8298_v54 = vpop.permute.xlu1 %3615 }
 0x2d0   : > { %v2684_v48 = vpop.f32.mrf.mxu0  ;;  %v2797_v45 = vpop.f32.mrf.mxu1 }
 0x2d1   : > { %v2853_v6 = vpack.c.bf16 %v2684_v48, %v2680_v60  ;;  %v2855_v31 = vpack.c.bf16 %v2797_v45, %v2793_v42 }
 0x2d2   : > { %v2688_v23 = vpop.f32.mrf.mxu0  ;;  %v2801_v1 = vpop.f32.mrf.mxu1 }
 0x2d3   : > { %3185 = vmatprep.mubr.bf16.mxu0 %v2853_v6  ;;  %3282 = vmatprep.mubr.bf16.mxu1 %v2855_v31  ;;  %v8300_v31 = vpop.permute.xlu0 %3640 }
 0x2d4   : > { %v2690_v4 = vpop.f32.mrf.mxu0  ;;  %v2803_v8 = vpop.f32.mrf.mxu1  ;;  %3186 = vmatmul.mubr.bf16.gmra.mxu0 %v2852_v17  ;;  %3283 = vmatmul.mubr.bf16.gmra.mxu1 %v2854_v59 }
 0x2d6   : > { %v2692_v18 = vpop.f32.mrf.mxu0  ;;  %v2805_v11 = vpop.f32.mrf.mxu1 }
 0x2d7   : > { %v2856_v62 = vpack.c.bf16 %v2692_v18, %v2688_v23  ;;  %v2858_v22 = vpack.c.bf16 %v2805_v11, %v2801_v1  ;;  %v8304_v11 = vpop.permute.xlu0 %3567 }
 0x2d8   : > { %v2694_v36 = vpop.f32.mrf.mxu0  ;;  %v2807_v58 = vpop.f32.mrf.mxu1 }
 0x2d9   : > { %v2857_v48 = vpack.c.bf16 %v2694_v36, %v2690_v4  ;;  %v2859_v45 = vpack.c.bf16 %v2807_v58, %v2803_v8  ;;  %v8302_v36 = vpop.permute.xlu1 %3670 }
 0x2da   : > { %v2698_v60 = vpop.f32.mrf.mxu0  ;;  %v2811_v42 = vpop.f32.mrf.mxu1 }
 0x2db   : > { %3193 = vmatprep.mubr.bf16.mxu0 %v2857_v48  ;;  %3290 = vmatprep.mubr.bf16.mxu1 %v2859_v45 }
 0x2dc   : > { %v2700_v7 = vpop.f32.mrf.mxu0  ;;  %v2813_v6 = vpop.f32.mrf.mxu1  ;;  %3194 = vmatmul.mubr.bf16.gmra.mxu0 %v2856_v62  ;;  %3291 = vmatmul.mubr.bf16.gmra.mxu1 %v2858_v22  ;;  %v9039_v62 = vcombine.low %v7375_v40, %v7390_v52 }
 0x2de   : > { %v2702_v17 = vpop.f32.mrf.mxu0  ;;  %v2815_v59 = vpop.f32.mrf.mxu1 }
 0x2df   : > { %v2860_v1 = vpack.c.bf16 %v2702_v17, %v2698_v60  ;;  %v2862_v4 = vpack.c.bf16 %v2815_v59, %v2811_v42  ;;  %v8311_v60 = vpop.permute.xlu1 %3592  ;;  %v8315_v17 = vpop.permute.xlu0 %3617 }
 0x2e0   : > { %v2704_v38 = vpop.f32.mrf.mxu0  ;;  %v2817_v28 = vpop.f32.mrf.mxu1 }
 0x2e1   : > { %v2861_v58 = vpack.c.bf16 %v2704_v38, %v2700_v7  ;;  %v2863_v23 = vpack.c.bf16 %v2817_v28, %v2813_v6  ;;  %v3684_v28 = vsel %vm941_vm14, %v9039_v62, %v8240_v41 }
 0x2e2   : > { %v2708_v8 = vpop.f32.mrf.mxu0  ;;  %v2821_v18 = vpop.f32.mrf.mxu1  ;;  %v3700_v6 = vsel %vm966_vm15, %v3684_v28, %v8248_v25 }
 0x2e3   : > { %3201 = vmatprep.mubr.bf16.mxu0 %v2861_v58  ;;  %3298 = vmatprep.mubr.bf16.mxu1 %v2863_v23  ;;  %v5879_v23 = vld [vmem:[%s6093_s14 + $0xc] sm:$0xf]  ;;  %v3716_v62 = vsel %vm983_vm0, %v3700_v6, %v8250_v61  ;;  %v8321_v25 = vpop.permute.xlu1 %3642 }
 0x2e4   : > { %v2710_v48 = vpop.f32.mrf.mxu0  ;;  %v2823_v45 = vpop.f32.mrf.mxu1  ;;  %3202 = vmatmul.mubr.bf16.gmra.mxu0 %v2860_v1  ;;  %3299 = vmatmul.mubr.bf16.gmra.mxu1 %v2862_v4  ;;  %v5880_v1 = vld [vmem:[%s6093_s14 + $0x10] sm:$0xf] }
 0x2e5   : > { %v5049_v4 = vcombine.low %v5879_v23, %v5880_v1 }
 0x2e6   : > { %v2712_v38 = vpop.f32.mrf.mxu0  ;;  %v2825_v22 = vpop.f32.mrf.mxu1 }
 0x2e7   : > { %v2864_v49 = vpack.c.bf16 %v2712_v38, %v2708_v8  ;;  %v2866_v40 = vpack.c.bf16 %v2825_v22, %v2821_v18  ;;  %v3731_v8 = vsel %vm1000_vm1, %v3716_v62, %v6976_v26  ;;  %v8327_v18 = vpop.permute.xlu0 %3672 }
 0x2e8   : > { %v2714_v42 = vpop.f32.mrf.mxu0  ;;  %v2827_v7 = vpop.f32.mrf.mxu1 }
 0x2e9   : > { %v2865_v59 = vpack.c.bf16 %v2714_v42, %v2710_v48  ;;  %v2867_v58 = vpack.c.bf16 %v2827_v7, %v2823_v45  ;;  %v3686_v48 = vsel %vm941_vm14, %v5049_v4, %v7887_v2  ;;  %v3740_v7 = vsel %vm1017_vm2, %v3731_v8, %v8260_v44 }
 0x2ea   : > { %v2718_v52 = vpop.f32.mrf.mxu0  ;;  %v2831_v41 = vpop.f32.mrf.mxu1  ;;  %v3702_v61 = vsel %vm966_vm15, %v3686_v48, %v8284_v13 }
 0x2eb   : > { %3209 = vmatprep.mubr.bf16.mxu0 %v2865_v59  ;;  %3306 = vmatprep.mubr.bf16.mxu1 %v2867_v58  ;;  %v3570_v59 = vpop.permute.xlu1 %3569  ;;  %v3718_v26 = vsel %vm983_vm0, %v3702_v61, %v8286_v27  ;;  %v3756_v58 = vsel %vm1034_vm5, %v3740_v7, %v8274_v63  ;;  %v3595_v13 = vpop.permute.xlu0 %3594  ;;  %v3694_v7 = vsel %vm941_vm14, %v7743_v51, %v9014_v39 }
 0x2ec   : > { %v2720_v15 = vpop.f32.mrf.mxu0  ;;  %v2833_v3 = vpop.f32.mrf.mxu1  ;;  %3210 = vmatmul.mubr.bf16.gmra.mxu0 %v2864_v49  ;;  %3307 = vmatmul.mubr.bf16.gmra.mxu1 %v2866_v40  ;;  %v3732_v23 = vsel %vm1000_vm1, %v3718_v26, %v7017_v47  ;;  %v3771_v1 = vsel %vm1051_vm6, %v3756_v58, %v7168_v30  ;;  %v5817_v26 = vld [vmem:[%s8703_s2 + $0x230] sm:$0xff]  }
 0x2ed   : > { %v3742_v4 = vsel %vm1017_vm2, %v3732_v23, %v8288_v55  ;;  %v3781_v40 = vsel %vm1068_vm7, %v3771_v1, %v8282_v37  ;;  %v3690_v37 = vsel %vm941_vm14, %v7641_v0, %v7045_v24  ;;  %v9041_v1 = vld [vmem:[#allocation23_spill] sm:$0xff] }
 0x2ee   : > { %v2722_v45 = vpop.f32.mrf.mxu0  ;;  %v2835_v28 = vpop.f32.mrf.mxu1  ;;  %v3758_v30 = vsel %vm1034_vm5, %v3742_v4, %v8290_v29 }
 0x2ef   : > { %v2868_v2 = vpack.c.bf16 %v2722_v45, %v2718_v52  ;;  %v2870_v6 = vpack.c.bf16 %v2835_v28, %v2831_v41  ;;  %v3620_v27 = vpop.permute.xlu1 %3619  ;;  %v3645_v47 = vpop.permute.xlu0 %3644  ;;  %v9040_v45 = vld [vmem:[#allocation24_spill] sm:$0xff] }
 0x2f0   : > { %v2724_v38 = vpop.f32.mrf.mxu0  ;;  %v2837_v22 = vpop.f32.mrf.mxu1 }
 0x2f1   : > { %v2869_v49 = vpack.c.bf16 %v2724_v38, %v2720_v15  ;;  %v2871_v42 = vpack.c.bf16 %v2837_v22, %v2833_v3  ;;  %v5881_v3 = vld [vmem:[%s6093_s14 + $0x18] sm:$0xf]  ;;  %v5882_v15 = vld [vmem:[%s6093_s14 + $0x1c] sm:$0xf]  ;;  %s5889_s14 = scalar_lea.vmem %s5888_s19, 128 }
 0x2f2   : > { %v5050_v44 = vcombine.low %v5881_v3, %v5882_v15  ;;  %v5814_v22 = vld [vmem:[%s8703_s2 + $0x2b8] sm:$0xff]   ;;  %v5819_v15 = vld [vmem:[%s8703_s2 + $0x268] sm:$0xff]   ;;  %p5891_p4 = scmp.lt.s32.totalorder %s5889_s14, %s5883_s11 }
 0x2f3   : > { %3217 = vmatprep.mubr.bf16.mxu0 %v2869_v49  ;;  %3314 = vmatprep.mubr.bf16.mxu1 %v2871_v42  ;;  %v8363_v55 = vpop.permute.xlu1 %3674  ;;  %v3572_v62 = vpop.permute.xlu0 %3571  ;;  %v5815_v49 = vld [vmem:[%s8703_s2 + $0x270] sm:$0xff]  }
 0x2f4   : > { %3218 = vmatmul.mubr.bf16.gmra.mxu0 %v2868_v2  ;;  %3315 = vmatmul.mubr.bf16.gmra.mxu1 %v2870_v6  ;;  %v3688_v63 = vsel %vm941_vm14, %v5050_v44, %v6956_v33  ;;  %v5816_v42 = vld [vmem:[%s8703_s2 + $0x2f0] sm:$0xff]   ;;  %v3710_v2 = vsel %vm966_vm15, %v3694_v7, %v3572_v62  ;;  %v5820_v44 = vld [vmem:[%s8703_s2 + $0x2e8] sm:$0xff]   ;;  %p5892_p5 = por %p5891_p4, %p5890_p2 }
 0x2f5   : > { %3917 = vmatprep.mubr.bf16.mxu0 %v8943_v14  ;;  %4030 = vmatprep.mubr.bf16.mxu1 %v8943_v14  ;;  %v3704_v52 = vsel %vm966_vm15, %v3688_v63, %v8294_v21  ;;  %v3706_v21 = vsel %vm966_vm15, %v3690_v37, %v8304_v11  ;;  %v5838_v7 = vld [vmem:[%s8703_s2 + $0x288] sm:$0xff]  }
 0x2f6   : > { %v3720_v41 = vsel %vm983_vm0, %v3704_v52, %v8296_v5  ;;  %v3772_v5 = vsel %vm1051_vm6, %v3758_v30, %v9013_v32  ;;  %v5823_v30 = vld [vmem:[%s8703_s2 + $0x260] sm:$0xff]   ;;  %p5893_p6 = pnand %p5892_p5, %p5886_p1 }
 0x2f7   : > { %v3733_v33 = vsel %vm1000_vm1, %v3720_v41, %v7108_v35  ;;  %v3783_v48 = vsel %vm1068_vm7, %v3772_v5, %v8292_v53  ;;  %v3722_v35 = vsel %vm983_vm0, %v3706_v21, %v8311_v60  ;;  %v3597_v0 = vpop.permute.xlu1 %3596  ;;  %v5811_v53 = vld [vmem:[%s8703_s2 + $0x278] sm:$0xff]   ;;  %v9042_v21 = vld [vmem:[#allocation25_spill] sm:$0xff] }
 0x2f8   : > { %v3744_v29 = vsel %vm1017_vm2, %v3733_v33, %v8298_v54  ;;  %v3734_v32 = vsel %vm1000_vm1, %v3722_v35, %v9012_v20  ;;  %v5812_v54 = vld [vmem:[%s8703_s2 + $0x2f8] sm:$0xff]   ;;  %5476 = vmatprep.subr.bf16.mxu0 %v5811_v53  ;;  %v3692_v20 = vsel %vm941_vm14, %v9040_v45, %v9010_v19  ;;  %v3726_v51 = vsel %vm983_vm0, %v3710_v2, %v3597_v0  ;;  %v5824_v33 = vld [vmem:[%s8703_s2 + $0x2e0] sm:$0xff]  }
 0x2f9   : > { %v3760_v24 = vsel %vm1034_vm5, %v3744_v29, %v8300_v31  ;;  %v3622_v31 = vpop.permute.xlu0 %3621  ;;  %5540 = vmatprep.subr.bf16.mxu1 %v5812_v54  ;;  %v3746_v60 = vsel %vm1017_vm2, %v3734_v32, %v8315_v17  ;;  %v3708_v28 = vsel %vm966_vm15, %v3692_v20, %v3570_v59  ;;  %v5825_v35 = vld [vmem:[%s8703_s2 + $0x220] sm:$0xff]   ;;  %v5827_v32 = vld [vmem:[%s8703_s2 + $0x258] sm:$0xff]  }
 0x2fa   : > { %v3773_v11 = vsel %vm1051_vm6, %v3760_v24, %v9017_v16  ;;  %v5813_v16 = vld [vmem:[%s8703_s2 + $0x238] sm:$0xff]   ;;  %v3724_v17 = vsel %vm983_vm0, %v3708_v28, %v3595_v13  ;;  %v3762_v19 = vsel %vm1034_vm5, %v3746_v60, %v8321_v25  ;;  %v5839_v2 = vld [vmem:[%s8703_s2 + $0x240] sm:$0xff]  }
 0x2fb   : > { %v3647_v8 = vpop.permute.xlu1 %3646  ;;  %v3785_v38 = vsel %vm1068_vm7, %v3773_v11, %v8302_v36  ;;  %v3735_v61 = vsel %vm1000_vm1, %v3724_v17, %v9016_v10  ;;  %v3774_v25 = vsel %vm1051_vm6, %v3762_v19, %v7583_v46  ;;  %v5818_v46 = vld [vmem:[%s8703_s2 + $0x2b0] sm:$0xff]   ;;  %v5828_v53 = vld [vmem:[%s8703_s2 + $0x2d8] sm:$0xff]  }
 0x2fc   : > { %5101 = vmatmul.mubr.msk.bf16.vlgmr.msra.gmra.mxu0 %vm1145_vm9, %v3781_v40  ;;  %5110 = vmatmul.mubr.msk.bf16.vlgmr.msra.gmra.mxu1 %vm1145_vm9, %v3781_v40  ;;  %v3748_v10 = vsel %vm1017_vm2, %v3735_v61, %v3620_v27  ;;  %v3787_v59 = vsel %vm1068_vm7, %v3774_v25, %v8327_v18  ;;  %v3736_v18 = vsel %vm1000_vm1, %v3726_v51, %v7463_v9  ;;  %v5821_v40 = vld [vmem:[%s8703_s2 + $0x228] sm:$0xff]   ;;  %v9043_v11 = vld [vmem:[#allocation26_spill] sm:$0xff]  ;;  %v5829_v20 = vld [vmem:[%s8703_s2 + $0x218] sm:$0xff]  }
 0x2fd   : > { %3927 = vmatprep.mubr.bf16.mxu0 %v8943_v14  ;;  %4040 = vmatprep.mubr.bf16.mxu1 %v8943_v14  ;;  %v3677_v36 = vpop.permute.xlu0 %3676  ;;  %v3764_v58 = vsel %vm1034_vm5, %v3748_v10, %v3645_v47  ;;  %v3750_v23 = vsel %vm1017_vm2, %v3736_v18, %v3622_v31  ;;  %v3696_v9 = vsel %vm941_vm14, %v9041_v1, %v9018_v57  ;;  %v5830_v28 = vld [vmem:[%s8703_s2 + $0x298] sm:$0xff]   ;;  %v5834_v61 = vld [vmem:[%s8703_s2 + $0x290] sm:$0xff]   ;;  %v5837_v25 = vld [vmem:[%s8703_s2 + $0x208] sm:$0xff]  }
 0x2fe   : > { %5477 = vmatpush3.bf16.msra.mxu0 %v5813_v16  ;;  %5541 = vmatpush3.bf16.msra.mxu1 %v5814_v22  ;;  %v3775_v13 = vsel %vm1051_vm6, %v3764_v58, %v7691_v34  ;;  %v5822_v34 = vld [vmem:[%s8703_s2 + $0x2a8] sm:$0xff]   ;;  %v3766_v57 = vsel %vm1034_vm5, %v3750_v23, %v3647_v8  ;;  %v5831_v16 = vld [vmem:[%s8703_s2 + $0x250] sm:$0xff]   ;;  %v5841_v10 = vld [vmem:[%s8703_s2 + $0x200] sm:$0xff]  }
 0x2ff   : > { %v3574_v6 = vpop.permute.xlu1 %3573  ;;  %5478 = vmatprep.subr.bf16.mxu0 %v5815_v49  ;;  %5542 = vmatprep.subr.bf16.mxu1 %v5816_v42  ;;  %v3789_v63 = vsel %vm1068_vm7, %v3775_v13, %v8363_v55  ;;  %v3776_v55 = vsel %vm1051_vm6, %v3766_v57, %v7752_v50  ;;  %v5826_v50 = vld [vmem:[%s8703_s2 + $0x2a0] sm:$0xff]   ;;  %v5832_v22 = vld [vmem:[%s8703_s2 + $0x2d0] sm:$0xff]   ;;  %v5835_v49 = vld [vmem:[%s8703_s2 + $0x248] sm:$0xff]  }
 0x300   : > { %v3712_v4 = vsel %vm966_vm15, %v3696_v9, %v3574_v6  ;;  %v3791_v29 = vsel %vm1068_vm7, %v3776_v55, %v3677_v36  ;;  %v5836_v42 = vld [vmem:[%s8703_s2 + $0x2c8] sm:$0xff]   ;;  %v5840_v6 = vld [vmem:[%s8703_s2 + $0x2c0] sm:$0xff]   ;;  %v9044_v13 = vld [vmem:[#allocation22_spill] sm:$0xff] }
 0x301   : > { %v3599_v39 = vpop.permute.xlu0 %3598  ;;  %v8567_v51 = vld [vmem:[%s8704_s3] ss:$0 sm:$0xff]  ;;  %v9045_v57 = vld [vmem:[#allocation27_spill] sm:$0xff] }
 0x302   : > { %5479 = vmatpush3.bf16.msra.mxu0 %v5817_v26  ;;  %5543 = vmatpush3.bf16.msra.mxu1 %v5818_v46  ;;  %v3728_v52 = vsel %vm983_vm0, %v3712_v4, %v3599_v39  ;;  %v1883_v23 = vadd.f32 %v8567_v51, %v9044_v13 }
 0x303   : > { %v3624_v3 = vpop.permute.xlu1 %3623  ;;  %5480 = vmatprep.subr.bf16.mxu0 %v5819_v15  ;;  %5544 = vmatprep.subr.bf16.mxu1 %v5820_v44  ;;  %v3737_v47 = vsel %vm1000_vm1, %v3728_v52, %v7621_v12  ;;  %v3698_v12 = vsel %vm941_vm14, %v9042_v21, %v9020_v43 }
 0x304   : > { %5102 = vmatmul.mubr.msk.bf16.gmra.mxu0 %vm1145_vm9, %v3783_v48  ;;  %5111 = vmatmul.mubr.msk.bf16.gmra.mxu1 %vm1145_vm9, %v3783_v48  ;;  %v3752_v37 = vsel %vm1017_vm2, %v3737_v47, %v3624_v3 }
 0x305   : > { %3937 = vmatprep.mubr.bf16.mxu0 %v8943_v14  ;;  %4050 = vmatprep.mubr.bf16.mxu1 %v8943_v14  ;;  %v3649_v27 = vpop.permute.xlu0 %3648 }
 0x306   : > { %5481 = vmatpush3.bf16.msra.mxu0 %v5821_v40  ;;  %5545 = vmatpush3.bf16.msra.mxu1 %v5822_v34  ;;  %v3768_v24 = vsel %vm1034_vm5, %v3752_v37, %v3649_v27 }
 0x307   : > { %v3679_v41 = vpop.permute.xlu1 %3678  ;;  %5482 = vmatprep.subr.bf16.mxu0 %v5823_v30  ;;  %5546 = vmatprep.subr.bf16.mxu1 %v5824_v33  ;;  %v3777_v54 = vsel %vm1051_vm6, %v3768_v24, %v8148_v56 }
 0x308   : > { %v3793_v45 = vsel %vm1068_vm7, %v3777_v54, %v3679_v41  ;;  %v1884_v41 = vadd.f32 %v8567_v51, %v9045_v57  ;;  %v9047_v54 = vld [vmem:[#allocation29_spill] sm:$0xff] }
 0x309   : > { %v3576_v5 = vpop.permute.xlu0 %3575 }
 0x30a   : > { %v3714_v62 = vsel %vm966_vm15, %v3698_v12, %v3576_v5  ;;  %5483 = vmatpush3.bf16.msra.mxu0 %v5825_v35  ;;  %5547 = vmatpush3.bf16.msra.mxu1 %v5826_v50 }
 0x30b   : > { %v3601_v48 = vpop.permute.xlu1 %3600  ;;  %5484 = vmatprep.subr.bf16.mxu0 %v5827_v32  ;;  %5548 = vmatprep.subr.bf16.mxu1 %v5828_v53 }
 0x30c   : > { %5103 = vmatmul.mubr.msk.bf16.gmra.mxu0 %vm1145_vm9, %v3785_v38  ;;  %5112 = vmatmul.mubr.msk.bf16.gmra.mxu1 %vm1145_vm9, %v3785_v38  ;;  %v3730_v43 = vsel %vm983_vm0, %v3714_v62, %v3601_v48 }
 0x30d   : > { %3947 = vmatprep.mubr.bf16.mxu0 %v8943_v14  ;;  %4060 = vmatprep.mubr.bf16.mxu1 %v8943_v14  ;;  %v3626_v0 = vpop.permute.xlu0 %3625  ;;  %v3738_v31 = vsel %vm1000_vm1, %v3730_v43, %v9043_v11  ;;  %v1886_v11 = vadd.f32 %v8567_v51, %v9047_v54  ;;  %v9053_v54 = vld [vmem:[#allocation31_spill] sm:$0xff] }
 0x30e   : > { %v3754_v8 = vsel %vm1017_vm2, %v3738_v31, %v3626_v0  ;;  %5485 = vmatpush3.bf16.msra.mxu0 %v5829_v20  ;;  %5549 = vmatpush3.bf16.msra.mxu1 %v5830_v28 }
 0x30f   : > { %v3651_v60 = vpop.permute.xlu1 %3650  ;;  %5486 = vmatprep.subr.bf16.mxu0 %v5831_v16  ;;  %5550 = vmatprep.subr.bf16.mxu1 %v5832_v22  ;;  %v9048_v16 = vld [vmem:[#allocation30_spill] sm:$0xff] }
 0x310   : > { %v3770_v38 = vsel %vm1034_vm5, %v3754_v8, %v3651_v60  ;;  %v1887_v22 = vadd.f32 %v8567_v51, %v9048_v16 }
 0x311   : > { %v3656_v56 = vpop.permute.xlu0 %3655 }
 0x312   : > { %v3779_v17 = vsel %vm1051_vm6, %v3770_v38, %v3656_v56  ;;  %5551 = vmatpush3.bf16.msra.mxu1 %v5834_v61 }
 0x313   : > { %v3681_v19 = vpop.permute.xlu1 %3680  ;;  %5552 = vmatprep.subr.bf16.mxu1 %v5836_v42 }
 0x314   : > { %5104 = vmatmul.mubr.msk.bf16.gmra.mxu0 %vm1145_vm9, %v3787_v59  ;;  %5113 = vmatmul.mubr.msk.bf16.gmra.mxu1 %vm1145_vm9, %v3787_v59  ;;  %v3795_v36 = vsel %vm1068_vm7, %v3779_v17, %v3681_v19  ;;  %v5842_v59 = vld [vmem:[%s8703_s2 + $0x280] sm:$0xff]  }
 0x315   : > { %3957 = vmatprep.mubr.bf16.mxu0 %v8943_v14  ;;  %4070 = vmatprep.mubr.bf16.mxu1 %v8943_v14 }
 0x316   : > { %5553 = vmatpush3.bf16.msra.mxu1 %v5838_v7  ;;  %v9049_v7 = vld [vmem:[#allocation33_spill] sm:$0xff] }
 0x317   : > { %5554 = vmatprep.subr.bf16.mxu1 %v5840_v6 }
 0x31a   : > { %5555 = vmatpush3.bf16.msra.mxu1 %v5842_v59 }
 0x31c   : > { %5105 = vmatmul.mubr.msk.bf16.gmra.mxu0 %vm1145_vm9, %v3789_v63  ;;  %5114 = vmatmul.mubr.msk.bf16.gmra.mxu1 %vm1145_vm9, %v3789_v63 }
 0x31d   : > { %3967 = vmatprep.mubr.bf16.mxu0 %v8943_v14  ;;  %4080 = vmatprep.mubr.bf16.mxu1 %v8943_v14 }
 0x324   : > { %5106 = vmatmul.mubr.msk.bf16.gmra.mxu0 %vm1145_vm9, %v3791_v29  ;;  %5115 = vmatmul.mubr.msk.bf16.gmra.mxu1 %vm1145_vm9, %v3791_v29  ;;  %v9046_v29 = vld [vmem:[#allocation7_spill] sm:$0xff] }
 0x325   : > { %3977 = vmatprep.mubr.bf16.mxu0 %v8943_v14  ;;  %4090 = vmatprep.mubr.bf16.mxu1 %v8943_v14  ;;  %v1885_v62 = vadd.f32 %v8567_v51, %v9046_v29 }
 0x32c   : > { %5107 = vmatmul.mubr.msk.bf16.gmra.mxu0 %vm1145_vm9, %v3793_v45  ;;  %5116 = vmatmul.mubr.msk.bf16.gmra.mxu1 %vm1145_vm9, %v3793_v45 }
 0x32d   : > { %3987 = vmatprep.mubr.bf16.mxu0 %v8943_v14  ;;  %4100 = vmatprep.mubr.bf16.mxu1 %v8943_v14  ;;  %v5833_v14 = vld [vmem:[%s8703_s2 + $0x210] sm:$0xff]  }
 0x32e   : > { %5487 = vmatpush3.bf16.msra.mxu0 %v5833_v14 }
 0x32f   : > { %5488 = vmatprep.subr.bf16.mxu0 %v5835_v49 }
 0x332   : > { %5489 = vmatpush3.bf16.msra.mxu0 %v5837_v25 }
 0x333   : > { %5490 = vmatprep.subr.bf16.mxu0 %v5839_v2  ;;  %v1888_v2 = vadd.f32 %v8567_v51, %v9049_v7 }
 0x334   : > { %5108 = vmatmul.mubr.msk.bf16.gmra.mxu0 %vm1145_vm9, %v3795_v36  ;;  %5117 = vmatmul.mubr.msk.bf16.gmra.mxu1 %vm1145_vm9, %v3795_v36 }
 0x336   : > { %5491 = vmatpush3.bf16.msra.mxu0 %v5841_v10 }
 0x37c   : > { %v5364_v26 = vpop.f32.mrf.mxu0  ;;  %v5428_v46 = vpop.f32.mrf.mxu1 }
 0x37e   : > { %v5365_v39 = vpop.f32.mrf.mxu0  ;;  %v5429_v58 = vpop.f32.mrf.mxu1 }
 0x37f   : > { %v5366_v18 = vadd.f32 %v5365_v39, %v5364_v26  ;;  %v5430_v3 = vadd.f32 %v5429_v58, %v5428_v46 }
 0x380   : > { %v5367_v15 = vpop.f32.mrf.mxu0  ;;  %v5431_v44 = vpop.f32.mrf.mxu1 }
 0x381   : > { %v3261_v1 = vadd.f32 %v5430_v3, %v5366_v18  ;;  %v9050_v3 = vld [vmem:[#allocation32_spill] sm:$0xff] }
 0x382   : > { %v5368_v9 = vpop.f32.mrf.mxu0  ;;  %v5432_v27 = vpop.f32.mrf.mxu1 }
 0x383   : > { %v8571_v4 = vadd.f32 %v3261_v1, %v1883_v23  ;;  %v5369_v63 = vadd.f32 %v5368_v9, %v5367_v15  ;;  %v5433_v40 = vadd.f32 %v5432_v27, %v5431_v44  ;;  %v1889_v15 = vadd.f32 %v8567_v51, %v9050_v3 }
 0x384   : > { %v5370_v34 = vpop.f32.mrf.mxu0  ;;  %v5434_v52 = vpop.f32.mrf.mxu1 }
 0x385   : > { %v3264_v47 = vadd.f32 %v5433_v40, %v5369_v63 }
 0x386   : > { %v5371_v30 = vpop.f32.mrf.mxu0  ;;  %v5435_v33 = vpop.f32.mrf.mxu1 }
 0x387   : > { %v8575_v55 = vadd.f32 %v3264_v47, %v1884_v41  ;;  %v5372_v5 = vadd.f32 %v5371_v30, %v5370_v34  ;;  %v5436_v37 = vadd.f32 %v5435_v33, %v5434_v52  ;;  %v9051_v34 = vld [vmem:[#allocation8_spill] sm:$0xff] }
 0x388   : > { %v5373_v21 = vpop.f32.mrf.mxu0  ;;  %v5437_v12 = vpop.f32.mrf.mxu1  ;;  %v1890_v52 = vadd.f32 %v8567_v51, %v9051_v34 }
 0x389   : > { %v3269_v48 = vadd.f32 %v5436_v37, %v5372_v5 }
 0x38a   : > { %v5374_v35 = vpop.f32.mrf.mxu0  ;;  %v5438_v50 = vpop.f32.mrf.mxu1 }
 0x38b   : > { %v8579_v24 = vadd.f32 %v3269_v48, %v1885_v62  ;;  %v5375_v43 = vadd.f32 %v5374_v35, %v5373_v21  ;;  %v5439_v0 = vadd.f32 %v5438_v50, %v5437_v12  ;;  %v9052_v12 = vld [vmem:[#allocation34_spill] sm:$0xff] }
 0x38c   : > { %v5376_v32 = vpop.f32.mrf.mxu0  ;;  %v5440_v53 = vpop.f32.mrf.mxu1  ;;  %v1891_v29 = vadd.f32 %v8567_v51, %v9052_v12 }
 0x38d   : > { %v3272_v31 = vadd.f32 %v5439_v0, %v5375_v43 }
 0x38e   : > { %v5377_v60 = vpop.f32.mrf.mxu0  ;;  %v5441_v45 = vpop.f32.mrf.mxu1 }
 0x38f   : > { %v8583_v20 = vadd.f32 %v3272_v31, %v1886_v11  ;;  %v5378_v28 = vadd.f32 %v5377_v60, %v5376_v32  ;;  %v5442_v8 = vadd.f32 %v5441_v45, %v5440_v53  ;;  %v1892_v11 = vadd.f32 %v8567_v51, %v9053_v54 }
 0x390   : > { %v5379_v56 = vpop.f32.mrf.mxu0  ;;  %v5443_v38 = vpop.f32.mrf.mxu1 }
 0x391   : > { %v3277_v17 = vadd.f32 %v5442_v8, %v5378_v28 }
 0x392   : > { %v5380_v19 = vpop.f32.mrf.mxu0  ;;  %v5444_v36 = vpop.f32.mrf.mxu1 }
 0x393   : > { %v8587_v14 = vadd.f32 %v3277_v17, %v1887_v22  ;;  %v5381_v61 = vadd.f32 %v5380_v19, %v5379_v56  ;;  %v5445_v49 = vadd.f32 %v5444_v36, %v5443_v38  ;;  %v9054_v22 = vld [vmem:[#allocation36_spill] sm:$0xff] }
 0x394   : > { %v5382_v42 = vpop.f32.mrf.mxu0  ;;  %v5446_v25 = vpop.f32.mrf.mxu1  ;;  %v1893_v17 = vadd.f32 %v8567_v51, %v9054_v22 }
 0x395   : > { %v3280_v6 = vadd.f32 %v5445_v49, %v5381_v61 }
 0x396   : > { %v5383_v10 = vpop.f32.mrf.mxu0  ;;  %v5447_v59 = vpop.f32.mrf.mxu1 }
 0x397   : > { %v8591_v26 = vadd.f32 %v3280_v6, %v1888_v2  ;;  %v5384_v46 = vadd.f32 %v5383_v10, %v5382_v42  ;;  %v5448_v39 = vadd.f32 %v5447_v59, %v5446_v25  ;;  %v9055_v6 = vld [vmem:[#allocation37_spill] sm:$0xff] }
 0x398   : > { %v5385_v58 = vpop.f32.mrf.mxu0  ;;  %v5449_v18 = vpop.f32.mrf.mxu1  ;;  %v1894_v10 = vadd.f32 %v8567_v51, %v9055_v6 }
 0x399   : > { %v3285_v44 = vadd.f32 %v5448_v39, %v5384_v46 }
 0x39a   : > { %v5386_v13 = vpop.f32.mrf.mxu0  ;;  %v5450_v23 = vpop.f32.mrf.mxu1 }
 0x39b   : > { %v8595_v1 = vadd.f32 %v3285_v44, %v1889_v15  ;;  %v5387_v9 = vadd.f32 %v5386_v13, %v5385_v58  ;;  %v5451_v27 = vadd.f32 %v5450_v23, %v5449_v18  ;;  %v9056_v13 = vld [vmem:[#allocation39_spill] sm:$0xff] }
 0x39c   : > { %v5388_v63 = vpop.f32.mrf.mxu0  ;;  %v5452_v40 = vpop.f32.mrf.mxu1  ;;  %v1895_v23 = vadd.f32 %v8567_v51, %v9056_v13 }
 0x39d   : > { %v3288_v57 = vadd.f32 %v5451_v27, %v5387_v9 }
 0x39e   : > { %v5389_v41 = vpop.f32.mrf.mxu0  ;;  %v5453_v47 = vpop.f32.mrf.mxu1 }
 0x39f   : > { %v8599_v30 = vadd.f32 %v3288_v57, %v1890_v52  ;;  %v5390_v33 = vadd.f32 %v5389_v41, %v5388_v63  ;;  %v5454_v5 = vadd.f32 %v5453_v47, %v5452_v40  ;;  %v9057_v47 = vld [vmem:[#allocation40_spill] sm:$0xff] }
 0x3a0   : > { %v5391_v37 = vpop.f32.mrf.mxu0  ;;  %v5455_v21 = vpop.f32.mrf.mxu1 }
 0x3a1   : > { %v3293_v62 = vadd.f32 %v5454_v5, %v5390_v33  ;;  %v1896_v33 = vadd.f32 %v8567_v51, %v9057_v47 }
 0x3a2   : > { %v5392_v48 = vpop.f32.mrf.mxu0  ;;  %v5456_v35 = vpop.f32.mrf.mxu1 }
 0x3a3   : > { %v8603_v50 = vadd.f32 %v3293_v62, %v1891_v29  ;;  %v5393_v43 = vadd.f32 %v5392_v48, %v5391_v37  ;;  %v5457_v0 = vadd.f32 %v5456_v35, %v5455_v21 }
 0x3a4   : > { %v5394_v32 = vpop.f32.mrf.mxu0  ;;  %v5458_v53 = vpop.f32.mrf.mxu1 }
 0x3a5   : > { %v3296_v31 = vadd.f32 %v5457_v0, %v5393_v43  ;;  %v9058_v43 = vld [vmem:[#allocation35_spill] sm:$0xff] }
 0x3a6   : > { %v5395_v60 = vpop.f32.mrf.mxu0  ;;  %v5459_v45 = vpop.f32.mrf.mxu1  ;;  %v1897_v0 = vadd.f32 %v8567_v51, %v9058_v43 }
 0x3a7   : > { %v8607_v28 = vadd.f32 %v3296_v31, %v1892_v11  ;;  %v5396_v8 = vadd.f32 %v5395_v60, %v5394_v32  ;;  %v5460_v56 = vadd.f32 %v5459_v45, %v5458_v53 }
 0x3a8   : > { %v5397_v38 = vpop.f32.mrf.mxu0  ;;  %v5461_v16 = vpop.f32.mrf.mxu1 }
 0x3a9   : > { %v3301_v19 = vadd.f32 %v5460_v56, %v5396_v8  ;;  %v9059_v56 = vld [vmem:[#allocation41_spill] sm:$0xff] }
 0x3aa   : > { %v5398_v36 = vpop.f32.mrf.mxu0  ;;  %v5462_v61 = vpop.f32.mrf.mxu1 }
 0x3ab   : > { %v8611_v49 = vadd.f32 %v3301_v19, %v1893_v17  ;;  %v5399_v42 = vadd.f32 %v5398_v36, %v5397_v38  ;;  %v5463_v25 = vadd.f32 %v5462_v61, %v5461_v16  ;;  %v1898_v38 = vadd.f32 %v8567_v51, %v9059_v56 }
 0x3ac   : > { %v5400_v7 = vpop.f32.mrf.mxu0  ;;  %v5464_v2 = vpop.f32.mrf.mxu1 }
 0x3ad   : > { %v3304_v59 = vadd.f32 %v5463_v25, %v5399_v42 }
 0x3ae   : > { %v5401_v46 = vpop.f32.mrf.mxu0  ;;  %v5465_v39 = vpop.f32.mrf.mxu1 }
 0x3af   : > { %v8615_v58 = vadd.f32 %v3304_v59, %v1894_v10  ;;  %v5402_v18 = vadd.f32 %v5401_v46, %v5400_v7  ;;  %v5466_v3 = vadd.f32 %v5465_v39, %v5464_v2 }
 0x3b0   : > { %v5403_v15 = vpop.f32.mrf.mxu0  ;;  %v5467_v44 = vpop.f32.mrf.mxu1 }
 0x3b1   : > { %v3309_v9 = vadd.f32 %v5466_v3, %v5402_v18 }
 0x3b2   : > { %v5404_v27 = vpop.f32.mrf.mxu0  ;;  %v5468_v63 = vpop.f32.mrf.mxu1 }
 0x3b3   : > { %v8619_v40 = vadd.f32 %v3309_v9, %v1895_v23  ;;  %v5405_v34 = vadd.f32 %v5404_v27, %v5403_v15  ;;  %v5469_v52 = vadd.f32 %v5468_v63, %v5467_v44 }
 0x3b4   : > { %v5406_v57 = vpop.f32.mrf.mxu0  ;;  %v5470_v41 = vpop.f32.mrf.mxu1 }
 0x3b5   : > { %v3312_v5 = vadd.f32 %v5469_v52, %v5405_v34 }
 0x3b6   : > { %v5407_v37 = vpop.f32.mrf.mxu0  ;;  %v5471_v21 = vpop.f32.mrf.mxu1 }
 0x3b7   : > { %v8623_v12 = vadd.f32 %v3312_v5, %v1896_v33  ;;  %v5408_v29 = vadd.f32 %v5407_v37, %v5406_v57  ;;  %v5472_v62 = vadd.f32 %v5471_v21, %v5470_v41 }
 0x3b8   : > { %v5409_v48 = vpop.f32.mrf.mxu0  ;;  %v5473_v35 = vpop.f32.mrf.mxu1 }
 0x3b9   : > { %v3317_v32 = vadd.f32 %v5472_v62, %v5408_v29 }
 0x3ba   : > { %v5410_v53 = vpop.f32.mrf.mxu0  ;;  %v5474_v54 = vpop.f32.mrf.mxu1 }
 0x3bb   : > { %v8627_v11 = vadd.f32 %v3317_v32, %v1897_v0  ;;  %v5411_v31 = vadd.f32 %v5410_v53, %v5409_v48  ;;  %v5475_v60 = vadd.f32 %v5474_v54, %v5473_v35 }
 0x3bc   : > { %v3919_v45 = vpop.f32.mrf.mxu0  ;;  %v4032_v8 = vpop.f32.mrf.mxu1 }
 0x3bd   : > { %v3320_v16 = vadd.f32 %v5475_v60, %v5411_v31 }
 0x3be   : > { %v3921_v22 = vpop.f32.mrf.mxu0  ;;  %v4034_v17 = vpop.f32.mrf.mxu1 }
 0x3bf   : > { %v8631_v19 = vadd.f32 %v3320_v16, %v1898_v38 }
 0x3c0   : > { %v3923_v36 = vpop.f32.mrf.mxu0  ;;  %v4036_v61 = vpop.f32.mrf.mxu1 }
 0x3c1   : > { %v4111_v6 = vpack.c.bf16 %v3923_v36, %v3919_v45  ;;  %v4113_v10 = vpack.c.bf16 %v4036_v61, %v4032_v8 }
 0x3c2   : > { %v3925_v42 = vpop.f32.mrf.mxu0  ;;  %v4038_v25 = vpop.f32.mrf.mxu1 }
 0x3c3   : > { %v4112_v7 = vpack.c.bf16 %v3925_v42, %v3921_v22  ;;  %v4114_v2 = vpack.c.bf16 %v4038_v25, %v4034_v17 }
 0x3c4   : > { %v3929_v59 = vpop.f32.mrf.mxu0  ;;  %v4042_v46 = vpop.f32.mrf.mxu1 }
 0x3c5   : > { %4432 = vmatprep.mubr.bf16.mxu0 %v4112_v7  ;;  %4529 = vmatprep.mubr.bf16.mxu1 %v4114_v2 }
 0x3c6   : > { %v3931_v39 = vpop.f32.mrf.mxu0  ;;  %v4044_v18 = vpop.f32.mrf.mxu1  ;;  %4433 = vmatmul.mubr.bf16.vlgmr.msra.gmra.mxu0 %v4111_v6  ;;  %4530 = vmatmul.mubr.bf16.vlgmr.msra.gmra.mxu1 %v4113_v10 }
 0x3c8   : > { %v3933_v51 = vpop.f32.mrf.mxu0  ;;  %v4046_v3 = vpop.f32.mrf.mxu1 }
 0x3c9   : > { %v4115_v9 = vpack.c.bf16 %v3933_v51, %v3929_v59  ;;  %v4117_v27 = vpack.c.bf16 %v4046_v3, %v4042_v46 }
 0x3ca   : > { %v3935_v15 = vpop.f32.mrf.mxu0  ;;  %v4048_v44 = vpop.f32.mrf.mxu1 }
 0x3cb   : > { %v4116_v13 = vpack.c.bf16 %v3935_v15, %v3931_v39  ;;  %v4118_v23 = vpack.c.bf16 %v4048_v44, %v4044_v18 }
 0x3cc   : > { %v3939_v63 = vpop.f32.mrf.mxu0  ;;  %v4052_v34 = vpop.f32.mrf.mxu1 }
 0x3cd   : > { %4440 = vmatprep.mubr.bf16.mxu0 %v4116_v13  ;;  %4537 = vmatprep.mubr.bf16.mxu1 %v4118_v23 }
 0x3ce   : > { %v3941_v52 = vpop.f32.mrf.mxu0  ;;  %v4054_v57 = vpop.f32.mrf.mxu1  ;;  %4441 = vmatmul.mubr.bf16.gmra.mxu0 %v4115_v9  ;;  %4538 = vmatmul.mubr.bf16.gmra.mxu1 %v4117_v27 }
 0x3d0   : > { %v3943_v41 = vpop.f32.mrf.mxu0  ;;  %v4056_v47 = vpop.f32.mrf.mxu1 }
 0x3d1   : > { %v4119_v29 = vpack.c.bf16 %v3943_v41, %v3939_v63  ;;  %v4121_v62 = vpack.c.bf16 %v4056_v47, %v4052_v34 }
 0x3d2   : > { %v3945_v33 = vpop.f32.mrf.mxu0  ;;  %v4058_v5 = vpop.f32.mrf.mxu1 }
 0x3d3   : > { %v4120_v37 = vpack.c.bf16 %v3945_v33, %v3941_v52  ;;  %v4122_v21 = vpack.c.bf16 %v4058_v5, %v4054_v57 }
 0x3d4   : > { %v3949_v48 = vpop.f32.mrf.mxu0  ;;  %v4062_v35 = vpop.f32.mrf.mxu1 }
 0x3d5   : > { %4448 = vmatprep.mubr.bf16.mxu0 %v4120_v37  ;;  %4545 = vmatprep.mubr.bf16.mxu1 %v4122_v21 }
 0x3d6   : > { %v3951_v43 = vpop.f32.mrf.mxu0  ;;  %v4064_v0 = vpop.f32.mrf.mxu1  ;;  %4449 = vmatmul.mubr.bf16.gmra.mxu0 %v4119_v29  ;;  %4546 = vmatmul.mubr.bf16.gmra.mxu1 %v4121_v62 }
 0x3d8   : > { %v3953_v32 = vpop.f32.mrf.mxu0  ;;  %v4066_v53 = vpop.f32.mrf.mxu1 }
 0x3d9   : > { %v4123_v8 = vpack.c.bf16 %v3953_v32, %v3949_v48  ;;  %v4125_v56 = vpack.c.bf16 %v4066_v53, %v4062_v35 }
 0x3da   : > { %v3955_v54 = vpop.f32.mrf.mxu0  ;;  %v4068_v31 = vpop.f32.mrf.mxu1 }
 0x3db   : > { %v4124_v60 = vpack.c.bf16 %v3955_v54, %v3951_v43  ;;  %v4126_v45 = vpack.c.bf16 %v4068_v31, %v4064_v0 }
 0x3dc   : > { %v3959_v38 = vpop.f32.mrf.mxu0  ;;  %v4072_v16 = vpop.f32.mrf.mxu1 }
 0x3dd   : > { %4456 = vmatprep.mubr.bf16.mxu0 %v4124_v60  ;;  %4553 = vmatprep.mubr.bf16.mxu1 %v4126_v45 }
 0x3de   : > { %v3961_v22 = vpop.f32.mrf.mxu0  ;;  %v4074_v17 = vpop.f32.mrf.mxu1  ;;  %4457 = vmatmul.mubr.bf16.gmra.mxu0 %v4123_v8  ;;  %4554 = vmatmul.mubr.bf16.gmra.mxu1 %v4125_v56 }
 0x3e0   : > { %v3963_v36 = vpop.f32.mrf.mxu0  ;;  %v4076_v61 = vpop.f32.mrf.mxu1 }
 0x3e1   : > { %v4127_v6 = vpack.c.bf16 %v3963_v36, %v3959_v38  ;;  %v4129_v10 = vpack.c.bf16 %v4076_v61, %v4072_v16 }
 0x3e2   : > { %v3965_v42 = vpop.f32.mrf.mxu0  ;;  %v4078_v25 = vpop.f32.mrf.mxu1 }
 0x3e3   : > { %v4128_v7 = vpack.c.bf16 %v3965_v42, %v3961_v22  ;;  %v4130_v2 = vpack.c.bf16 %v4078_v25, %v4074_v17 }
 0x3e4   : > { %v3969_v59 = vpop.f32.mrf.mxu0  ;;  %v4082_v46 = vpop.f32.mrf.mxu1 }
 0x3e5   : > { %4464 = vmatprep.mubr.bf16.mxu0 %v4128_v7  ;;  %4561 = vmatprep.mubr.bf16.mxu1 %v4130_v2 }
 0x3e6   : > { %v3971_v39 = vpop.f32.mrf.mxu0  ;;  %v4084_v18 = vpop.f32.mrf.mxu1  ;;  %4465 = vmatmul.mubr.bf16.gmra.mxu0 %v4127_v6  ;;  %4562 = vmatmul.mubr.bf16.gmra.mxu1 %v4129_v10 }
 0x3e8   : > { %v3973_v51 = vpop.f32.mrf.mxu0  ;;  %v4086_v3 = vpop.f32.mrf.mxu1 }
 0x3e9   : > { %v4131_v9 = vpack.c.bf16 %v3973_v51, %v3969_v59  ;;  %v4133_v27 = vpack.c.bf16 %v4086_v3, %v4082_v46 }
 0x3ea   : > { %v3975_v15 = vpop.f32.mrf.mxu0  ;;  %v4088_v44 = vpop.f32.mrf.mxu1 }
 0x3eb   : > { %v4132_v13 = vpack.c.bf16 %v3975_v15, %v3971_v39  ;;  %v4134_v23 = vpack.c.bf16 %v4088_v44, %v4084_v18 }
 0x3ec   : > { %v3979_v63 = vpop.f32.mrf.mxu0  ;;  %v4092_v34 = vpop.f32.mrf.mxu1 }
 0x3ed   : > { %4472 = vmatprep.mubr.bf16.mxu0 %v4132_v13  ;;  %4569 = vmatprep.mubr.bf16.mxu1 %v4134_v23 }
 0x3ee   : > { %v3981_v52 = vpop.f32.mrf.mxu0  ;;  %v4094_v57 = vpop.f32.mrf.mxu1  ;;  %4473 = vmatmul.mubr.bf16.gmra.mxu0 %v4131_v9  ;;  %4570 = vmatmul.mubr.bf16.gmra.mxu1 %v4133_v27 }
 0x3f0   : > { %v3983_v41 = vpop.f32.mrf.mxu0  ;;  %v4096_v47 = vpop.f32.mrf.mxu1 }
 0x3f1   : > { %v4135_v29 = vpack.c.bf16 %v3983_v41, %v3979_v63  ;;  %v4137_v62 = vpack.c.bf16 %v4096_v47, %v4092_v34 }
 0x3f2   : > { %v3985_v33 = vpop.f32.mrf.mxu0  ;;  %v4098_v5 = vpop.f32.mrf.mxu1 }
 0x3f3   : > { %v4136_v37 = vpack.c.bf16 %v3985_v33, %v3981_v52  ;;  %v4138_v21 = vpack.c.bf16 %v4098_v5, %v4094_v57 }
 0x3f4   : > { %v3989_v48 = vpop.f32.mrf.mxu0  ;;  %v4102_v35 = vpop.f32.mrf.mxu1 }
 0x3f5   : > { %4480 = vmatprep.mubr.bf16.mxu0 %v4136_v37  ;;  %4577 = vmatprep.mubr.bf16.mxu1 %v4138_v21 }
 0x3f6   : > { %v3991_v43 = vpop.f32.mrf.mxu0  ;;  %v4104_v0 = vpop.f32.mrf.mxu1  ;;  %4481 = vmatmul.mubr.bf16.gmra.mxu0 %v4135_v29  ;;  %4578 = vmatmul.mubr.bf16.gmra.mxu1 %v4137_v62 }
 0x3f8   : > { %v3993_v32 = vpop.f32.mrf.mxu0  ;;  %v4106_v53 = vpop.f32.mrf.mxu1 }
 0x3f9   : > { %v4139_v8 = vpack.c.bf16 %v3993_v32, %v3989_v48  ;;  %v4141_v56 = vpack.c.bf16 %v4106_v53, %v4102_v35 }
 0x3fa   : > { %v3995_v54 = vpop.f32.mrf.mxu0  ;;  %v4108_v31 = vpop.f32.mrf.mxu1 }
 0x3fb   : > { %v4140_v60 = vpack.c.bf16 %v3995_v54, %v3991_v43  ;;  %v4142_v45 = vpack.c.bf16 %v4108_v31, %v4104_v0 }
 0x3fd   : > { %4488 = vmatprep.mubr.bf16.mxu0 %v4140_v60  ;;  %4585 = vmatprep.mubr.bf16.mxu1 %v4142_v45 }
 0x3fe   : > { %4489 = vmatmul.mubr.bf16.gmra.mxu0 %v4139_v8  ;;  %4586 = vmatmul.mubr.bf16.gmra.mxu1 %v4141_v56 }
 0x486   : > { %v5492_v38 = vpop.f32.mrf.mxu0  ;;  %v5556_v16 = vpop.f32.mrf.mxu1 }
 0x488   : > { %v5493_v22 = vpop.f32.mrf.mxu0  ;;  %v5557_v17 = vpop.f32.mrf.mxu1 }
 0x489   : > { %v5494_v36 = vadd.f32 %v5493_v22, %v5492_v38  ;;  %v5558_v61 = vadd.f32 %v5557_v17, %v5556_v16 }
 0x48a   : > { %v5495_v42 = vpop.f32.mrf.mxu0  ;;  %v5559_v25 = vpop.f32.mrf.mxu1 }
 0x48b   : > { %v4532_v7 = vadd.f32 %v5558_v61, %v5494_v36 }
 0x48c   : > { %v5496_v2 = vpop.f32.mrf.mxu0  ;;  %v5560_v6 = vpop.f32.mrf.mxu1 }
 0x48d   : > { %v5497_v10 = vadd.f32 %v5496_v2, %v5495_v42  ;;  %v5561_v59 = vadd.f32 %v5560_v6, %v5559_v25  ;;  %v4594_v46 = vadd.f32 %v4532_v7, %v8571_v4 }
 0x48e   : > { %v5498_v39 = vpop.f32.mrf.mxu0  ;;  %v5562_v18 = vpop.f32.mrf.mxu1 }
 0x48f   : > { %v4535_v51 = vadd.f32 %v5561_v59, %v5497_v10  ;;  %v4610_v3 = vmax.f32 %v4594_v46, 0.0 }
 0x490   : > { %v5499_v15 = vpop.f32.mrf.mxu0  ;;  %v5563_v44 = vpop.f32.mrf.mxu1 }
 0x491   : > { %v5500_v13 = vadd.f32 %v5499_v15, %v5498_v39  ;;  %v5564_v23 = vadd.f32 %v5563_v44, %v5562_v18  ;;  %4626 = vxpose.xlu0.b32.start [1/16] (narrow) %v4610_v3, 8  ;;  %v4595_v9 = vadd.f32 %v4535_v51, %v8575_v55 }
 0x492   : > { %v5501_v27 = vpop.f32.mrf.mxu0  ;;  %v5565_v63 = vpop.f32.mrf.mxu1 }
 0x493   : > { %v4540_v34 = vadd.f32 %v5564_v23, %v5500_v13  ;;  %v4611_v52 = vmax.f32 %v4595_v9, 0.0 }
 0x494   : > { %v5502_v57 = vpop.f32.mrf.mxu0  ;;  %v5566_v41 = vpop.f32.mrf.mxu1 }
 0x495   : > { %v5503_v47 = vadd.f32 %v5502_v57, %v5501_v27  ;;  %v5567_v33 = vadd.f32 %v5566_v41, %v5565_v63  ;;  %4627 = vxpose.xlu0.b32.cont [2/16] (narrow) %v4611_v52, 8  ;;  %v4596_v4 = vadd.f32 %v4540_v34, %v8579_v24 }
 0x496   : > { %v5504_v5 = vpop.f32.mrf.mxu0  ;;  %v5568_v37 = vpop.f32.mrf.mxu1 }
 0x497   : > { %v4543_v21 = vadd.f32 %v5567_v33, %v5503_v47  ;;  %v4612_v29 = vmax.f32 %v4596_v4, 0.0 }
 0x498   : > { %v5505_v62 = vpop.f32.mrf.mxu0  ;;  %v5569_v48 = vpop.f32.mrf.mxu1 }
 0x499   : > { %v5506_v35 = vadd.f32 %v5505_v62, %v5504_v5  ;;  %v5570_v43 = vadd.f32 %v5569_v48, %v5568_v37  ;;  %4628 = vxpose.xlu0.b32.cont [3/16] (narrow) %v4612_v29, 8  ;;  %v4597_v55 = vadd.f32 %v4543_v21, %v8583_v20 }
 0x49a   : > { %v5507_v0 = vpop.f32.mrf.mxu0  ;;  %v5571_v32 = vpop.f32.mrf.mxu1 }
 0x49b   : > { %v4548_v53 = vadd.f32 %v5570_v43, %v5506_v35  ;;  %v4613_v54 = vmax.f32 %v4597_v55, 0.0 }
 0x49c   : > { %v5508_v31 = vpop.f32.mrf.mxu0  ;;  %v5572_v60 = vpop.f32.mrf.mxu1 }
 0x49d   : > { %v5509_v45 = vadd.f32 %v5508_v31, %v5507_v0  ;;  %v5573_v8 = vadd.f32 %v5572_v60, %v5571_v32  ;;  %4629 = vxpose.xlu0.b32.cont [4/16] (narrow) %v4613_v54, 8  ;;  %v4598_v24 = vadd.f32 %v4548_v53, %v8587_v14 }
 0x49e   : > { %v5510_v56 = vpop.f32.mrf.mxu0  ;;  %v5574_v38 = vpop.f32.mrf.mxu1 }
 0x49f   : > { %v4551_v16 = vadd.f32 %v5573_v8, %v5509_v45  ;;  %v4614_v22 = vmax.f32 %v4598_v24, 0.0 }
 0x4a0   : > { %v5511_v17 = vpop.f32.mrf.mxu0  ;;  %v5575_v36 = vpop.f32.mrf.mxu1 }
 0x4a1   : > { %v5512_v61 = vadd.f32 %v5511_v17, %v5510_v56  ;;  %v5576_v42 = vadd.f32 %v5575_v36, %v5574_v38  ;;  %4630 = vxpose.xlu0.b32.cont [5/16] (narrow) %v4614_v22, 8  ;;  %v4599_v20 = vadd.f32 %v4551_v16, %v8591_v26 }
 0x4a2   : > { %v5513_v25 = vpop.f32.mrf.mxu0  ;;  %v5577_v7 = vpop.f32.mrf.mxu1 }
 0x4a3   : > { %v4556_v2 = vadd.f32 %v5576_v42, %v5512_v61  ;;  %v4615_v6 = vmax.f32 %v4599_v20, 0.0 }
 0x4a4   : > { %v5514_v10 = vpop.f32.mrf.mxu0  ;;  %v5578_v59 = vpop.f32.mrf.mxu1 }
 0x4a5   : > { %v5515_v46 = vadd.f32 %v5514_v10, %v5513_v25  ;;  %v5579_v39 = vadd.f32 %v5578_v59, %v5577_v7  ;;  %4631 = vxpose.xlu0.b32.cont [6/16] (narrow) %v4615_v6, 8  ;;  %v4600_v14 = vadd.f32 %v4556_v2, %v8595_v1 }
 0x4a6   : > { %v5516_v18 = vpop.f32.mrf.mxu0  ;;  %v5580_v51 = vpop.f32.mrf.mxu1 }
 0x4a7   : > { %v4559_v3 = vadd.f32 %v5579_v39, %v5515_v46  ;;  %v4616_v15 = vmax.f32 %v4600_v14, 0.0 }
 0x4a8   : > { %v5517_v44 = vpop.f32.mrf.mxu0  ;;  %v5581_v13 = vpop.f32.mrf.mxu1 }
 0x4a9   : > { %v5518_v23 = vadd.f32 %v5517_v44, %v5516_v18  ;;  %v5582_v9 = vadd.f32 %v5581_v13, %v5580_v51  ;;  %4632 = vxpose.xlu0.b32.cont [7/16] (narrow) %v4616_v15, 8  ;;  %v4601_v26 = vadd.f32 %v4559_v3, %v8599_v30 }
 0x4aa   : > { %v5519_v27 = vpop.f32.mrf.mxu0  ;;  %v5583_v63 = vpop.f32.mrf.mxu1 }
 0x4ab   : > { %v4564_v34 = vadd.f32 %v5582_v9, %v5518_v23  ;;  %v4617_v52 = vmax.f32 %v4601_v26, 0.0 }
 0x4ac   : > { %v5520_v57 = vpop.f32.mrf.mxu0  ;;  %v5584_v41 = vpop.f32.mrf.mxu1 }
 0x4ad   : > { %v5521_v47 = vadd.f32 %v5520_v57, %v5519_v27  ;;  %v5585_v33 = vadd.f32 %v5584_v41, %v5583_v63  ;;  %4633 = vxpose.xlu0.b32.cont [8/16] (narrow) %v4617_v52, 8  ;;  %v4602_v1 = vadd.f32 %v4564_v34, %v8603_v50 }
 0x4ae   : > { %v5522_v4 = vpop.f32.mrf.mxu0  ;;  %v5586_v5 = vpop.f32.mrf.mxu1 }
 0x4af   : > { %v4567_v37 = vadd.f32 %v5585_v33, %v5521_v47  ;;  %v4618_v21 = vmax.f32 %v4602_v1, 0.0 }
 0x4b0   : > { %v5523_v29 = vpop.f32.mrf.mxu0  ;;  %v5587_v62 = vpop.f32.mrf.mxu1 }
 0x4b1   : > { %v5524_v48 = vadd.f32 %v5523_v29, %v5522_v4  ;;  %v5588_v35 = vadd.f32 %v5587_v62, %v5586_v5  ;;  %4634 = vxpose.xlu0.b32.cont [9/16] (narrow) %v4618_v21, 8  ;;  %v4603_v30 = vadd.f32 %v4567_v37, %v8607_v28 }
 0x4b2   : > { %v5525_v43 = vpop.f32.mrf.mxu0  ;;  %v5589_v55 = vpop.f32.mrf.mxu1 }
 0x4b3   : > { %v4572_v0 = vadd.f32 %v5588_v35, %v5524_v48  ;;  %v4619_v32 = vmax.f32 %v4603_v30, 0.0 }
 0x4b4   : > { %v5526_v53 = vpop.f32.mrf.mxu0  ;;  %v5590_v54 = vpop.f32.mrf.mxu1 }
 0x4b5   : > { %v5527_v31 = vadd.f32 %v5526_v53, %v5525_v43  ;;  %v5591_v60 = vadd.f32 %v5590_v54, %v5589_v55  ;;  %4635 = vxpose.xlu0.b32.cont [10/16] (narrow) %v4619_v32, 8  ;;  %v4604_v50 = vadd.f32 %v4572_v0, %v8611_v49 }
 0x4b6   : > { %v5528_v45 = vpop.f32.mrf.mxu0  ;;  %v5592_v8 = vpop.f32.mrf.mxu1 }
 0x4b7   : > { %v4575_v24 = vadd.f32 %v5591_v60, %v5527_v31  ;;  %v4620_v56 = vmax.f32 %v4604_v50, 0.0 }
 0x4b8   : > { %v5529_v38 = vpop.f32.mrf.mxu0  ;;  %v5593_v16 = vpop.f32.mrf.mxu1 }
 0x4b9   : > { %v5530_v22 = vadd.f32 %v5529_v38, %v5528_v45  ;;  %v5594_v17 = vadd.f32 %v5593_v16, %v5592_v8  ;;  %4636 = vxpose.xlu0.b32.cont [11/16] (narrow) %v4620_v56, 8  ;;  %v4605_v28 = vadd.f32 %v4575_v24, %v8615_v58 }
 0x4ba   : > { %v5531_v36 = vpop.f32.mrf.mxu0  ;;  %v5595_v61 = vpop.f32.mrf.mxu1 }
 0x4bb   : > { %v4580_v42 = vadd.f32 %v5594_v17, %v5530_v22  ;;  %v4621_v20 = vmax.f32 %v4605_v28, 0.0 }
 0x4bc   : > { %v5532_v25 = vpop.f32.mrf.mxu0  ;;  %v5596_v7 = vpop.f32.mrf.mxu1 }
 0x4bd   : > { %v5533_v2 = vadd.f32 %v5532_v25, %v5531_v36  ;;  %v5597_v6 = vadd.f32 %v5596_v7, %v5595_v61  ;;  %4637 = vxpose.xlu0.b32.cont [12/16] (narrow) %v4621_v20, 8  ;;  %v4606_v49 = vadd.f32 %v4580_v42, %v8619_v40 }
 0x4be   : > { %v5534_v10 = vpop.f32.mrf.mxu0  ;;  %v5598_v59 = vpop.f32.mrf.mxu1 }
 0x4bf   : > { %v4583_v46 = vadd.f32 %v5597_v6, %v5533_v2  ;;  %v4622_v39 = vmax.f32 %v4606_v49, 0.0 }
 0x4c0   : > { %v5535_v14 = vpop.f32.mrf.mxu0  ;;  %v5599_v18 = vpop.f32.mrf.mxu1 }
 0x4c1   : > { %v5536_v51 = vadd.f32 %v5535_v14, %v5534_v10  ;;  %v5600_v3 = vadd.f32 %v5599_v18, %v5598_v59  ;;  %4638 = vxpose.xlu0.b32.cont [13/16] (narrow) %v4622_v39, 8  ;;  %v4607_v58 = vadd.f32 %v4583_v46, %v8623_v12 }
 0x4c2   : > { %v5537_v15 = vpop.f32.mrf.mxu0  ;;  %v5601_v44 = vpop.f32.mrf.mxu1 }
 0x4c3   : > { %v4588_v13 = vadd.f32 %v5600_v3, %v5536_v51  ;;  %v4623_v23 = vmax.f32 %v4607_v58, 0.0 }
 0x4c4   : > { %v5538_v9 = vpop.f32.mrf.mxu0  ;;  %v5602_v40 = vpop.f32.mrf.mxu1 }
 0x4c5   : > { %v5539_v26 = vadd.f32 %v5538_v9, %v5537_v15  ;;  %v5603_v27 = vadd.f32 %v5602_v40, %v5601_v44  ;;  %4639 = vxpose.xlu0.b32.cont [14/16] (narrow) %v4623_v23, 8  ;;  %v4608_v63 = vadd.f32 %v4588_v13, %v8627_v11 }
 0x4c7   : > { %v4591_v34 = vadd.f32 %v5603_v27, %v5539_v26  ;;  %v4624_v52 = vmax.f32 %v4608_v63, 0.0 }
 0x4c9   : > { %4640 = vxpose.xlu0.b32.cont [15/16] (narrow) %v4624_v52, 8  ;;  %v4609_v57 = vadd.f32 %v4591_v34, %v8631_v19 }
 0x4cb   : > { %v4625_v12 = vmax.f32 %v4609_v57, 0.0 }
 0x4cd   : > { %4641 = vxpose.xlu0.b32.end [16/16] (narrow) %v4625_v12, 8 }
 0x50d   : > { %v4642_v11 = vpop.trf.xlu0 }
 0x50e   : > { %4658 = vst [vmem:[%s204_s9] sm:$0xf] %v4642_v11 }
 0x50f   : > { %5896 = shalt.err (!%p5893_p6)
}
 0x510   : > { %s5897_s8 = scalar_lea.hbm %s4673_s5, 64  ;;  %s5901_s6 = scalar_lea.hbm %s8705_s4, 256 }
 0x511   : > { %p5898_p7 = scmp.ne.s32.totalorder %s4673_s5, %s5897_s8  ;;  %p5902_p11 = scmp.lt.s32.totalorder %s4673_s5, %s8705_s4 }
 0x512   : > { %p5903_p12 = scmp.lt.s32.totalorder %s5901_s6, %s5897_s8 }
 0x513   : > { %p5899_p9 = pnand %p5898_p7, %p6063_p3 }
 0x514   : > { %p5904_p13 = por %p5903_p12, %p5902_p11 }
 0x515   : > { %p5900_p10 = pneg %p5899_p9 }
 0x517   : > { %p5905_p0 = pnand %p5904_p13, %p5900_p10 }
 0x519   : > { %5908 = shalt.err (!%p5905_p0)
}
 0x51a   : > { %5605 = dma.vmem_to_hbm [thread:$0]  (%p6063_p3), %s8652_s23, 64, %s4673_s5, %s4660_s10  }
 0x51b PF: > { %p5611_p1 = scmp.ge.s32.totalorder %s5975_s22, 2  ;;  %s4687_s12 = sand.u32 1, %s5947_s15  }
 0x51c   : > { %s4688_s24 = scalar_lea.sflag [#allocation3], %s4687_s12 }
 0x51d   : > { %p5608_p2 = pnand %p5611_p1, %p6072_p8 }
 0x51f   : > { %p5609_p4 = pneg %p5608_p2 }
 0x521   : > { %5942 = dma.done.wait (%p5609_p4), %s4688_s24, 64  }
 0x522   : > { %5944 = vsyncadd (%p5609_p4), %s4688_s24, 4294967232  ;;  %s17_s22 = sadd.s32 1, %s5975_s22   ;;  %s9060_s15 = smov %s5951_s16 }
 0x523   : > { %p14_p5 = scmp.ge.s32.totalorder %s17_s22, 6   ;;  %s9061_s16 = smov %s5955_s17 }
 0x524   : > { %s9062_s17 = smov %s6081_s7  ;;  %s9063_s18 = smov %s5967_s20 }
 0x525   : > { %s9064_s19 = smov %s5971_s21  ;;  %s9065_s20 = smov %s9068_s25 }
 0x526   : > { %s9066_s21 = smov %s9072_s26  ;;  %16 = sbr.rel (!%p14_p5) target bundleno = 5 (0x5), region = 76 }
 0x52b   :  { %4693 = vsyncpa [#allocation3], 1 }
 0x52c   :  { %4695 = vsyncpa [#allocation3 + $0x1], 1 }

</bundles_post_ra>
